<compile_context>
chip_gen: v7x
topology: tpu7x:2x2x1
jax: 0.10.0
libtpu: 0.0.40
codegen_flags: <defaults>
</compile_context>

<pallas_src>
import math

import jax
import jax.numpy as jnp
from jax.experimental import pallas as pl
from jax.experimental.pallas import tpu as pltpu

NEG_SLOPE = 0.01   # torch.nn.LeakyReLU default
BN_EPS = 1e-5      # torch.nn.BatchNorm1d default


# ----------------------------------------------------------------------------
# In-kernel building blocks (operate on loaded values + param Refs)
# ----------------------------------------------------------------------------
def _leaky_relu(y):
    # max(y, a*y) == LeakyReLU(y) for 0 < a < 1 (identical result, fewer VALU ops)
    return jnp.maximum(y, NEG_SLOPE * y)


def _batchnorm_train(y, gamma, beta):
    # Training-mode BatchNorm1d: biased batch variance, eps = 1e-5.
    # One-pass stats -> the two sublane reductions are independent.
    mu = jnp.mean(y, axis=0, keepdims=True)
    msq = jnp.mean(y * y, axis=0, keepdims=True)
    var = jnp.maximum(msq - mu * mu, 0.0)   # guard tiny cancellation
    return (y - mu) * jax.lax.rsqrt(var + BN_EPS) * gamma + beta


def _linear_lrelu_parts(p, parts):
    # LeakyReLU( concat(parts, axis=1) @ W + b ) computed as a sum of partial
    # matmuls against sublane-aligned row blocks of W (no lane concat needed).
    w_ref, b_ref = p["w"], p["b"]
    off = 0
    acc = None
    for part in parts:
        d = part.shape[1]
        y = jnp.dot(part, w_ref[off:off + d, :],
                    preferred_element_type=jnp.float32)
        acc = y if acc is None else acc + y
        off += d
    return _leaky_relu(acc + b_ref[...])


def _linskip(p, x):
    # LinSkip = 3x [Linear -> LeakyReLU -> BatchNorm1d(train)] then + x
    h = x
    for i in range(3):  # static unroll
        y = jnp.dot(h, p["w"][i], preferred_element_type=jnp.float32) + p["b"][i]
        y = _leaky_relu(y)
        h = _batchnorm_train(y, p["g"][i], p["beta"][i])
    return h + x


def _ulayer_apply(p, x, c=None):
    # Recursive U structure, fully inside the kernel (static unroll).
    xc = _linear_lrelu_parts(p["down_lin"], (x,))
    xc = _linskip(p["down_skip1"], xc)
    xc = _linskip(p["down_skip2"], xc)
    if "inner" in p:
        h = _ulayer_apply(p["inner"], xc, c)
        up_in = (h, xc)                      # == torch.cat((h, xc), dim=1)
    else:
        up_in = (xc, c) if c is not None else (xc,)
    h = _linear_lrelu_parts(p["up_lin"], up_in)
    h = _linskip(p["up_skip1"], h)
    h = _linskip(p["up_skip2"], h)
    return h


# ----------------------------------------------------------------------------
# Fused pallas_call builder (single grid-less invocation, everything in VMEM)
# ----------------------------------------------------------------------------
def make_fused_ulayer(params, batch, udim, cdim=0):
    flat, treedef = jax.tree_util.tree_flatten(params)
    n_params = len(flat)
    n_data_in = 2 if cdim else 1

    def kernel(*refs):
        x_ref = refs[0]
        c_ref = refs[1] if cdim else None
        param_refs = refs[n_data_in:n_data_in + n_params]
        o_ref = refs[n_data_in + n_params]
        p = jax.tree_util.tree_unflatten(treedef, list(param_refs))
        c = c_ref[...] if c_ref is not None else None
        o_ref[...] = _ulayer_apply(p, x_ref[...], c).astype(o_ref.dtype)

    fused = pl.pallas_call(
        kernel,
        out_shape=jax.ShapeDtypeStruct((batch, udim), jnp.float32),
        in_specs=[pl.BlockSpec(memory_space=pltpu.MemorySpace.VMEM)]
        * (n_data_in + n_params),
        out_specs=pl.BlockSpec(memory_space=pltpu.MemorySpace.VMEM),
    )

    @jax.jit
    def run(x, c=None):
        args = (x, c) if cdim else (x,)
        return fused(*args, *flat)

    return run


# ----------------------------------------------------------------------------
# Deterministic parameter initialization (PyTorch-like shapes, arrays only)
# ----------------------------------------------------------------------------
def init_linear(key, din, dout):
    k1, k2 = jax.random.split(key)
    bound = 1.0 / math.sqrt(din)
    # stored as (din, dout) so the kernel computes x @ W + b
    w = jax.random.uniform(k1, (din, dout), jnp.float32, -bound, bound)
    b = jax.random.uniform(k2, (1, dout), jnp.float32, -bound, bound)
    return {"w": w, "b": b}


def init_linskip(key, dim):
    keys = jax.random.split(key, 5)
    ws, bs = [], []
    for i in range(3):
        p = init_linear(keys[i], dim, dim)
        ws.append(p["w"])
        bs.append(p["b"])
    w = jnp.stack(ws)                     # (3, dim, dim)
    b = jnp.stack(bs)                     # (3, 1, dim)
    g = 1.0 + 0.1 * jax.random.normal(keys[3], (3, 1, dim), jnp.float32)
    beta = 0.1 * jax.random.normal(keys[4], (3, 1, dim), jnp.float32)
    return {"w": w, "b": b, "g": g, "beta": beta}


def init_ulayer(key, udim, ddim, base, cdim=0):
    is_base = (base == 0)
    keys = jax.random.split(key, 7)
    params = {
        "down_lin": init_linear(keys[0], udim, ddim),
        "down_skip1": init_linskip(keys[1], ddim),
        "down_skip2": init_linskip(keys[2], ddim),
    }
    if is_base:
        params["up_lin"] = init_linear(keys[3], cdim + ddim, udim)
    else:
        # module requires udim == 2*ddim for the non-base up-projection
        params["inner"] = init_ulayer(keys[3], ddim, ddim // 2, base - 1, cdim)
        params["up_lin"] = init_linear(keys[4], udim, udim)
    params["up_skip1"] = init_linskip(keys[5], udim)
    params["up_skip2"] = init_linskip(keys[6], udim)
    return params


# ----------------------------------------------------------------------------
# Pure-JAX reference (straight translation of the PyTorch module) for checking
# ----------------------------------------------------------------------------
def _ref_forward(params, x, c=None):
    hp = jax.lax.Precision.HIGHEST

    def lin_lrelu(p, h):
        y = jnp.dot(h, p["w"], precision=hp) + p["b"]
        return jnp.where(y > 0, y, NEG_SLOPE * y)

    def bn(y, g, b):
        mu = jnp.mean(y, axis=0, keepdims=True)
        var = jnp.mean((y - mu) ** 2, axis=0, keepdims=True)
        return (y - mu) / jnp.sqrt(var + BN_EPS) * g + b

    def linskip(p, h0):
        h = h0
        for i in range(3):
            y = jnp.dot(h, p["w"][i], precision=hp) + p["b"][i]
            y = jnp.where(y > 0, y, NEG_SLOPE * y)
            h = bn(y, p["g"][i], p["beta"][i])
        return h + h0

    xc = lin_lrelu(params["down_lin"], x)
    xc = linskip(params["down_skip1"], xc)
    xc = linskip(params["down_skip2"], xc)
    if "inner" in params:
        h = _ref_forward(params["inner"], xc, c)
        h = jnp.concatenate((h, xc), axis=1)
    else:
        h = xc
        if c is not None:
            h = jnp.concatenate((h, c), axis=1)
    h = lin_lrelu(params["up_lin"], h)
    h = linskip(params["up_skip1"], h)
    h = linskip(params["up_skip2"], h)
    return h


# ----------------------------------------------------------------------------
if __name__ == "__main__":
    key = jax.random.PRNGKey(0)
    kp, kx = jax.random.split(key)

    # ULayer(udim=32, ddim=16, base=1, cdim=0):
    #   one level of recursion (inner ULayer(16, 8, 0)), unconditional.
    B, UDIM, DDIM, BASE = 8, 32, 16, 1
    params = init_ulayer(kp, UDIM, DDIM, BASE, cdim=0)

    x = jax.random.normal(kx, (B, UDIM), jnp.float32)

    fwd = make_fused_ulayer(params, B, UDIM, cdim=0)
    out = fwd(x)
    jax.block_until_ready(out)

    assert out.shape == (B, UDIM) and out.dtype == jnp.float32
    assert bool(jnp.all(jnp.isfinite(out)))

    ref = _ref_forward(params, x)
    assert bool(jnp.allclose(out, ref, atol=1e-2, rtol=1e-2))

    print("KERNEL_OK")
</pallas_src>

<mosaic_0001>
module attributes {stable_mosaic.version = 11 : i64} {
  func.func @kernel(%arg0: memref<8x32xf32, #tpu.memory_space<vmem>>, %arg1: memref<1x16xf32, #tpu.memory_space<vmem>>, %arg2: memref<32x16xf32, #tpu.memory_space<vmem>>, %arg3: memref<3x1x16xf32, #tpu.memory_space<vmem>>, %arg4: memref<3x1x16xf32, #tpu.memory_space<vmem>>, %arg5: memref<3x1x16xf32, #tpu.memory_space<vmem>>, %arg6: memref<3x16x16xf32, #tpu.memory_space<vmem>>, %arg7: memref<3x1x16xf32, #tpu.memory_space<vmem>>, %arg8: memref<3x1x16xf32, #tpu.memory_space<vmem>>, %arg9: memref<3x1x16xf32, #tpu.memory_space<vmem>>, %arg10: memref<3x16x16xf32, #tpu.memory_space<vmem>>, %arg11: memref<1x8xf32, #tpu.memory_space<vmem>>, %arg12: memref<16x8xf32, #tpu.memory_space<vmem>>, %arg13: memref<3x1x8xf32, #tpu.memory_space<vmem>>, %arg14: memref<3x1x8xf32, #tpu.memory_space<vmem>>, %arg15: memref<3x1x8xf32, #tpu.memory_space<vmem>>, %arg16: memref<3x8x8xf32, #tpu.memory_space<vmem>>, %arg17: memref<3x1x8xf32, #tpu.memory_space<vmem>>, %arg18: memref<3x1x8xf32, #tpu.memory_space<vmem>>, %arg19: memref<3x1x8xf32, #tpu.memory_space<vmem>>, %arg20: memref<3x8x8xf32, #tpu.memory_space<vmem>>, %arg21: memref<1x16xf32, #tpu.memory_space<vmem>>, %arg22: memref<8x16xf32, #tpu.memory_space<vmem>>, %arg23: memref<3x1x16xf32, #tpu.memory_space<vmem>>, %arg24: memref<3x1x16xf32, #tpu.memory_space<vmem>>, %arg25: memref<3x1x16xf32, #tpu.memory_space<vmem>>, %arg26: memref<3x16x16xf32, #tpu.memory_space<vmem>>, %arg27: memref<3x1x16xf32, #tpu.memory_space<vmem>>, %arg28: memref<3x1x16xf32, #tpu.memory_space<vmem>>, %arg29: memref<3x1x16xf32, #tpu.memory_space<vmem>>, %arg30: memref<3x16x16xf32, #tpu.memory_space<vmem>>, %arg31: memref<1x32xf32, #tpu.memory_space<vmem>>, %arg32: memref<32x32xf32, #tpu.memory_space<vmem>>, %arg33: memref<3x1x32xf32, #tpu.memory_space<vmem>>, %arg34: memref<3x1x32xf32, #tpu.memory_space<vmem>>, %arg35: memref<3x1x32xf32, #tpu.memory_space<vmem>>, %arg36: memref<3x32x32xf32, #tpu.memory_space<vmem>>, %arg37: memref<3x1x32xf32, #tpu.memory_space<vmem>>, %arg38: memref<3x1x32xf32, #tpu.memory_space<vmem>>, %arg39: memref<3x1x32xf32, #tpu.memory_space<vmem>>, %arg40: memref<3x32x32xf32, #tpu.memory_space<vmem>>, %arg41: memref<8x32xf32, #tpu.memory_space<vmem>>) attributes {dimension_semantics = [], scalar_prefetch = 0 : i64, scratch_operands = 0 : i64, tpu.core_type = #tpu.core_type<tc>} {
    %c0 = arith.constant 0 : index
    %c0_0 = arith.constant 0 : index
    %0 = vector.load %arg0[%c0, %c0_0] : memref<8x32xf32, #tpu.memory_space<vmem>>, vector<8x32xf32>
    %c0_1 = arith.constant 0 : index
    %c0_2 = arith.constant 0 : index
    %1 = vector.load %arg2[%c0_1, %c0_2] : memref<32x16xf32, #tpu.memory_space<vmem>>, vector<32x16xf32>
    %cst = arith.constant dense<0.000000e+00> : vector<8x16xf32>
    %2 = tpu.matmul %0, %1, %cst {dimension_numbers = #tpu.dot_dimension_numbers<[1], [0], [0], [1], [0, 0, 1, 1], [], []>} : vector<8x32xf32>, vector<32x16xf32>, vector<8x16xf32> -> vector<8x16xf32>
    %c0_3 = arith.constant 0 : index
    %c0_4 = arith.constant 0 : index
    %3 = vector.load %arg1[%c0_3, %c0_4] : memref<1x16xf32, #tpu.memory_space<vmem>>, vector<1x16xf32>
    %4 = vector.broadcast %3 : vector<1x16xf32> to vector<8x16xf32>
    %5 = arith.addf %2, %4 : vector<8x16xf32>
    %cst_5 = arith.constant 0.00999999977 : f32
    %6 = vector.broadcast %cst_5 : f32 to vector<8x16xf32>
    %7 = arith.mulf %6, %5 : vector<8x16xf32>
    %8 = arith.maximumf %5, %7 : vector<8x16xf32>
    %c0_6 = arith.constant 0 : index
    %c0_7 = arith.constant 0 : index
    %c0_8 = arith.constant 0 : index
    %9 = vector.load %arg6[%c0_6, %c0_7, %c0_8] : memref<3x16x16xf32, #tpu.memory_space<vmem>>, vector<1x16x16xf32>
    %10 = vector.shape_cast %9 : vector<1x16x16xf32> to vector<16x16xf32>
    %cst_9 = arith.constant dense<0.000000e+00> : vector<8x16xf32>
    %11 = tpu.matmul %8, %10, %cst_9 {dimension_numbers = #tpu.dot_dimension_numbers<[1], [0], [0], [1], [0, 0, 1, 1], [], []>} : vector<8x16xf32>, vector<16x16xf32>, vector<8x16xf32> -> vector<8x16xf32>
    %c0_10 = arith.constant 0 : index
    %c0_11 = arith.constant 0 : index
    %c0_12 = arith.constant 0 : index
    %12 = vector.load %arg3[%c0_10, %c0_11, %c0_12] : memref<3x1x16xf32, #tpu.memory_space<vmem>>, vector<1x1x16xf32>
    %13 = vector.shape_cast %12 : vector<1x1x16xf32> to vector<1x16xf32>
    %14 = vector.broadcast %13 : vector<1x16xf32> to vector<8x16xf32>
    %15 = arith.addf %11, %14 : vector<8x16xf32>
    %cst_13 = arith.constant 0.00999999977 : f32
    %16 = vector.broadcast %cst_13 : f32 to vector<8x16xf32>
    %17 = arith.mulf %16, %15 : vector<8x16xf32>
    %18 = arith.maximumf %15, %17 : vector<8x16xf32>
    %c0_14 = arith.constant 0 : index
    %c0_15 = arith.constant 0 : index
    %c0_16 = arith.constant 0 : index
    %19 = vector.load %arg5[%c0_14, %c0_15, %c0_16] : memref<3x1x16xf32, #tpu.memory_space<vmem>>, vector<1x1x16xf32>
    %20 = vector.shape_cast %19 : vector<1x1x16xf32> to vector<1x16xf32>
    %c0_17 = arith.constant 0 : index
    %c0_18 = arith.constant 0 : index
    %c0_19 = arith.constant 0 : index
    %21 = vector.load %arg4[%c0_17, %c0_18, %c0_19] : memref<3x1x16xf32, #tpu.memory_space<vmem>>, vector<1x1x16xf32>
    %22 = vector.shape_cast %21 : vector<1x1x16xf32> to vector<1x16xf32>
    %cst_20 = arith.constant dense<0.000000e+00> : vector<16xf32>
    %23 = vector.multi_reduction <add>, %18, %cst_20 [0] : vector<8x16xf32> to vector<16xf32>
    %24 = vector.shape_cast %23 : vector<16xf32> to vector<1x16xf32>
    %cst_21 = arith.constant 8.000000e+00 : f32
    %25 = vector.broadcast %cst_21 : f32 to vector<1x16xf32>
    %26 = arith.divf %24, %25 : vector<1x16xf32>
    %27 = arith.mulf %18, %18 : vector<8x16xf32>
    %cst_22 = arith.constant dense<0.000000e+00> : vector<16xf32>
    %28 = vector.multi_reduction <add>, %27, %cst_22 [0] : vector<8x16xf32> to vector<16xf32>
    %29 = vector.shape_cast %28 : vector<16xf32> to vector<1x16xf32>
    %cst_23 = arith.constant 8.000000e+00 : f32
    %30 = vector.broadcast %cst_23 : f32 to vector<1x16xf32>
    %31 = arith.divf %29, %30 : vector<1x16xf32>
    %32 = arith.mulf %26, %26 : vector<1x16xf32>
    %33 = arith.subf %31, %32 : vector<1x16xf32>
    %cst_24 = arith.constant 0.000000e+00 : f32
    %34 = vector.broadcast %cst_24 : f32 to vector<1x16xf32>
    %35 = arith.maximumf %33, %34 : vector<1x16xf32>
    %36 = vector.broadcast %26 : vector<1x16xf32> to vector<8x16xf32>
    %37 = arith.subf %18, %36 : vector<8x16xf32>
    %cst_25 = arith.constant 9.99999974E-6 : f32
    %38 = vector.broadcast %cst_25 : f32 to vector<1x16xf32>
    %39 = arith.addf %35, %38 : vector<1x16xf32>
    %40 = math.rsqrt %39 : vector<1x16xf32>
    %41 = vector.broadcast %40 : vector<1x16xf32> to vector<8x16xf32>
    %42 = arith.mulf %37, %41 : vector<8x16xf32>
    %43 = vector.broadcast %20 : vector<1x16xf32> to vector<8x16xf32>
    %44 = arith.mulf %42, %43 : vector<8x16xf32>
    %45 = vector.broadcast %22 : vector<1x16xf32> to vector<8x16xf32>
    %46 = arith.addf %44, %45 : vector<8x16xf32>
    %c1 = arith.constant 1 : index
    %c0_26 = arith.constant 0 : index
    %c0_27 = arith.constant 0 : index
    %47 = vector.load %arg6[%c1, %c0_26, %c0_27] : memref<3x16x16xf32, #tpu.memory_space<vmem>>, vector<1x16x16xf32>
    %48 = vector.shape_cast %47 : vector<1x16x16xf32> to vector<16x16xf32>
    %cst_28 = arith.constant dense<0.000000e+00> : vector<8x16xf32>
    %49 = tpu.matmul %46, %48, %cst_28 {dimension_numbers = #tpu.dot_dimension_numbers<[1], [0], [0], [1], [0, 0, 1, 1], [], []>} : vector<8x16xf32>, vector<16x16xf32>, vector<8x16xf32> -> vector<8x16xf32>
    %c1_29 = arith.constant 1 : index
    %c0_30 = arith.constant 0 : index
    %c0_31 = arith.constant 0 : index
    %50 = vector.load %arg3[%c1_29, %c0_30, %c0_31] : memref<3x1x16xf32, #tpu.memory_space<vmem>>, vector<1x1x16xf32>
    %51 = vector.shape_cast %50 : vector<1x1x16xf32> to vector<1x16xf32>
    %52 = vector.broadcast %51 : vector<1x16xf32> to vector<8x16xf32>
    %53 = arith.addf %49, %52 : vector<8x16xf32>
    %cst_32 = arith.constant 0.00999999977 : f32
    %54 = vector.broadcast %cst_32 : f32 to vector<8x16xf32>
    %55 = arith.mulf %54, %53 : vector<8x16xf32>
    %56 = arith.maximumf %53, %55 : vector<8x16xf32>
    %c1_33 = arith.constant 1 : index
    %c0_34 = arith.constant 0 : index
    %c0_35 = arith.constant 0 : index
    %57 = vector.load %arg5[%c1_33, %c0_34, %c0_35] : memref<3x1x16xf32, #tpu.memory_space<vmem>>, vector<1x1x16xf32>
    %58 = vector.shape_cast %57 : vector<1x1x16xf32> to vector<1x16xf32>
    %c1_36 = arith.constant 1 : index
    %c0_37 = arith.constant 0 : index
    %c0_38 = arith.constant 0 : index
    %59 = vector.load %arg4[%c1_36, %c0_37, %c0_38] : memref<3x1x16xf32, #tpu.memory_space<vmem>>, vector<1x1x16xf32>
    %60 = vector.shape_cast %59 : vector<1x1x16xf32> to vector<1x16xf32>
    %cst_39 = arith.constant dense<0.000000e+00> : vector<16xf32>
    %61 = vector.multi_reduction <add>, %56, %cst_39 [0] : vector<8x16xf32> to vector<16xf32>
    %62 = vector.shape_cast %61 : vector<16xf32> to vector<1x16xf32>
    %cst_40 = arith.constant 8.000000e+00 : f32
    %63 = vector.broadcast %cst_40 : f32 to vector<1x16xf32>
    %64 = arith.divf %62, %63 : vector<1x16xf32>
    %65 = arith.mulf %56, %56 : vector<8x16xf32>
    %cst_41 = arith.constant dense<0.000000e+00> : vector<16xf32>
    %66 = vector.multi_reduction <add>, %65, %cst_41 [0] : vector<8x16xf32> to vector<16xf32>
    %67 = vector.shape_cast %66 : vector<16xf32> to vector<1x16xf32>
    %cst_42 = arith.constant 8.000000e+00 : f32
    %68 = vector.broadcast %cst_42 : f32 to vector<1x16xf32>
    %69 = arith.divf %67, %68 : vector<1x16xf32>
    %70 = arith.mulf %64, %64 : vector<1x16xf32>
    %71 = arith.subf %69, %70 : vector<1x16xf32>
    %cst_43 = arith.constant 0.000000e+00 : f32
    %72 = vector.broadcast %cst_43 : f32 to vector<1x16xf32>
    %73 = arith.maximumf %71, %72 : vector<1x16xf32>
    %74 = vector.broadcast %64 : vector<1x16xf32> to vector<8x16xf32>
    %75 = arith.subf %56, %74 : vector<8x16xf32>
    %cst_44 = arith.constant 9.99999974E-6 : f32
    %76 = vector.broadcast %cst_44 : f32 to vector<1x16xf32>
    %77 = arith.addf %73, %76 : vector<1x16xf32>
    %78 = math.rsqrt %77 : vector<1x16xf32>
    %79 = vector.broadcast %78 : vector<1x16xf32> to vector<8x16xf32>
    %80 = arith.mulf %75, %79 : vector<8x16xf32>
    %81 = vector.broadcast %58 : vector<1x16xf32> to vector<8x16xf32>
    %82 = arith.mulf %80, %81 : vector<8x16xf32>
    %83 = vector.broadcast %60 : vector<1x16xf32> to vector<8x16xf32>
    %84 = arith.addf %82, %83 : vector<8x16xf32>
    %c2 = arith.constant 2 : index
    %c0_45 = arith.constant 0 : index
    %c0_46 = arith.constant 0 : index
    %85 = vector.load %arg6[%c2, %c0_45, %c0_46] : memref<3x16x16xf32, #tpu.memory_space<vmem>>, vector<1x16x16xf32>
    %86 = vector.shape_cast %85 : vector<1x16x16xf32> to vector<16x16xf32>
    %cst_47 = arith.constant dense<0.000000e+00> : vector<8x16xf32>
    %87 = tpu.matmul %84, %86, %cst_47 {dimension_numbers = #tpu.dot_dimension_numbers<[1], [0], [0], [1], [0, 0, 1, 1], [], []>} : vector<8x16xf32>, vector<16x16xf32>, vector<8x16xf32> -> vector<8x16xf32>
    %c2_48 = arith.constant 2 : index
    %c0_49 = arith.constant 0 : index
    %c0_50 = arith.constant 0 : index
    %88 = vector.load %arg3[%c2_48, %c0_49, %c0_50] : memref<3x1x16xf32, #tpu.memory_space<vmem>>, vector<1x1x16xf32>
    %89 = vector.shape_cast %88 : vector<1x1x16xf32> to vector<1x16xf32>
    %90 = vector.broadcast %89 : vector<1x16xf32> to vector<8x16xf32>
    %91 = arith.addf %87, %90 : vector<8x16xf32>
    %cst_51 = arith.constant 0.00999999977 : f32
    %92 = vector.broadcast %cst_51 : f32 to vector<8x16xf32>
    %93 = arith.mulf %92, %91 : vector<8x16xf32>
    %94 = arith.maximumf %91, %93 : vector<8x16xf32>
    %c2_52 = arith.constant 2 : index
    %c0_53 = arith.constant 0 : index
    %c0_54 = arith.constant 0 : index
    %95 = vector.load %arg5[%c2_52, %c0_53, %c0_54] : memref<3x1x16xf32, #tpu.memory_space<vmem>>, vector<1x1x16xf32>
    %96 = vector.shape_cast %95 : vector<1x1x16xf32> to vector<1x16xf32>
    %c2_55 = arith.constant 2 : index
    %c0_56 = arith.constant 0 : index
    %c0_57 = arith.constant 0 : index
    %97 = vector.load %arg4[%c2_55, %c0_56, %c0_57] : memref<3x1x16xf32, #tpu.memory_space<vmem>>, vector<1x1x16xf32>
    %98 = vector.shape_cast %97 : vector<1x1x16xf32> to vector<1x16xf32>
    %cst_58 = arith.constant dense<0.000000e+00> : vector<16xf32>
    %99 = vector.multi_reduction <add>, %94, %cst_58 [0] : vector<8x16xf32> to vector<16xf32>
    %100 = vector.shape_cast %99 : vector<16xf32> to vector<1x16xf32>
    %cst_59 = arith.constant 8.000000e+00 : f32
    %101 = vector.broadcast %cst_59 : f32 to vector<1x16xf32>
    %102 = arith.divf %100, %101 : vector<1x16xf32>
    %103 = arith.mulf %94, %94 : vector<8x16xf32>
    %cst_60 = arith.constant dense<0.000000e+00> : vector<16xf32>
    %104 = vector.multi_reduction <add>, %103, %cst_60 [0] : vector<8x16xf32> to vector<16xf32>
    %105 = vector.shape_cast %104 : vector<16xf32> to vector<1x16xf32>
    %cst_61 = arith.constant 8.000000e+00 : f32
    %106 = vector.broadcast %cst_61 : f32 to vector<1x16xf32>
    %107 = arith.divf %105, %106 : vector<1x16xf32>
    %108 = arith.mulf %102, %102 : vector<1x16xf32>
    %109 = arith.subf %107, %108 : vector<1x16xf32>
    %cst_62 = arith.constant 0.000000e+00 : f32
    %110 = vector.broadcast %cst_62 : f32 to vector<1x16xf32>
    %111 = arith.maximumf %109, %110 : vector<1x16xf32>
    %112 = vector.broadcast %102 : vector<1x16xf32> to vector<8x16xf32>
    %113 = arith.subf %94, %112 : vector<8x16xf32>
    %cst_63 = arith.constant 9.99999974E-6 : f32
    %114 = vector.broadcast %cst_63 : f32 to vector<1x16xf32>
    %115 = arith.addf %111, %114 : vector<1x16xf32>
    %116 = math.rsqrt %115 : vector<1x16xf32>
    %117 = vector.broadcast %116 : vector<1x16xf32> to vector<8x16xf32>
    %118 = arith.mulf %113, %117 : vector<8x16xf32>
    %119 = vector.broadcast %96 : vector<1x16xf32> to vector<8x16xf32>
    %120 = arith.mulf %118, %119 : vector<8x16xf32>
    %121 = vector.broadcast %98 : vector<1x16xf32> to vector<8x16xf32>
    %122 = arith.addf %120, %121 : vector<8x16xf32>
    %123 = arith.addf %122, %8 : vector<8x16xf32>
    %c0_64 = arith.constant 0 : index
    %c0_65 = arith.constant 0 : index
    %c0_66 = arith.constant 0 : index
    %124 = vector.load %arg10[%c0_64, %c0_65, %c0_66] : memref<3x16x16xf32, #tpu.memory_space<vmem>>, vector<1x16x16xf32>
    %125 = vector.shape_cast %124 : vector<1x16x16xf32> to vector<16x16xf32>
    %cst_67 = arith.constant dense<0.000000e+00> : vector<8x16xf32>
    %126 = tpu.matmul %123, %125, %cst_67 {dimension_numbers = #tpu.dot_dimension_numbers<[1], [0], [0], [1], [0, 0, 1, 1], [], []>} : vector<8x16xf32>, vector<16x16xf32>, vector<8x16xf32> -> vector<8x16xf32>
    %c0_68 = arith.constant 0 : index
    %c0_69 = arith.constant 0 : index
    %c0_70 = arith.constant 0 : index
    %127 = vector.load %arg7[%c0_68, %c0_69, %c0_70] : memref<3x1x16xf32, #tpu.memory_space<vmem>>, vector<1x1x16xf32>
    %128 = vector.shape_cast %127 : vector<1x1x16xf32> to vector<1x16xf32>
    %129 = vector.broadcast %128 : vector<1x16xf32> to vector<8x16xf32>
    %130 = arith.addf %126, %129 : vector<8x16xf32>
    %cst_71 = arith.constant 0.00999999977 : f32
    %131 = vector.broadcast %cst_71 : f32 to vector<8x16xf32>
    %132 = arith.mulf %131, %130 : vector<8x16xf32>
    %133 = arith.maximumf %130, %132 : vector<8x16xf32>
    %c0_72 = arith.constant 0 : index
    %c0_73 = arith.constant 0 : index
    %c0_74 = arith.constant 0 : index
    %134 = vector.load %arg9[%c0_72, %c0_73, %c0_74] : memref<3x1x16xf32, #tpu.memory_space<vmem>>, vector<1x1x16xf32>
    %135 = vector.shape_cast %134 : vector<1x1x16xf32> to vector<1x16xf32>
    %c0_75 = arith.constant 0 : index
    %c0_76 = arith.constant 0 : index
    %c0_77 = arith.constant 0 : index
    %136 = vector.load %arg8[%c0_75, %c0_76, %c0_77] : memref<3x1x16xf32, #tpu.memory_space<vmem>>, vector<1x1x16xf32>
    %137 = vector.shape_cast %136 : vector<1x1x16xf32> to vector<1x16xf32>
    %cst_78 = arith.constant dense<0.000000e+00> : vector<16xf32>
    %138 = vector.multi_reduction <add>, %133, %cst_78 [0] : vector<8x16xf32> to vector<16xf32>
    %139 = vector.shape_cast %138 : vector<16xf32> to vector<1x16xf32>
    %cst_79 = arith.constant 8.000000e+00 : f32
    %140 = vector.broadcast %cst_79 : f32 to vector<1x16xf32>
    %141 = arith.divf %139, %140 : vector<1x16xf32>
    %142 = arith.mulf %133, %133 : vector<8x16xf32>
    %cst_80 = arith.constant dense<0.000000e+00> : vector<16xf32>
    %143 = vector.multi_reduction <add>, %142, %cst_80 [0] : vector<8x16xf32> to vector<16xf32>
    %144 = vector.shape_cast %143 : vector<16xf32> to vector<1x16xf32>
    %cst_81 = arith.constant 8.000000e+00 : f32
    %145 = vector.broadcast %cst_81 : f32 to vector<1x16xf32>
    %146 = arith.divf %144, %145 : vector<1x16xf32>
    %147 = arith.mulf %141, %141 : vector<1x16xf32>
    %148 = arith.subf %146, %147 : vector<1x16xf32>
    %cst_82 = arith.constant 0.000000e+00 : f32
    %149 = vector.broadcast %cst_82 : f32 to vector<1x16xf32>
    %150 = arith.maximumf %148, %149 : vector<1x16xf32>
    %151 = vector.broadcast %141 : vector<1x16xf32> to vector<8x16xf32>
    %152 = arith.subf %133, %151 : vector<8x16xf32>
    %cst_83 = arith.constant 9.99999974E-6 : f32
    %153 = vector.broadcast %cst_83 : f32 to vector<1x16xf32>
    %154 = arith.addf %150, %153 : vector<1x16xf32>
    %155 = math.rsqrt %154 : vector<1x16xf32>
    %156 = vector.broadcast %155 : vector<1x16xf32> to vector<8x16xf32>
    %157 = arith.mulf %152, %156 : vector<8x16xf32>
    %158 = vector.broadcast %135 : vector<1x16xf32> to vector<8x16xf32>
    %159 = arith.mulf %157, %158 : vector<8x16xf32>
    %160 = vector.broadcast %137 : vector<1x16xf32> to vector<8x16xf32>
    %161 = arith.addf %159, %160 : vector<8x16xf32>
    %c1_84 = arith.constant 1 : index
    %c0_85 = arith.constant 0 : index
    %c0_86 = arith.constant 0 : index
    %162 = vector.load %arg10[%c1_84, %c0_85, %c0_86] : memref<3x16x16xf32, #tpu.memory_space<vmem>>, vector<1x16x16xf32>
    %163 = vector.shape_cast %162 : vector<1x16x16xf32> to vector<16x16xf32>
    %cst_87 = arith.constant dense<0.000000e+00> : vector<8x16xf32>
    %164 = tpu.matmul %161, %163, %cst_87 {dimension_numbers = #tpu.dot_dimension_numbers<[1], [0], [0], [1], [0, 0, 1, 1], [], []>} : vector<8x16xf32>, vector<16x16xf32>, vector<8x16xf32> -> vector<8x16xf32>
    %c1_88 = arith.constant 1 : index
    %c0_89 = arith.constant 0 : index
    %c0_90 = arith.constant 0 : index
    %165 = vector.load %arg7[%c1_88, %c0_89, %c0_90] : memref<3x1x16xf32, #tpu.memory_space<vmem>>, vector<1x1x16xf32>
    %166 = vector.shape_cast %165 : vector<1x1x16xf32> to vector<1x16xf32>
    %167 = vector.broadcast %166 : vector<1x16xf32> to vector<8x16xf32>
    %168 = arith.addf %164, %167 : vector<8x16xf32>
    %cst_91 = arith.constant 0.00999999977 : f32
    %169 = vector.broadcast %cst_91 : f32 to vector<8x16xf32>
    %170 = arith.mulf %169, %168 : vector<8x16xf32>
    %171 = arith.maximumf %168, %170 : vector<8x16xf32>
    %c1_92 = arith.constant 1 : index
    %c0_93 = arith.constant 0 : index
    %c0_94 = arith.constant 0 : index
    %172 = vector.load %arg9[%c1_92, %c0_93, %c0_94] : memref<3x1x16xf32, #tpu.memory_space<vmem>>, vector<1x1x16xf32>
    %173 = vector.shape_cast %172 : vector<1x1x16xf32> to vector<1x16xf32>
    %c1_95 = arith.constant 1 : index
    %c0_96 = arith.constant 0 : index
    %c0_97 = arith.constant 0 : index
    %174 = vector.load %arg8[%c1_95, %c0_96, %c0_97] : memref<3x1x16xf32, #tpu.memory_space<vmem>>, vector<1x1x16xf32>
    %175 = vector.shape_cast %174 : vector<1x1x16xf32> to vector<1x16xf32>
    %cst_98 = arith.constant dense<0.000000e+00> : vector<16xf32>
    %176 = vector.multi_reduction <add>, %171, %cst_98 [0] : vector<8x16xf32> to vector<16xf32>
    %177 = vector.shape_cast %176 : vector<16xf32> to vector<1x16xf32>
    %cst_99 = arith.constant 8.000000e+00 : f32
    %178 = vector.broadcast %cst_99 : f32 to vector<1x16xf32>
    %179 = arith.divf %177, %178 : vector<1x16xf32>
    %180 = arith.mulf %171, %171 : vector<8x16xf32>
    %cst_100 = arith.constant dense<0.000000e+00> : vector<16xf32>
    %181 = vector.multi_reduction <add>, %180, %cst_100 [0] : vector<8x16xf32> to vector<16xf32>
    %182 = vector.shape_cast %181 : vector<16xf32> to vector<1x16xf32>
    %cst_101 = arith.constant 8.000000e+00 : f32
    %183 = vector.broadcast %cst_101 : f32 to vector<1x16xf32>
    %184 = arith.divf %182, %183 : vector<1x16xf32>
    %185 = arith.mulf %179, %179 : vector<1x16xf32>
    %186 = arith.subf %184, %185 : vector<1x16xf32>
    %cst_102 = arith.constant 0.000000e+00 : f32
    %187 = vector.broadcast %cst_102 : f32 to vector<1x16xf32>
    %188 = arith.maximumf %186, %187 : vector<1x16xf32>
    %189 = vector.broadcast %179 : vector<1x16xf32> to vector<8x16xf32>
    %190 = arith.subf %171, %189 : vector<8x16xf32>
    %cst_103 = arith.constant 9.99999974E-6 : f32
    %191 = vector.broadcast %cst_103 : f32 to vector<1x16xf32>
    %192 = arith.addf %188, %191 : vector<1x16xf32>
    %193 = math.rsqrt %192 : vector<1x16xf32>
    %194 = vector.broadcast %193 : vector<1x16xf32> to vector<8x16xf32>
    %195 = arith.mulf %190, %194 : vector<8x16xf32>
    %196 = vector.broadcast %173 : vector<1x16xf32> to vector<8x16xf32>
    %197 = arith.mulf %195, %196 : vector<8x16xf32>
    %198 = vector.broadcast %175 : vector<1x16xf32> to vector<8x16xf32>
    %199 = arith.addf %197, %198 : vector<8x16xf32>
    %c2_104 = arith.constant 2 : index
    %c0_105 = arith.constant 0 : index
    %c0_106 = arith.constant 0 : index
    %200 = vector.load %arg10[%c2_104, %c0_105, %c0_106] : memref<3x16x16xf32, #tpu.memory_space<vmem>>, vector<1x16x16xf32>
    %201 = vector.shape_cast %200 : vector<1x16x16xf32> to vector<16x16xf32>
    %cst_107 = arith.constant dense<0.000000e+00> : vector<8x16xf32>
    %202 = tpu.matmul %199, %201, %cst_107 {dimension_numbers = #tpu.dot_dimension_numbers<[1], [0], [0], [1], [0, 0, 1, 1], [], []>} : vector<8x16xf32>, vector<16x16xf32>, vector<8x16xf32> -> vector<8x16xf32>
    %c2_108 = arith.constant 2 : index
    %c0_109 = arith.constant 0 : index
    %c0_110 = arith.constant 0 : index
    %203 = vector.load %arg7[%c2_108, %c0_109, %c0_110] : memref<3x1x16xf32, #tpu.memory_space<vmem>>, vector<1x1x16xf32>
    %204 = vector.shape_cast %203 : vector<1x1x16xf32> to vector<1x16xf32>
    %205 = vector.broadcast %204 : vector<1x16xf32> to vector<8x16xf32>
    %206 = arith.addf %202, %205 : vector<8x16xf32>
    %cst_111 = arith.constant 0.00999999977 : f32
    %207 = vector.broadcast %cst_111 : f32 to vector<8x16xf32>
    %208 = arith.mulf %207, %206 : vector<8x16xf32>
    %209 = arith.maximumf %206, %208 : vector<8x16xf32>
    %c2_112 = arith.constant 2 : index
    %c0_113 = arith.constant 0 : index
    %c0_114 = arith.constant 0 : index
    %210 = vector.load %arg9[%c2_112, %c0_113, %c0_114] : memref<3x1x16xf32, #tpu.memory_space<vmem>>, vector<1x1x16xf32>
    %211 = vector.shape_cast %210 : vector<1x1x16xf32> to vector<1x16xf32>
    %c2_115 = arith.constant 2 : index
    %c0_116 = arith.constant 0 : index
    %c0_117 = arith.constant 0 : index
    %212 = vector.load %arg8[%c2_115, %c0_116, %c0_117] : memref<3x1x16xf32, #tpu.memory_space<vmem>>, vector<1x1x16xf32>
    %213 = vector.shape_cast %212 : vector<1x1x16xf32> to vector<1x16xf32>
    %cst_118 = arith.constant dense<0.000000e+00> : vector<16xf32>
    %214 = vector.multi_reduction <add>, %209, %cst_118 [0] : vector<8x16xf32> to vector<16xf32>
    %215 = vector.shape_cast %214 : vector<16xf32> to vector<1x16xf32>
    %cst_119 = arith.constant 8.000000e+00 : f32
    %216 = vector.broadcast %cst_119 : f32 to vector<1x16xf32>
    %217 = arith.divf %215, %216 : vector<1x16xf32>
    %218 = arith.mulf %209, %209 : vector<8x16xf32>
    %cst_120 = arith.constant dense<0.000000e+00> : vector<16xf32>
    %219 = vector.multi_reduction <add>, %218, %cst_120 [0] : vector<8x16xf32> to vector<16xf32>
    %220 = vector.shape_cast %219 : vector<16xf32> to vector<1x16xf32>
    %cst_121 = arith.constant 8.000000e+00 : f32
    %221 = vector.broadcast %cst_121 : f32 to vector<1x16xf32>
    %222 = arith.divf %220, %221 : vector<1x16xf32>
    %223 = arith.mulf %217, %217 : vector<1x16xf32>
    %224 = arith.subf %222, %223 : vector<1x16xf32>
    %cst_122 = arith.constant 0.000000e+00 : f32
    %225 = vector.broadcast %cst_122 : f32 to vector<1x16xf32>
    %226 = arith.maximumf %224, %225 : vector<1x16xf32>
    %227 = vector.broadcast %217 : vector<1x16xf32> to vector<8x16xf32>
    %228 = arith.subf %209, %227 : vector<8x16xf32>
    %cst_123 = arith.constant 9.99999974E-6 : f32
    %229 = vector.broadcast %cst_123 : f32 to vector<1x16xf32>
    %230 = arith.addf %226, %229 : vector<1x16xf32>
    %231 = math.rsqrt %230 : vector<1x16xf32>
    %232 = vector.broadcast %231 : vector<1x16xf32> to vector<8x16xf32>
    %233 = arith.mulf %228, %232 : vector<8x16xf32>
    %234 = vector.broadcast %211 : vector<1x16xf32> to vector<8x16xf32>
    %235 = arith.mulf %233, %234 : vector<8x16xf32>
    %236 = vector.broadcast %213 : vector<1x16xf32> to vector<8x16xf32>
    %237 = arith.addf %235, %236 : vector<8x16xf32>
    %238 = arith.addf %237, %123 : vector<8x16xf32>
    %c0_124 = arith.constant 0 : index
    %c0_125 = arith.constant 0 : index
    %239 = vector.load %arg12[%c0_124, %c0_125] : memref<16x8xf32, #tpu.memory_space<vmem>>, vector<16x8xf32>
    %cst_126 = arith.constant dense<0.000000e+00> : vector<8x8xf32>
    %240 = tpu.matmul %238, %239, %cst_126 {dimension_numbers = #tpu.dot_dimension_numbers<[1], [0], [0], [1], [0, 0, 1, 1], [], []>} : vector<8x16xf32>, vector<16x8xf32>, vector<8x8xf32> -> vector<8x8xf32>
    %c0_127 = arith.constant 0 : index
    %c0_128 = arith.constant 0 : index
    %241 = vector.load %arg11[%c0_127, %c0_128] : memref<1x8xf32, #tpu.memory_space<vmem>>, vector<1x8xf32>
    %242 = vector.broadcast %241 : vector<1x8xf32> to vector<8x8xf32>
    %243 = arith.addf %240, %242 : vector<8x8xf32>
    %cst_129 = arith.constant 0.00999999977 : f32
    %244 = vector.broadcast %cst_129 : f32 to vector<8x8xf32>
    %245 = arith.mulf %244, %243 : vector<8x8xf32>
    %246 = arith.maximumf %243, %245 : vector<8x8xf32>
    %c0_130 = arith.constant 0 : index
    %c0_131 = arith.constant 0 : index
    %c0_132 = arith.constant 0 : index
    %247 = vector.load %arg16[%c0_130, %c0_131, %c0_132] : memref<3x8x8xf32, #tpu.memory_space<vmem>>, vector<1x8x8xf32>
    %248 = vector.shape_cast %247 : vector<1x8x8xf32> to vector<8x8xf32>
    %cst_133 = arith.constant dense<0.000000e+00> : vector<8x8xf32>
    %249 = tpu.matmul %246, %248, %cst_133 {dimension_numbers = #tpu.dot_dimension_numbers<[1], [0], [0], [1], [0, 0, 1, 1], [], []>} : vector<8x8xf32>, vector<8x8xf32>, vector<8x8xf32> -> vector<8x8xf32>
    %c0_134 = arith.constant 0 : index
    %c0_135 = arith.constant 0 : index
    %c0_136 = arith.constant 0 : index
    %250 = vector.load %arg13[%c0_134, %c0_135, %c0_136] : memref<3x1x8xf32, #tpu.memory_space<vmem>>, vector<1x1x8xf32>
    %251 = vector.shape_cast %250 : vector<1x1x8xf32> to vector<1x8xf32>
    %252 = vector.broadcast %251 : vector<1x8xf32> to vector<8x8xf32>
    %253 = arith.addf %249, %252 : vector<8x8xf32>
    %cst_137 = arith.constant 0.00999999977 : f32
    %254 = vector.broadcast %cst_137 : f32 to vector<8x8xf32>
    %255 = arith.mulf %254, %253 : vector<8x8xf32>
    %256 = arith.maximumf %253, %255 : vector<8x8xf32>
    %c0_138 = arith.constant 0 : index
    %c0_139 = arith.constant 0 : index
    %c0_140 = arith.constant 0 : index
    %257 = vector.load %arg15[%c0_138, %c0_139, %c0_140] : memref<3x1x8xf32, #tpu.memory_space<vmem>>, vector<1x1x8xf32>
    %258 = vector.shape_cast %257 : vector<1x1x8xf32> to vector<1x8xf32>
    %c0_141 = arith.constant 0 : index
    %c0_142 = arith.constant 0 : index
    %c0_143 = arith.constant 0 : index
    %259 = vector.load %arg14[%c0_141, %c0_142, %c0_143] : memref<3x1x8xf32, #tpu.memory_space<vmem>>, vector<1x1x8xf32>
    %260 = vector.shape_cast %259 : vector<1x1x8xf32> to vector<1x8xf32>
    %cst_144 = arith.constant dense<0.000000e+00> : vector<8xf32>
    %261 = vector.multi_reduction <add>, %256, %cst_144 [0] : vector<8x8xf32> to vector<8xf32>
    %262 = vector.shape_cast %261 : vector<8xf32> to vector<1x8xf32>
    %cst_145 = arith.constant 8.000000e+00 : f32
    %263 = vector.broadcast %cst_145 : f32 to vector<1x8xf32>
    %264 = arith.divf %262, %263 : vector<1x8xf32>
    %265 = arith.mulf %256, %256 : vector<8x8xf32>
    %cst_146 = arith.constant dense<0.000000e+00> : vector<8xf32>
    %266 = vector.multi_reduction <add>, %265, %cst_146 [0] : vector<8x8xf32> to vector<8xf32>
    %267 = vector.shape_cast %266 : vector<8xf32> to vector<1x8xf32>
    %cst_147 = arith.constant 8.000000e+00 : f32
    %268 = vector.broadcast %cst_147 : f32 to vector<1x8xf32>
    %269 = arith.divf %267, %268 : vector<1x8xf32>
    %270 = arith.mulf %264, %264 : vector<1x8xf32>
    %271 = arith.subf %269, %270 : vector<1x8xf32>
    %cst_148 = arith.constant 0.000000e+00 : f32
    %272 = vector.broadcast %cst_148 : f32 to vector<1x8xf32>
    %273 = arith.maximumf %271, %272 : vector<1x8xf32>
    %274 = vector.broadcast %264 : vector<1x8xf32> to vector<8x8xf32>
    %275 = arith.subf %256, %274 : vector<8x8xf32>
    %cst_149 = arith.constant 9.99999974E-6 : f32
    %276 = vector.broadcast %cst_149 : f32 to vector<1x8xf32>
    %277 = arith.addf %273, %276 : vector<1x8xf32>
    %278 = math.rsqrt %277 : vector<1x8xf32>
    %279 = vector.broadcast %278 : vector<1x8xf32> to vector<8x8xf32>
    %280 = arith.mulf %275, %279 : vector<8x8xf32>
    %281 = vector.broadcast %258 : vector<1x8xf32> to vector<8x8xf32>
    %282 = arith.mulf %280, %281 : vector<8x8xf32>
    %283 = vector.broadcast %260 : vector<1x8xf32> to vector<8x8xf32>
    %284 = arith.addf %282, %283 : vector<8x8xf32>
    %c1_150 = arith.constant 1 : index
    %c0_151 = arith.constant 0 : index
    %c0_152 = arith.constant 0 : index
    %285 = vector.load %arg16[%c1_150, %c0_151, %c0_152] : memref<3x8x8xf32, #tpu.memory_space<vmem>>, vector<1x8x8xf32>
    %286 = vector.shape_cast %285 : vector<1x8x8xf32> to vector<8x8xf32>
    %cst_153 = arith.constant dense<0.000000e+00> : vector<8x8xf32>
    %287 = tpu.matmul %284, %286, %cst_153 {dimension_numbers = #tpu.dot_dimension_numbers<[1], [0], [0], [1], [0, 0, 1, 1], [], []>} : vector<8x8xf32>, vector<8x8xf32>, vector<8x8xf32> -> vector<8x8xf32>
    %c1_154 = arith.constant 1 : index
    %c0_155 = arith.constant 0 : index
    %c0_156 = arith.constant 0 : index
    %288 = vector.load %arg13[%c1_154, %c0_155, %c0_156] : memref<3x1x8xf32, #tpu.memory_space<vmem>>, vector<1x1x8xf32>
    %289 = vector.shape_cast %288 : vector<1x1x8xf32> to vector<1x8xf32>
    %290 = vector.broadcast %289 : vector<1x8xf32> to vector<8x8xf32>
    %291 = arith.addf %287, %290 : vector<8x8xf32>
    %cst_157 = arith.constant 0.00999999977 : f32
    %292 = vector.broadcast %cst_157 : f32 to vector<8x8xf32>
    %293 = arith.mulf %292, %291 : vector<8x8xf32>
    %294 = arith.maximumf %291, %293 : vector<8x8xf32>
    %c1_158 = arith.constant 1 : index
    %c0_159 = arith.constant 0 : index
    %c0_160 = arith.constant 0 : index
    %295 = vector.load %arg15[%c1_158, %c0_159, %c0_160] : memref<3x1x8xf32, #tpu.memory_space<vmem>>, vector<1x1x8xf32>
    %296 = vector.shape_cast %295 : vector<1x1x8xf32> to vector<1x8xf32>
    %c1_161 = arith.constant 1 : index
    %c0_162 = arith.constant 0 : index
    %c0_163 = arith.constant 0 : index
    %297 = vector.load %arg14[%c1_161, %c0_162, %c0_163] : memref<3x1x8xf32, #tpu.memory_space<vmem>>, vector<1x1x8xf32>
    %298 = vector.shape_cast %297 : vector<1x1x8xf32> to vector<1x8xf32>
    %cst_164 = arith.constant dense<0.000000e+00> : vector<8xf32>
    %299 = vector.multi_reduction <add>, %294, %cst_164 [0] : vector<8x8xf32> to vector<8xf32>
    %300 = vector.shape_cast %299 : vector<8xf32> to vector<1x8xf32>
    %cst_165 = arith.constant 8.000000e+00 : f32
    %301 = vector.broadcast %cst_165 : f32 to vector<1x8xf32>
    %302 = arith.divf %300, %301 : vector<1x8xf32>
    %303 = arith.mulf %294, %294 : vector<8x8xf32>
    %cst_166 = arith.constant dense<0.000000e+00> : vector<8xf32>
    %304 = vector.multi_reduction <add>, %303, %cst_166 [0] : vector<8x8xf32> to vector<8xf32>
    %305 = vector.shape_cast %304 : vector<8xf32> to vector<1x8xf32>
    %cst_167 = arith.constant 8.000000e+00 : f32
    %306 = vector.broadcast %cst_167 : f32 to vector<1x8xf32>
    %307 = arith.divf %305, %306 : vector<1x8xf32>
    %308 = arith.mulf %302, %302 : vector<1x8xf32>
    %309 = arith.subf %307, %308 : vector<1x8xf32>
    %cst_168 = arith.constant 0.000000e+00 : f32
    %310 = vector.broadcast %cst_168 : f32 to vector<1x8xf32>
    %311 = arith.maximumf %309, %310 : vector<1x8xf32>
    %312 = vector.broadcast %302 : vector<1x8xf32> to vector<8x8xf32>
    %313 = arith.subf %294, %312 : vector<8x8xf32>
    %cst_169 = arith.constant 9.99999974E-6 : f32
    %314 = vector.broadcast %cst_169 : f32 to vector<1x8xf32>
    %315 = arith.addf %311, %314 : vector<1x8xf32>
    %316 = math.rsqrt %315 : vector<1x8xf32>
    %317 = vector.broadcast %316 : vector<1x8xf32> to vector<8x8xf32>
    %318 = arith.mulf %313, %317 : vector<8x8xf32>
    %319 = vector.broadcast %296 : vector<1x8xf32> to vector<8x8xf32>
    %320 = arith.mulf %318, %319 : vector<8x8xf32>
    %321 = vector.broadcast %298 : vector<1x8xf32> to vector<8x8xf32>
    %322 = arith.addf %320, %321 : vector<8x8xf32>
    %c2_170 = arith.constant 2 : index
    %c0_171 = arith.constant 0 : index
    %c0_172 = arith.constant 0 : index
    %323 = vector.load %arg16[%c2_170, %c0_171, %c0_172] : memref<3x8x8xf32, #tpu.memory_space<vmem>>, vector<1x8x8xf32>
    %324 = vector.shape_cast %323 : vector<1x8x8xf32> to vector<8x8xf32>
    %cst_173 = arith.constant dense<0.000000e+00> : vector<8x8xf32>
    %325 = tpu.matmul %322, %324, %cst_173 {dimension_numbers = #tpu.dot_dimension_numbers<[1], [0], [0], [1], [0, 0, 1, 1], [], []>} : vector<8x8xf32>, vector<8x8xf32>, vector<8x8xf32> -> vector<8x8xf32>
    %c2_174 = arith.constant 2 : index
    %c0_175 = arith.constant 0 : index
    %c0_176 = arith.constant 0 : index
    %326 = vector.load %arg13[%c2_174, %c0_175, %c0_176] : memref<3x1x8xf32, #tpu.memory_space<vmem>>, vector<1x1x8xf32>
    %327 = vector.shape_cast %326 : vector<1x1x8xf32> to vector<1x8xf32>
    %328 = vector.broadcast %327 : vector<1x8xf32> to vector<8x8xf32>
    %329 = arith.addf %325, %328 : vector<8x8xf32>
    %cst_177 = arith.constant 0.00999999977 : f32
    %330 = vector.broadcast %cst_177 : f32 to vector<8x8xf32>
    %331 = arith.mulf %330, %329 : vector<8x8xf32>
    %332 = arith.maximumf %329, %331 : vector<8x8xf32>
    %c2_178 = arith.constant 2 : index
    %c0_179 = arith.constant 0 : index
    %c0_180 = arith.constant 0 : index
    %333 = vector.load %arg15[%c2_178, %c0_179, %c0_180] : memref<3x1x8xf32, #tpu.memory_space<vmem>>, vector<1x1x8xf32>
    %334 = vector.shape_cast %333 : vector<1x1x8xf32> to vector<1x8xf32>
    %c2_181 = arith.constant 2 : index
    %c0_182 = arith.constant 0 : index
    %c0_183 = arith.constant 0 : index
    %335 = vector.load %arg14[%c2_181, %c0_182, %c0_183] : memref<3x1x8xf32, #tpu.memory_space<vmem>>, vector<1x1x8xf32>
    %336 = vector.shape_cast %335 : vector<1x1x8xf32> to vector<1x8xf32>
    %cst_184 = arith.constant dense<0.000000e+00> : vector<8xf32>
    %337 = vector.multi_reduction <add>, %332, %cst_184 [0] : vector<8x8xf32> to vector<8xf32>
    %338 = vector.shape_cast %337 : vector<8xf32> to vector<1x8xf32>
    %cst_185 = arith.constant 8.000000e+00 : f32
    %339 = vector.broadcast %cst_185 : f32 to vector<1x8xf32>
    %340 = arith.divf %338, %339 : vector<1x8xf32>
    %341 = arith.mulf %332, %332 : vector<8x8xf32>
    %cst_186 = arith.constant dense<0.000000e+00> : vector<8xf32>
    %342 = vector.multi_reduction <add>, %341, %cst_186 [0] : vector<8x8xf32> to vector<8xf32>
    %343 = vector.shape_cast %342 : vector<8xf32> to vector<1x8xf32>
    %cst_187 = arith.constant 8.000000e+00 : f32
    %344 = vector.broadcast %cst_187 : f32 to vector<1x8xf32>
    %345 = arith.divf %343, %344 : vector<1x8xf32>
    %346 = arith.mulf %340, %340 : vector<1x8xf32>
    %347 = arith.subf %345, %346 : vector<1x8xf32>
    %cst_188 = arith.constant 0.000000e+00 : f32
    %348 = vector.broadcast %cst_188 : f32 to vector<1x8xf32>
    %349 = arith.maximumf %347, %348 : vector<1x8xf32>
    %350 = vector.broadcast %340 : vector<1x8xf32> to vector<8x8xf32>
    %351 = arith.subf %332, %350 : vector<8x8xf32>
    %cst_189 = arith.constant 9.99999974E-6 : f32
    %352 = vector.broadcast %cst_189 : f32 to vector<1x8xf32>
    %353 = arith.addf %349, %352 : vector<1x8xf32>
    %354 = math.rsqrt %353 : vector<1x8xf32>
    %355 = vector.broadcast %354 : vector<1x8xf32> to vector<8x8xf32>
    %356 = arith.mulf %351, %355 : vector<8x8xf32>
    %357 = vector.broadcast %334 : vector<1x8xf32> to vector<8x8xf32>
    %358 = arith.mulf %356, %357 : vector<8x8xf32>
    %359 = vector.broadcast %336 : vector<1x8xf32> to vector<8x8xf32>
    %360 = arith.addf %358, %359 : vector<8x8xf32>
    %361 = arith.addf %360, %246 : vector<8x8xf32>
    %c0_190 = arith.constant 0 : index
    %c0_191 = arith.constant 0 : index
    %c0_192 = arith.constant 0 : index
    %362 = vector.load %arg20[%c0_190, %c0_191, %c0_192] : memref<3x8x8xf32, #tpu.memory_space<vmem>>, vector<1x8x8xf32>
    %363 = vector.shape_cast %362 : vector<1x8x8xf32> to vector<8x8xf32>
    %cst_193 = arith.constant dense<0.000000e+00> : vector<8x8xf32>
    %364 = tpu.matmul %361, %363, %cst_193 {dimension_numbers = #tpu.dot_dimension_numbers<[1], [0], [0], [1], [0, 0, 1, 1], [], []>} : vector<8x8xf32>, vector<8x8xf32>, vector<8x8xf32> -> vector<8x8xf32>
    %c0_194 = arith.constant 0 : index
    %c0_195 = arith.constant 0 : index
    %c0_196 = arith.constant 0 : index
    %365 = vector.load %arg17[%c0_194, %c0_195, %c0_196] : memref<3x1x8xf32, #tpu.memory_space<vmem>>, vector<1x1x8xf32>
    %366 = vector.shape_cast %365 : vector<1x1x8xf32> to vector<1x8xf32>
    %367 = vector.broadcast %366 : vector<1x8xf32> to vector<8x8xf32>
    %368 = arith.addf %364, %367 : vector<8x8xf32>
    %cst_197 = arith.constant 0.00999999977 : f32
    %369 = vector.broadcast %cst_197 : f32 to vector<8x8xf32>
    %370 = arith.mulf %369, %368 : vector<8x8xf32>
    %371 = arith.maximumf %368, %370 : vector<8x8xf32>
    %c0_198 = arith.constant 0 : index
    %c0_199 = arith.constant 0 : index
    %c0_200 = arith.constant 0 : index
    %372 = vector.load %arg19[%c0_198, %c0_199, %c0_200] : memref<3x1x8xf32, #tpu.memory_space<vmem>>, vector<1x1x8xf32>
    %373 = vector.shape_cast %372 : vector<1x1x8xf32> to vector<1x8xf32>
    %c0_201 = arith.constant 0 : index
    %c0_202 = arith.constant 0 : index
    %c0_203 = arith.constant 0 : index
    %374 = vector.load %arg18[%c0_201, %c0_202, %c0_203] : memref<3x1x8xf32, #tpu.memory_space<vmem>>, vector<1x1x8xf32>
    %375 = vector.shape_cast %374 : vector<1x1x8xf32> to vector<1x8xf32>
    %cst_204 = arith.constant dense<0.000000e+00> : vector<8xf32>
    %376 = vector.multi_reduction <add>, %371, %cst_204 [0] : vector<8x8xf32> to vector<8xf32>
    %377 = vector.shape_cast %376 : vector<8xf32> to vector<1x8xf32>
    %cst_205 = arith.constant 8.000000e+00 : f32
    %378 = vector.broadcast %cst_205 : f32 to vector<1x8xf32>
    %379 = arith.divf %377, %378 : vector<1x8xf32>
    %380 = arith.mulf %371, %371 : vector<8x8xf32>
    %cst_206 = arith.constant dense<0.000000e+00> : vector<8xf32>
    %381 = vector.multi_reduction <add>, %380, %cst_206 [0] : vector<8x8xf32> to vector<8xf32>
    %382 = vector.shape_cast %381 : vector<8xf32> to vector<1x8xf32>
    %cst_207 = arith.constant 8.000000e+00 : f32
    %383 = vector.broadcast %cst_207 : f32 to vector<1x8xf32>
    %384 = arith.divf %382, %383 : vector<1x8xf32>
    %385 = arith.mulf %379, %379 : vector<1x8xf32>
    %386 = arith.subf %384, %385 : vector<1x8xf32>
    %cst_208 = arith.constant 0.000000e+00 : f32
    %387 = vector.broadcast %cst_208 : f32 to vector<1x8xf32>
    %388 = arith.maximumf %386, %387 : vector<1x8xf32>
    %389 = vector.broadcast %379 : vector<1x8xf32> to vector<8x8xf32>
    %390 = arith.subf %371, %389 : vector<8x8xf32>
    %cst_209 = arith.constant 9.99999974E-6 : f32
    %391 = vector.broadcast %cst_209 : f32 to vector<1x8xf32>
    %392 = arith.addf %388, %391 : vector<1x8xf32>
    %393 = math.rsqrt %392 : vector<1x8xf32>
    %394 = vector.broadcast %393 : vector<1x8xf32> to vector<8x8xf32>
    %395 = arith.mulf %390, %394 : vector<8x8xf32>
    %396 = vector.broadcast %373 : vector<1x8xf32> to vector<8x8xf32>
    %397 = arith.mulf %395, %396 : vector<8x8xf32>
    %398 = vector.broadcast %375 : vector<1x8xf32> to vector<8x8xf32>
    %399 = arith.addf %397, %398 : vector<8x8xf32>
    %c1_210 = arith.constant 1 : index
    %c0_211 = arith.constant 0 : index
    %c0_212 = arith.constant 0 : index
    %400 = vector.load %arg20[%c1_210, %c0_211, %c0_212] : memref<3x8x8xf32, #tpu.memory_space<vmem>>, vector<1x8x8xf32>
    %401 = vector.shape_cast %400 : vector<1x8x8xf32> to vector<8x8xf32>
    %cst_213 = arith.constant dense<0.000000e+00> : vector<8x8xf32>
    %402 = tpu.matmul %399, %401, %cst_213 {dimension_numbers = #tpu.dot_dimension_numbers<[1], [0], [0], [1], [0, 0, 1, 1], [], []>} : vector<8x8xf32>, vector<8x8xf32>, vector<8x8xf32> -> vector<8x8xf32>
    %c1_214 = arith.constant 1 : index
    %c0_215 = arith.constant 0 : index
    %c0_216 = arith.constant 0 : index
    %403 = vector.load %arg17[%c1_214, %c0_215, %c0_216] : memref<3x1x8xf32, #tpu.memory_space<vmem>>, vector<1x1x8xf32>
    %404 = vector.shape_cast %403 : vector<1x1x8xf32> to vector<1x8xf32>
    %405 = vector.broadcast %404 : vector<1x8xf32> to vector<8x8xf32>
    %406 = arith.addf %402, %405 : vector<8x8xf32>
    %cst_217 = arith.constant 0.00999999977 : f32
    %407 = vector.broadcast %cst_217 : f32 to vector<8x8xf32>
    %408 = arith.mulf %407, %406 : vector<8x8xf32>
    %409 = arith.maximumf %406, %408 : vector<8x8xf32>
    %c1_218 = arith.constant 1 : index
    %c0_219 = arith.constant 0 : index
    %c0_220 = arith.constant 0 : index
    %410 = vector.load %arg19[%c1_218, %c0_219, %c0_220] : memref<3x1x8xf32, #tpu.memory_space<vmem>>, vector<1x1x8xf32>
    %411 = vector.shape_cast %410 : vector<1x1x8xf32> to vector<1x8xf32>
    %c1_221 = arith.constant 1 : index
    %c0_222 = arith.constant 0 : index
    %c0_223 = arith.constant 0 : index
    %412 = vector.load %arg18[%c1_221, %c0_222, %c0_223] : memref<3x1x8xf32, #tpu.memory_space<vmem>>, vector<1x1x8xf32>
    %413 = vector.shape_cast %412 : vector<1x1x8xf32> to vector<1x8xf32>
    %cst_224 = arith.constant dense<0.000000e+00> : vector<8xf32>
    %414 = vector.multi_reduction <add>, %409, %cst_224 [0] : vector<8x8xf32> to vector<8xf32>
    %415 = vector.shape_cast %414 : vector<8xf32> to vector<1x8xf32>
    %cst_225 = arith.constant 8.000000e+00 : f32
    %416 = vector.broadcast %cst_225 : f32 to vector<1x8xf32>
    %417 = arith.divf %415, %416 : vector<1x8xf32>
    %418 = arith.mulf %409, %409 : vector<8x8xf32>
    %cst_226 = arith.constant dense<0.000000e+00> : vector<8xf32>
    %419 = vector.multi_reduction <add>, %418, %cst_226 [0] : vector<8x8xf32> to vector<8xf32>
    %420 = vector.shape_cast %419 : vector<8xf32> to vector<1x8xf32>
    %cst_227 = arith.constant 8.000000e+00 : f32
    %421 = vector.broadcast %cst_227 : f32 to vector<1x8xf32>
    %422 = arith.divf %420, %421 : vector<1x8xf32>
    %423 = arith.mulf %417, %417 : vector<1x8xf32>
    %424 = arith.subf %422, %423 : vector<1x8xf32>
    %cst_228 = arith.constant 0.000000e+00 : f32
    %425 = vector.broadcast %cst_228 : f32 to vector<1x8xf32>
    %426 = arith.maximumf %424, %425 : vector<1x8xf32>
    %427 = vector.broadcast %417 : vector<1x8xf32> to vector<8x8xf32>
    %428 = arith.subf %409, %427 : vector<8x8xf32>
    %cst_229 = arith.constant 9.99999974E-6 : f32
    %429 = vector.broadcast %cst_229 : f32 to vector<1x8xf32>
    %430 = arith.addf %426, %429 : vector<1x8xf32>
    %431 = math.rsqrt %430 : vector<1x8xf32>
    %432 = vector.broadcast %431 : vector<1x8xf32> to vector<8x8xf32>
    %433 = arith.mulf %428, %432 : vector<8x8xf32>
    %434 = vector.broadcast %411 : vector<1x8xf32> to vector<8x8xf32>
    %435 = arith.mulf %433, %434 : vector<8x8xf32>
    %436 = vector.broadcast %413 : vector<1x8xf32> to vector<8x8xf32>
    %437 = arith.addf %435, %436 : vector<8x8xf32>
    %c2_230 = arith.constant 2 : index
    %c0_231 = arith.constant 0 : index
    %c0_232 = arith.constant 0 : index
    %438 = vector.load %arg20[%c2_230, %c0_231, %c0_232] : memref<3x8x8xf32, #tpu.memory_space<vmem>>, vector<1x8x8xf32>
    %439 = vector.shape_cast %438 : vector<1x8x8xf32> to vector<8x8xf32>
    %cst_233 = arith.constant dense<0.000000e+00> : vector<8x8xf32>
    %440 = tpu.matmul %437, %439, %cst_233 {dimension_numbers = #tpu.dot_dimension_numbers<[1], [0], [0], [1], [0, 0, 1, 1], [], []>} : vector<8x8xf32>, vector<8x8xf32>, vector<8x8xf32> -> vector<8x8xf32>
    %c2_234 = arith.constant 2 : index
    %c0_235 = arith.constant 0 : index
    %c0_236 = arith.constant 0 : index
    %441 = vector.load %arg17[%c2_234, %c0_235, %c0_236] : memref<3x1x8xf32, #tpu.memory_space<vmem>>, vector<1x1x8xf32>
    %442 = vector.shape_cast %441 : vector<1x1x8xf32> to vector<1x8xf32>
    %443 = vector.broadcast %442 : vector<1x8xf32> to vector<8x8xf32>
    %444 = arith.addf %440, %443 : vector<8x8xf32>
    %cst_237 = arith.constant 0.00999999977 : f32
    %445 = vector.broadcast %cst_237 : f32 to vector<8x8xf32>
    %446 = arith.mulf %445, %444 : vector<8x8xf32>
    %447 = arith.maximumf %444, %446 : vector<8x8xf32>
    %c2_238 = arith.constant 2 : index
    %c0_239 = arith.constant 0 : index
    %c0_240 = arith.constant 0 : index
    %448 = vector.load %arg19[%c2_238, %c0_239, %c0_240] : memref<3x1x8xf32, #tpu.memory_space<vmem>>, vector<1x1x8xf32>
    %449 = vector.shape_cast %448 : vector<1x1x8xf32> to vector<1x8xf32>
    %c2_241 = arith.constant 2 : index
    %c0_242 = arith.constant 0 : index
    %c0_243 = arith.constant 0 : index
    %450 = vector.load %arg18[%c2_241, %c0_242, %c0_243] : memref<3x1x8xf32, #tpu.memory_space<vmem>>, vector<1x1x8xf32>
    %451 = vector.shape_cast %450 : vector<1x1x8xf32> to vector<1x8xf32>
    %cst_244 = arith.constant dense<0.000000e+00> : vector<8xf32>
    %452 = vector.multi_reduction <add>, %447, %cst_244 [0] : vector<8x8xf32> to vector<8xf32>
    %453 = vector.shape_cast %452 : vector<8xf32> to vector<1x8xf32>
    %cst_245 = arith.constant 8.000000e+00 : f32
    %454 = vector.broadcast %cst_245 : f32 to vector<1x8xf32>
    %455 = arith.divf %453, %454 : vector<1x8xf32>
    %456 = arith.mulf %447, %447 : vector<8x8xf32>
    %cst_246 = arith.constant dense<0.000000e+00> : vector<8xf32>
    %457 = vector.multi_reduction <add>, %456, %cst_246 [0] : vector<8x8xf32> to vector<8xf32>
    %458 = vector.shape_cast %457 : vector<8xf32> to vector<1x8xf32>
    %cst_247 = arith.constant 8.000000e+00 : f32
    %459 = vector.broadcast %cst_247 : f32 to vector<1x8xf32>
    %460 = arith.divf %458, %459 : vector<1x8xf32>
    %461 = arith.mulf %455, %455 : vector<1x8xf32>
    %462 = arith.subf %460, %461 : vector<1x8xf32>
    %cst_248 = arith.constant 0.000000e+00 : f32
    %463 = vector.broadcast %cst_248 : f32 to vector<1x8xf32>
    %464 = arith.maximumf %462, %463 : vector<1x8xf32>
    %465 = vector.broadcast %455 : vector<1x8xf32> to vector<8x8xf32>
    %466 = arith.subf %447, %465 : vector<8x8xf32>
    %cst_249 = arith.constant 9.99999974E-6 : f32
    %467 = vector.broadcast %cst_249 : f32 to vector<1x8xf32>
    %468 = arith.addf %464, %467 : vector<1x8xf32>
    %469 = math.rsqrt %468 : vector<1x8xf32>
    %470 = vector.broadcast %469 : vector<1x8xf32> to vector<8x8xf32>
    %471 = arith.mulf %466, %470 : vector<8x8xf32>
    %472 = vector.broadcast %449 : vector<1x8xf32> to vector<8x8xf32>
    %473 = arith.mulf %471, %472 : vector<8x8xf32>
    %474 = vector.broadcast %451 : vector<1x8xf32> to vector<8x8xf32>
    %475 = arith.addf %473, %474 : vector<8x8xf32>
    %476 = arith.addf %475, %361 : vector<8x8xf32>
    %c0_250 = arith.constant 0 : index
    %c0_251 = arith.constant 0 : index
    %477 = vector.load %arg22[%c0_250, %c0_251] : memref<8x16xf32, #tpu.memory_space<vmem>>, vector<8x16xf32>
    %cst_252 = arith.constant dense<0.000000e+00> : vector<8x16xf32>
    %478 = tpu.matmul %476, %477, %cst_252 {dimension_numbers = #tpu.dot_dimension_numbers<[1], [0], [0], [1], [0, 0, 1, 1], [], []>} : vector<8x8xf32>, vector<8x16xf32>, vector<8x16xf32> -> vector<8x16xf32>
    %c0_253 = arith.constant 0 : index
    %c0_254 = arith.constant 0 : index
    %479 = vector.load %arg21[%c0_253, %c0_254] : memref<1x16xf32, #tpu.memory_space<vmem>>, vector<1x16xf32>
    %480 = vector.broadcast %479 : vector<1x16xf32> to vector<8x16xf32>
    %481 = arith.addf %478, %480 : vector<8x16xf32>
    %cst_255 = arith.constant 0.00999999977 : f32
    %482 = vector.broadcast %cst_255 : f32 to vector<8x16xf32>
    %483 = arith.mulf %482, %481 : vector<8x16xf32>
    %484 = arith.maximumf %481, %483 : vector<8x16xf32>
    %c0_256 = arith.constant 0 : index
    %c0_257 = arith.constant 0 : index
    %c0_258 = arith.constant 0 : index
    %485 = vector.load %arg26[%c0_256, %c0_257, %c0_258] : memref<3x16x16xf32, #tpu.memory_space<vmem>>, vector<1x16x16xf32>
    %486 = vector.shape_cast %485 : vector<1x16x16xf32> to vector<16x16xf32>
    %cst_259 = arith.constant dense<0.000000e+00> : vector<8x16xf32>
    %487 = tpu.matmul %484, %486, %cst_259 {dimension_numbers = #tpu.dot_dimension_numbers<[1], [0], [0], [1], [0, 0, 1, 1], [], []>} : vector<8x16xf32>, vector<16x16xf32>, vector<8x16xf32> -> vector<8x16xf32>
    %c0_260 = arith.constant 0 : index
    %c0_261 = arith.constant 0 : index
    %c0_262 = arith.constant 0 : index
    %488 = vector.load %arg23[%c0_260, %c0_261, %c0_262] : memref<3x1x16xf32, #tpu.memory_space<vmem>>, vector<1x1x16xf32>
    %489 = vector.shape_cast %488 : vector<1x1x16xf32> to vector<1x16xf32>
    %490 = vector.broadcast %489 : vector<1x16xf32> to vector<8x16xf32>
    %491 = arith.addf %487, %490 : vector<8x16xf32>
    %cst_263 = arith.constant 0.00999999977 : f32
    %492 = vector.broadcast %cst_263 : f32 to vector<8x16xf32>
    %493 = arith.mulf %492, %491 : vector<8x16xf32>
    %494 = arith.maximumf %491, %493 : vector<8x16xf32>
    %c0_264 = arith.constant 0 : index
    %c0_265 = arith.constant 0 : index
    %c0_266 = arith.constant 0 : index
    %495 = vector.load %arg25[%c0_264, %c0_265, %c0_266] : memref<3x1x16xf32, #tpu.memory_space<vmem>>, vector<1x1x16xf32>
    %496 = vector.shape_cast %495 : vector<1x1x16xf32> to vector<1x16xf32>
    %c0_267 = arith.constant 0 : index
    %c0_268 = arith.constant 0 : index
    %c0_269 = arith.constant 0 : index
    %497 = vector.load %arg24[%c0_267, %c0_268, %c0_269] : memref<3x1x16xf32, #tpu.memory_space<vmem>>, vector<1x1x16xf32>
    %498 = vector.shape_cast %497 : vector<1x1x16xf32> to vector<1x16xf32>
    %cst_270 = arith.constant dense<0.000000e+00> : vector<16xf32>
    %499 = vector.multi_reduction <add>, %494, %cst_270 [0] : vector<8x16xf32> to vector<16xf32>
    %500 = vector.shape_cast %499 : vector<16xf32> to vector<1x16xf32>
    %cst_271 = arith.constant 8.000000e+00 : f32
    %501 = vector.broadcast %cst_271 : f32 to vector<1x16xf32>
    %502 = arith.divf %500, %501 : vector<1x16xf32>
    %503 = arith.mulf %494, %494 : vector<8x16xf32>
    %cst_272 = arith.constant dense<0.000000e+00> : vector<16xf32>
    %504 = vector.multi_reduction <add>, %503, %cst_272 [0] : vector<8x16xf32> to vector<16xf32>
    %505 = vector.shape_cast %504 : vector<16xf32> to vector<1x16xf32>
    %cst_273 = arith.constant 8.000000e+00 : f32
    %506 = vector.broadcast %cst_273 : f32 to vector<1x16xf32>
    %507 = arith.divf %505, %506 : vector<1x16xf32>
    %508 = arith.mulf %502, %502 : vector<1x16xf32>
    %509 = arith.subf %507, %508 : vector<1x16xf32>
    %cst_274 = arith.constant 0.000000e+00 : f32
    %510 = vector.broadcast %cst_274 : f32 to vector<1x16xf32>
    %511 = arith.maximumf %509, %510 : vector<1x16xf32>
    %512 = vector.broadcast %502 : vector<1x16xf32> to vector<8x16xf32>
    %513 = arith.subf %494, %512 : vector<8x16xf32>
    %cst_275 = arith.constant 9.99999974E-6 : f32
    %514 = vector.broadcast %cst_275 : f32 to vector<1x16xf32>
    %515 = arith.addf %511, %514 : vector<1x16xf32>
    %516 = math.rsqrt %515 : vector<1x16xf32>
    %517 = vector.broadcast %516 : vector<1x16xf32> to vector<8x16xf32>
    %518 = arith.mulf %513, %517 : vector<8x16xf32>
    %519 = vector.broadcast %496 : vector<1x16xf32> to vector<8x16xf32>
    %520 = arith.mulf %518, %519 : vector<8x16xf32>
    %521 = vector.broadcast %498 : vector<1x16xf32> to vector<8x16xf32>
    %522 = arith.addf %520, %521 : vector<8x16xf32>
    %c1_276 = arith.constant 1 : index
    %c0_277 = arith.constant 0 : index
    %c0_278 = arith.constant 0 : index
    %523 = vector.load %arg26[%c1_276, %c0_277, %c0_278] : memref<3x16x16xf32, #tpu.memory_space<vmem>>, vector<1x16x16xf32>
    %524 = vector.shape_cast %523 : vector<1x16x16xf32> to vector<16x16xf32>
    %cst_279 = arith.constant dense<0.000000e+00> : vector<8x16xf32>
    %525 = tpu.matmul %522, %524, %cst_279 {dimension_numbers = #tpu.dot_dimension_numbers<[1], [0], [0], [1], [0, 0, 1, 1], [], []>} : vector<8x16xf32>, vector<16x16xf32>, vector<8x16xf32> -> vector<8x16xf32>
    %c1_280 = arith.constant 1 : index
    %c0_281 = arith.constant 0 : index
    %c0_282 = arith.constant 0 : index
    %526 = vector.load %arg23[%c1_280, %c0_281, %c0_282] : memref<3x1x16xf32, #tpu.memory_space<vmem>>, vector<1x1x16xf32>
    %527 = vector.shape_cast %526 : vector<1x1x16xf32> to vector<1x16xf32>
    %528 = vector.broadcast %527 : vector<1x16xf32> to vector<8x16xf32>
    %529 = arith.addf %525, %528 : vector<8x16xf32>
    %cst_283 = arith.constant 0.00999999977 : f32
    %530 = vector.broadcast %cst_283 : f32 to vector<8x16xf32>
    %531 = arith.mulf %530, %529 : vector<8x16xf32>
    %532 = arith.maximumf %529, %531 : vector<8x16xf32>
    %c1_284 = arith.constant 1 : index
    %c0_285 = arith.constant 0 : index
    %c0_286 = arith.constant 0 : index
    %533 = vector.load %arg25[%c1_284, %c0_285, %c0_286] : memref<3x1x16xf32, #tpu.memory_space<vmem>>, vector<1x1x16xf32>
    %534 = vector.shape_cast %533 : vector<1x1x16xf32> to vector<1x16xf32>
    %c1_287 = arith.constant 1 : index
    %c0_288 = arith.constant 0 : index
    %c0_289 = arith.constant 0 : index
    %535 = vector.load %arg24[%c1_287, %c0_288, %c0_289] : memref<3x1x16xf32, #tpu.memory_space<vmem>>, vector<1x1x16xf32>
    %536 = vector.shape_cast %535 : vector<1x1x16xf32> to vector<1x16xf32>
    %cst_290 = arith.constant dense<0.000000e+00> : vector<16xf32>
    %537 = vector.multi_reduction <add>, %532, %cst_290 [0] : vector<8x16xf32> to vector<16xf32>
    %538 = vector.shape_cast %537 : vector<16xf32> to vector<1x16xf32>
    %cst_291 = arith.constant 8.000000e+00 : f32
    %539 = vector.broadcast %cst_291 : f32 to vector<1x16xf32>
    %540 = arith.divf %538, %539 : vector<1x16xf32>
    %541 = arith.mulf %532, %532 : vector<8x16xf32>
    %cst_292 = arith.constant dense<0.000000e+00> : vector<16xf32>
    %542 = vector.multi_reduction <add>, %541, %cst_292 [0] : vector<8x16xf32> to vector<16xf32>
    %543 = vector.shape_cast %542 : vector<16xf32> to vector<1x16xf32>
    %cst_293 = arith.constant 8.000000e+00 : f32
    %544 = vector.broadcast %cst_293 : f32 to vector<1x16xf32>
    %545 = arith.divf %543, %544 : vector<1x16xf32>
    %546 = arith.mulf %540, %540 : vector<1x16xf32>
    %547 = arith.subf %545, %546 : vector<1x16xf32>
    %cst_294 = arith.constant 0.000000e+00 : f32
    %548 = vector.broadcast %cst_294 : f32 to vector<1x16xf32>
    %549 = arith.maximumf %547, %548 : vector<1x16xf32>
    %550 = vector.broadcast %540 : vector<1x16xf32> to vector<8x16xf32>
    %551 = arith.subf %532, %550 : vector<8x16xf32>
    %cst_295 = arith.constant 9.99999974E-6 : f32
    %552 = vector.broadcast %cst_295 : f32 to vector<1x16xf32>
    %553 = arith.addf %549, %552 : vector<1x16xf32>
    %554 = math.rsqrt %553 : vector<1x16xf32>
    %555 = vector.broadcast %554 : vector<1x16xf32> to vector<8x16xf32>
    %556 = arith.mulf %551, %555 : vector<8x16xf32>
    %557 = vector.broadcast %534 : vector<1x16xf32> to vector<8x16xf32>
    %558 = arith.mulf %556, %557 : vector<8x16xf32>
    %559 = vector.broadcast %536 : vector<1x16xf32> to vector<8x16xf32>
    %560 = arith.addf %558, %559 : vector<8x16xf32>
    %c2_296 = arith.constant 2 : index
    %c0_297 = arith.constant 0 : index
    %c0_298 = arith.constant 0 : index
    %561 = vector.load %arg26[%c2_296, %c0_297, %c0_298] : memref<3x16x16xf32, #tpu.memory_space<vmem>>, vector<1x16x16xf32>
    %562 = vector.shape_cast %561 : vector<1x16x16xf32> to vector<16x16xf32>
    %cst_299 = arith.constant dense<0.000000e+00> : vector<8x16xf32>
    %563 = tpu.matmul %560, %562, %cst_299 {dimension_numbers = #tpu.dot_dimension_numbers<[1], [0], [0], [1], [0, 0, 1, 1], [], []>} : vector<8x16xf32>, vector<16x16xf32>, vector<8x16xf32> -> vector<8x16xf32>
    %c2_300 = arith.constant 2 : index
    %c0_301 = arith.constant 0 : index
    %c0_302 = arith.constant 0 : index
    %564 = vector.load %arg23[%c2_300, %c0_301, %c0_302] : memref<3x1x16xf32, #tpu.memory_space<vmem>>, vector<1x1x16xf32>
    %565 = vector.shape_cast %564 : vector<1x1x16xf32> to vector<1x16xf32>
    %566 = vector.broadcast %565 : vector<1x16xf32> to vector<8x16xf32>
    %567 = arith.addf %563, %566 : vector<8x16xf32>
    %cst_303 = arith.constant 0.00999999977 : f32
    %568 = vector.broadcast %cst_303 : f32 to vector<8x16xf32>
    %569 = arith.mulf %568, %567 : vector<8x16xf32>
    %570 = arith.maximumf %567, %569 : vector<8x16xf32>
    %c2_304 = arith.constant 2 : index
    %c0_305 = arith.constant 0 : index
    %c0_306 = arith.constant 0 : index
    %571 = vector.load %arg25[%c2_304, %c0_305, %c0_306] : memref<3x1x16xf32, #tpu.memory_space<vmem>>, vector<1x1x16xf32>
    %572 = vector.shape_cast %571 : vector<1x1x16xf32> to vector<1x16xf32>
    %c2_307 = arith.constant 2 : index
    %c0_308 = arith.constant 0 : index
    %c0_309 = arith.constant 0 : index
    %573 = vector.load %arg24[%c2_307, %c0_308, %c0_309] : memref<3x1x16xf32, #tpu.memory_space<vmem>>, vector<1x1x16xf32>
    %574 = vector.shape_cast %573 : vector<1x1x16xf32> to vector<1x16xf32>
    %cst_310 = arith.constant dense<0.000000e+00> : vector<16xf32>
    %575 = vector.multi_reduction <add>, %570, %cst_310 [0] : vector<8x16xf32> to vector<16xf32>
    %576 = vector.shape_cast %575 : vector<16xf32> to vector<1x16xf32>
    %cst_311 = arith.constant 8.000000e+00 : f32
    %577 = vector.broadcast %cst_311 : f32 to vector<1x16xf32>
    %578 = arith.divf %576, %577 : vector<1x16xf32>
    %579 = arith.mulf %570, %570 : vector<8x16xf32>
    %cst_312 = arith.constant dense<0.000000e+00> : vector<16xf32>
    %580 = vector.multi_reduction <add>, %579, %cst_312 [0] : vector<8x16xf32> to vector<16xf32>
    %581 = vector.shape_cast %580 : vector<16xf32> to vector<1x16xf32>
    %cst_313 = arith.constant 8.000000e+00 : f32
    %582 = vector.broadcast %cst_313 : f32 to vector<1x16xf32>
    %583 = arith.divf %581, %582 : vector<1x16xf32>
    %584 = arith.mulf %578, %578 : vector<1x16xf32>
    %585 = arith.subf %583, %584 : vector<1x16xf32>
    %cst_314 = arith.constant 0.000000e+00 : f32
    %586 = vector.broadcast %cst_314 : f32 to vector<1x16xf32>
    %587 = arith.maximumf %585, %586 : vector<1x16xf32>
    %588 = vector.broadcast %578 : vector<1x16xf32> to vector<8x16xf32>
    %589 = arith.subf %570, %588 : vector<8x16xf32>
    %cst_315 = arith.constant 9.99999974E-6 : f32
    %590 = vector.broadcast %cst_315 : f32 to vector<1x16xf32>
    %591 = arith.addf %587, %590 : vector<1x16xf32>
    %592 = math.rsqrt %591 : vector<1x16xf32>
    %593 = vector.broadcast %592 : vector<1x16xf32> to vector<8x16xf32>
    %594 = arith.mulf %589, %593 : vector<8x16xf32>
    %595 = vector.broadcast %572 : vector<1x16xf32> to vector<8x16xf32>
    %596 = arith.mulf %594, %595 : vector<8x16xf32>
    %597 = vector.broadcast %574 : vector<1x16xf32> to vector<8x16xf32>
    %598 = arith.addf %596, %597 : vector<8x16xf32>
    %599 = arith.addf %598, %484 : vector<8x16xf32>
    %c0_316 = arith.constant 0 : index
    %c0_317 = arith.constant 0 : index
    %c0_318 = arith.constant 0 : index
    %600 = vector.load %arg30[%c0_316, %c0_317, %c0_318] : memref<3x16x16xf32, #tpu.memory_space<vmem>>, vector<1x16x16xf32>
    %601 = vector.shape_cast %600 : vector<1x16x16xf32> to vector<16x16xf32>
    %cst_319 = arith.constant dense<0.000000e+00> : vector<8x16xf32>
    %602 = tpu.matmul %599, %601, %cst_319 {dimension_numbers = #tpu.dot_dimension_numbers<[1], [0], [0], [1], [0, 0, 1, 1], [], []>} : vector<8x16xf32>, vector<16x16xf32>, vector<8x16xf32> -> vector<8x16xf32>
    %c0_320 = arith.constant 0 : index
    %c0_321 = arith.constant 0 : index
    %c0_322 = arith.constant 0 : index
    %603 = vector.load %arg27[%c0_320, %c0_321, %c0_322] : memref<3x1x16xf32, #tpu.memory_space<vmem>>, vector<1x1x16xf32>
    %604 = vector.shape_cast %603 : vector<1x1x16xf32> to vector<1x16xf32>
    %605 = vector.broadcast %604 : vector<1x16xf32> to vector<8x16xf32>
    %606 = arith.addf %602, %605 : vector<8x16xf32>
    %cst_323 = arith.constant 0.00999999977 : f32
    %607 = vector.broadcast %cst_323 : f32 to vector<8x16xf32>
    %608 = arith.mulf %607, %606 : vector<8x16xf32>
    %609 = arith.maximumf %606, %608 : vector<8x16xf32>
    %c0_324 = arith.constant 0 : index
    %c0_325 = arith.constant 0 : index
    %c0_326 = arith.constant 0 : index
    %610 = vector.load %arg29[%c0_324, %c0_325, %c0_326] : memref<3x1x16xf32, #tpu.memory_space<vmem>>, vector<1x1x16xf32>
    %611 = vector.shape_cast %610 : vector<1x1x16xf32> to vector<1x16xf32>
    %c0_327 = arith.constant 0 : index
    %c0_328 = arith.constant 0 : index
    %c0_329 = arith.constant 0 : index
    %612 = vector.load %arg28[%c0_327, %c0_328, %c0_329] : memref<3x1x16xf32, #tpu.memory_space<vmem>>, vector<1x1x16xf32>
    %613 = vector.shape_cast %612 : vector<1x1x16xf32> to vector<1x16xf32>
    %cst_330 = arith.constant dense<0.000000e+00> : vector<16xf32>
    %614 = vector.multi_reduction <add>, %609, %cst_330 [0] : vector<8x16xf32> to vector<16xf32>
    %615 = vector.shape_cast %614 : vector<16xf32> to vector<1x16xf32>
    %cst_331 = arith.constant 8.000000e+00 : f32
    %616 = vector.broadcast %cst_331 : f32 to vector<1x16xf32>
    %617 = arith.divf %615, %616 : vector<1x16xf32>
    %618 = arith.mulf %609, %609 : vector<8x16xf32>
    %cst_332 = arith.constant dense<0.000000e+00> : vector<16xf32>
    %619 = vector.multi_reduction <add>, %618, %cst_332 [0] : vector<8x16xf32> to vector<16xf32>
    %620 = vector.shape_cast %619 : vector<16xf32> to vector<1x16xf32>
    %cst_333 = arith.constant 8.000000e+00 : f32
    %621 = vector.broadcast %cst_333 : f32 to vector<1x16xf32>
    %622 = arith.divf %620, %621 : vector<1x16xf32>
    %623 = arith.mulf %617, %617 : vector<1x16xf32>
    %624 = arith.subf %622, %623 : vector<1x16xf32>
    %cst_334 = arith.constant 0.000000e+00 : f32
    %625 = vector.broadcast %cst_334 : f32 to vector<1x16xf32>
    %626 = arith.maximumf %624, %625 : vector<1x16xf32>
    %627 = vector.broadcast %617 : vector<1x16xf32> to vector<8x16xf32>
    %628 = arith.subf %609, %627 : vector<8x16xf32>
    %cst_335 = arith.constant 9.99999974E-6 : f32
    %629 = vector.broadcast %cst_335 : f32 to vector<1x16xf32>
    %630 = arith.addf %626, %629 : vector<1x16xf32>
    %631 = math.rsqrt %630 : vector<1x16xf32>
    %632 = vector.broadcast %631 : vector<1x16xf32> to vector<8x16xf32>
    %633 = arith.mulf %628, %632 : vector<8x16xf32>
    %634 = vector.broadcast %611 : vector<1x16xf32> to vector<8x16xf32>
    %635 = arith.mulf %633, %634 : vector<8x16xf32>
    %636 = vector.broadcast %613 : vector<1x16xf32> to vector<8x16xf32>
    %637 = arith.addf %635, %636 : vector<8x16xf32>
    %c1_336 = arith.constant 1 : index
    %c0_337 = arith.constant 0 : index
    %c0_338 = arith.constant 0 : index
    %638 = vector.load %arg30[%c1_336, %c0_337, %c0_338] : memref<3x16x16xf32, #tpu.memory_space<vmem>>, vector<1x16x16xf32>
    %639 = vector.shape_cast %638 : vector<1x16x16xf32> to vector<16x16xf32>
    %cst_339 = arith.constant dense<0.000000e+00> : vector<8x16xf32>
    %640 = tpu.matmul %637, %639, %cst_339 {dimension_numbers = #tpu.dot_dimension_numbers<[1], [0], [0], [1], [0, 0, 1, 1], [], []>} : vector<8x16xf32>, vector<16x16xf32>, vector<8x16xf32> -> vector<8x16xf32>
    %c1_340 = arith.constant 1 : index
    %c0_341 = arith.constant 0 : index
    %c0_342 = arith.constant 0 : index
    %641 = vector.load %arg27[%c1_340, %c0_341, %c0_342] : memref<3x1x16xf32, #tpu.memory_space<vmem>>, vector<1x1x16xf32>
    %642 = vector.shape_cast %641 : vector<1x1x16xf32> to vector<1x16xf32>
    %643 = vector.broadcast %642 : vector<1x16xf32> to vector<8x16xf32>
    %644 = arith.addf %640, %643 : vector<8x16xf32>
    %cst_343 = arith.constant 0.00999999977 : f32
    %645 = vector.broadcast %cst_343 : f32 to vector<8x16xf32>
    %646 = arith.mulf %645, %644 : vector<8x16xf32>
    %647 = arith.maximumf %644, %646 : vector<8x16xf32>
    %c1_344 = arith.constant 1 : index
    %c0_345 = arith.constant 0 : index
    %c0_346 = arith.constant 0 : index
    %648 = vector.load %arg29[%c1_344, %c0_345, %c0_346] : memref<3x1x16xf32, #tpu.memory_space<vmem>>, vector<1x1x16xf32>
    %649 = vector.shape_cast %648 : vector<1x1x16xf32> to vector<1x16xf32>
    %c1_347 = arith.constant 1 : index
    %c0_348 = arith.constant 0 : index
    %c0_349 = arith.constant 0 : index
    %650 = vector.load %arg28[%c1_347, %c0_348, %c0_349] : memref<3x1x16xf32, #tpu.memory_space<vmem>>, vector<1x1x16xf32>
    %651 = vector.shape_cast %650 : vector<1x1x16xf32> to vector<1x16xf32>
    %cst_350 = arith.constant dense<0.000000e+00> : vector<16xf32>
    %652 = vector.multi_reduction <add>, %647, %cst_350 [0] : vector<8x16xf32> to vector<16xf32>
    %653 = vector.shape_cast %652 : vector<16xf32> to vector<1x16xf32>
    %cst_351 = arith.constant 8.000000e+00 : f32
    %654 = vector.broadcast %cst_351 : f32 to vector<1x16xf32>
    %655 = arith.divf %653, %654 : vector<1x16xf32>
    %656 = arith.mulf %647, %647 : vector<8x16xf32>
    %cst_352 = arith.constant dense<0.000000e+00> : vector<16xf32>
    %657 = vector.multi_reduction <add>, %656, %cst_352 [0] : vector<8x16xf32> to vector<16xf32>
    %658 = vector.shape_cast %657 : vector<16xf32> to vector<1x16xf32>
    %cst_353 = arith.constant 8.000000e+00 : f32
    %659 = vector.broadcast %cst_353 : f32 to vector<1x16xf32>
    %660 = arith.divf %658, %659 : vector<1x16xf32>
    %661 = arith.mulf %655, %655 : vector<1x16xf32>
    %662 = arith.subf %660, %661 : vector<1x16xf32>
    %cst_354 = arith.constant 0.000000e+00 : f32
    %663 = vector.broadcast %cst_354 : f32 to vector<1x16xf32>
    %664 = arith.maximumf %662, %663 : vector<1x16xf32>
    %665 = vector.broadcast %655 : vector<1x16xf32> to vector<8x16xf32>
    %666 = arith.subf %647, %665 : vector<8x16xf32>
    %cst_355 = arith.constant 9.99999974E-6 : f32
    %667 = vector.broadcast %cst_355 : f32 to vector<1x16xf32>
    %668 = arith.addf %664, %667 : vector<1x16xf32>
    %669 = math.rsqrt %668 : vector<1x16xf32>
    %670 = vector.broadcast %669 : vector<1x16xf32> to vector<8x16xf32>
    %671 = arith.mulf %666, %670 : vector<8x16xf32>
    %672 = vector.broadcast %649 : vector<1x16xf32> to vector<8x16xf32>
    %673 = arith.mulf %671, %672 : vector<8x16xf32>
    %674 = vector.broadcast %651 : vector<1x16xf32> to vector<8x16xf32>
    %675 = arith.addf %673, %674 : vector<8x16xf32>
    %c2_356 = arith.constant 2 : index
    %c0_357 = arith.constant 0 : index
    %c0_358 = arith.constant 0 : index
    %676 = vector.load %arg30[%c2_356, %c0_357, %c0_358] : memref<3x16x16xf32, #tpu.memory_space<vmem>>, vector<1x16x16xf32>
    %677 = vector.shape_cast %676 : vector<1x16x16xf32> to vector<16x16xf32>
    %cst_359 = arith.constant dense<0.000000e+00> : vector<8x16xf32>
    %678 = tpu.matmul %675, %677, %cst_359 {dimension_numbers = #tpu.dot_dimension_numbers<[1], [0], [0], [1], [0, 0, 1, 1], [], []>} : vector<8x16xf32>, vector<16x16xf32>, vector<8x16xf32> -> vector<8x16xf32>
    %c2_360 = arith.constant 2 : index
    %c0_361 = arith.constant 0 : index
    %c0_362 = arith.constant 0 : index
    %679 = vector.load %arg27[%c2_360, %c0_361, %c0_362] : memref<3x1x16xf32, #tpu.memory_space<vmem>>, vector<1x1x16xf32>
    %680 = vector.shape_cast %679 : vector<1x1x16xf32> to vector<1x16xf32>
    %681 = vector.broadcast %680 : vector<1x16xf32> to vector<8x16xf32>
    %682 = arith.addf %678, %681 : vector<8x16xf32>
    %cst_363 = arith.constant 0.00999999977 : f32
    %683 = vector.broadcast %cst_363 : f32 to vector<8x16xf32>
    %684 = arith.mulf %683, %682 : vector<8x16xf32>
    %685 = arith.maximumf %682, %684 : vector<8x16xf32>
    %c2_364 = arith.constant 2 : index
    %c0_365 = arith.constant 0 : index
    %c0_366 = arith.constant 0 : index
    %686 = vector.load %arg29[%c2_364, %c0_365, %c0_366] : memref<3x1x16xf32, #tpu.memory_space<vmem>>, vector<1x1x16xf32>
    %687 = vector.shape_cast %686 : vector<1x1x16xf32> to vector<1x16xf32>
    %c2_367 = arith.constant 2 : index
    %c0_368 = arith.constant 0 : index
    %c0_369 = arith.constant 0 : index
    %688 = vector.load %arg28[%c2_367, %c0_368, %c0_369] : memref<3x1x16xf32, #tpu.memory_space<vmem>>, vector<1x1x16xf32>
    %689 = vector.shape_cast %688 : vector<1x1x16xf32> to vector<1x16xf32>
    %cst_370 = arith.constant dense<0.000000e+00> : vector<16xf32>
    %690 = vector.multi_reduction <add>, %685, %cst_370 [0] : vector<8x16xf32> to vector<16xf32>
    %691 = vector.shape_cast %690 : vector<16xf32> to vector<1x16xf32>
    %cst_371 = arith.constant 8.000000e+00 : f32
    %692 = vector.broadcast %cst_371 : f32 to vector<1x16xf32>
    %693 = arith.divf %691, %692 : vector<1x16xf32>
    %694 = arith.mulf %685, %685 : vector<8x16xf32>
    %cst_372 = arith.constant dense<0.000000e+00> : vector<16xf32>
    %695 = vector.multi_reduction <add>, %694, %cst_372 [0] : vector<8x16xf32> to vector<16xf32>
    %696 = vector.shape_cast %695 : vector<16xf32> to vector<1x16xf32>
    %cst_373 = arith.constant 8.000000e+00 : f32
    %697 = vector.broadcast %cst_373 : f32 to vector<1x16xf32>
    %698 = arith.divf %696, %697 : vector<1x16xf32>
    %699 = arith.mulf %693, %693 : vector<1x16xf32>
    %700 = arith.subf %698, %699 : vector<1x16xf32>
    %cst_374 = arith.constant 0.000000e+00 : f32
    %701 = vector.broadcast %cst_374 : f32 to vector<1x16xf32>
    %702 = arith.maximumf %700, %701 : vector<1x16xf32>
    %703 = vector.broadcast %693 : vector<1x16xf32> to vector<8x16xf32>
    %704 = arith.subf %685, %703 : vector<8x16xf32>
    %cst_375 = arith.constant 9.99999974E-6 : f32
    %705 = vector.broadcast %cst_375 : f32 to vector<1x16xf32>
    %706 = arith.addf %702, %705 : vector<1x16xf32>
    %707 = math.rsqrt %706 : vector<1x16xf32>
    %708 = vector.broadcast %707 : vector<1x16xf32> to vector<8x16xf32>
    %709 = arith.mulf %704, %708 : vector<8x16xf32>
    %710 = vector.broadcast %687 : vector<1x16xf32> to vector<8x16xf32>
    %711 = arith.mulf %709, %710 : vector<8x16xf32>
    %712 = vector.broadcast %689 : vector<1x16xf32> to vector<8x16xf32>
    %713 = arith.addf %711, %712 : vector<8x16xf32>
    %714 = arith.addf %713, %599 : vector<8x16xf32>
    %c0_376 = arith.constant 0 : index
    %c0_377 = arith.constant 0 : index
    %715 = vector.load %arg32[%c0_376, %c0_377] : memref<32x32xf32, #tpu.memory_space<vmem>>, vector<16x32xf32>
    %cst_378 = arith.constant dense<0.000000e+00> : vector<8x32xf32>
    %716 = tpu.matmul %714, %715, %cst_378 {dimension_numbers = #tpu.dot_dimension_numbers<[1], [0], [0], [1], [0, 0, 1, 1], [], []>} : vector<8x16xf32>, vector<16x32xf32>, vector<8x32xf32> -> vector<8x32xf32>
    %c16 = arith.constant 16 : index
    %c0_379 = arith.constant 0 : index
    %717 = vector.load %arg32[%c16, %c0_379] : memref<32x32xf32, #tpu.memory_space<vmem>>, vector<16x32xf32>
    %cst_380 = arith.constant dense<0.000000e+00> : vector<8x32xf32>
    %718 = tpu.matmul %238, %717, %cst_380 {dimension_numbers = #tpu.dot_dimension_numbers<[1], [0], [0], [1], [0, 0, 1, 1], [], []>} : vector<8x16xf32>, vector<16x32xf32>, vector<8x32xf32> -> vector<8x32xf32>
    %719 = arith.addf %716, %718 : vector<8x32xf32>
    %c0_381 = arith.constant 0 : index
    %c0_382 = arith.constant 0 : index
    %720 = vector.load %arg31[%c0_381, %c0_382] : memref<1x32xf32, #tpu.memory_space<vmem>>, vector<1x32xf32>
    %721 = vector.broadcast %720 : vector<1x32xf32> to vector<8x32xf32>
    %722 = arith.addf %719, %721 : vector<8x32xf32>
    %cst_383 = arith.constant 0.00999999977 : f32
    %723 = vector.broadcast %cst_383 : f32 to vector<8x32xf32>
    %724 = arith.mulf %723, %722 : vector<8x32xf32>
    %725 = arith.maximumf %722, %724 : vector<8x32xf32>
    %c0_384 = arith.constant 0 : index
    %c0_385 = arith.constant 0 : index
    %c0_386 = arith.constant 0 : index
    %726 = vector.load %arg36[%c0_384, %c0_385, %c0_386] : memref<3x32x32xf32, #tpu.memory_space<vmem>>, vector<1x32x32xf32>
    %727 = vector.shape_cast %726 : vector<1x32x32xf32> to vector<32x32xf32>
    %cst_387 = arith.constant dense<0.000000e+00> : vector<8x32xf32>
    %728 = tpu.matmul %725, %727, %cst_387 {dimension_numbers = #tpu.dot_dimension_numbers<[1], [0], [0], [1], [0, 0, 1, 1], [], []>} : vector<8x32xf32>, vector<32x32xf32>, vector<8x32xf32> -> vector<8x32xf32>
    %c0_388 = arith.constant 0 : index
    %c0_389 = arith.constant 0 : index
    %c0_390 = arith.constant 0 : index
    %729 = vector.load %arg33[%c0_388, %c0_389, %c0_390] : memref<3x1x32xf32, #tpu.memory_space<vmem>>, vector<1x1x32xf32>
    %730 = vector.shape_cast %729 : vector<1x1x32xf32> to vector<1x32xf32>
    %731 = vector.broadcast %730 : vector<1x32xf32> to vector<8x32xf32>
    %732 = arith.addf %728, %731 : vector<8x32xf32>
    %cst_391 = arith.constant 0.00999999977 : f32
    %733 = vector.broadcast %cst_391 : f32 to vector<8x32xf32>
    %734 = arith.mulf %733, %732 : vector<8x32xf32>
    %735 = arith.maximumf %732, %734 : vector<8x32xf32>
    %c0_392 = arith.constant 0 : index
    %c0_393 = arith.constant 0 : index
    %c0_394 = arith.constant 0 : index
    %736 = vector.load %arg35[%c0_392, %c0_393, %c0_394] : memref<3x1x32xf32, #tpu.memory_space<vmem>>, vector<1x1x32xf32>
    %737 = vector.shape_cast %736 : vector<1x1x32xf32> to vector<1x32xf32>
    %c0_395 = arith.constant 0 : index
    %c0_396 = arith.constant 0 : index
    %c0_397 = arith.constant 0 : index
    %738 = vector.load %arg34[%c0_395, %c0_396, %c0_397] : memref<3x1x32xf32, #tpu.memory_space<vmem>>, vector<1x1x32xf32>
    %739 = vector.shape_cast %738 : vector<1x1x32xf32> to vector<1x32xf32>
    %cst_398 = arith.constant dense<0.000000e+00> : vector<32xf32>
    %740 = vector.multi_reduction <add>, %735, %cst_398 [0] : vector<8x32xf32> to vector<32xf32>
    %741 = vector.shape_cast %740 : vector<32xf32> to vector<1x32xf32>
    %cst_399 = arith.constant 8.000000e+00 : f32
    %742 = vector.broadcast %cst_399 : f32 to vector<1x32xf32>
    %743 = arith.divf %741, %742 : vector<1x32xf32>
    %744 = arith.mulf %735, %735 : vector<8x32xf32>
    %cst_400 = arith.constant dense<0.000000e+00> : vector<32xf32>
    %745 = vector.multi_reduction <add>, %744, %cst_400 [0] : vector<8x32xf32> to vector<32xf32>
    %746 = vector.shape_cast %745 : vector<32xf32> to vector<1x32xf32>
    %cst_401 = arith.constant 8.000000e+00 : f32
    %747 = vector.broadcast %cst_401 : f32 to vector<1x32xf32>
    %748 = arith.divf %746, %747 : vector<1x32xf32>
    %749 = arith.mulf %743, %743 : vector<1x32xf32>
    %750 = arith.subf %748, %749 : vector<1x32xf32>
    %cst_402 = arith.constant 0.000000e+00 : f32
    %751 = vector.broadcast %cst_402 : f32 to vector<1x32xf32>
    %752 = arith.maximumf %750, %751 : vector<1x32xf32>
    %753 = vector.broadcast %743 : vector<1x32xf32> to vector<8x32xf32>
    %754 = arith.subf %735, %753 : vector<8x32xf32>
    %cst_403 = arith.constant 9.99999974E-6 : f32
    %755 = vector.broadcast %cst_403 : f32 to vector<1x32xf32>
    %756 = arith.addf %752, %755 : vector<1x32xf32>
    %757 = math.rsqrt %756 : vector<1x32xf32>
    %758 = vector.broadcast %757 : vector<1x32xf32> to vector<8x32xf32>
    %759 = arith.mulf %754, %758 : vector<8x32xf32>
    %760 = vector.broadcast %737 : vector<1x32xf32> to vector<8x32xf32>
    %761 = arith.mulf %759, %760 : vector<8x32xf32>
    %762 = vector.broadcast %739 : vector<1x32xf32> to vector<8x32xf32>
    %763 = arith.addf %761, %762 : vector<8x32xf32>
    %c1_404 = arith.constant 1 : index
    %c0_405 = arith.constant 0 : index
    %c0_406 = arith.constant 0 : index
    %764 = vector.load %arg36[%c1_404, %c0_405, %c0_406] : memref<3x32x32xf32, #tpu.memory_space<vmem>>, vector<1x32x32xf32>
    %765 = vector.shape_cast %764 : vector<1x32x32xf32> to vector<32x32xf32>
    %cst_407 = arith.constant dense<0.000000e+00> : vector<8x32xf32>
    %766 = tpu.matmul %763, %765, %cst_407 {dimension_numbers = #tpu.dot_dimension_numbers<[1], [0], [0], [1], [0, 0, 1, 1], [], []>} : vector<8x32xf32>, vector<32x32xf32>, vector<8x32xf32> -> vector<8x32xf32>
    %c1_408 = arith.constant 1 : index
    %c0_409 = arith.constant 0 : index
    %c0_410 = arith.constant 0 : index
    %767 = vector.load %arg33[%c1_408, %c0_409, %c0_410] : memref<3x1x32xf32, #tpu.memory_space<vmem>>, vector<1x1x32xf32>
    %768 = vector.shape_cast %767 : vector<1x1x32xf32> to vector<1x32xf32>
    %769 = vector.broadcast %768 : vector<1x32xf32> to vector<8x32xf32>
    %770 = arith.addf %766, %769 : vector<8x32xf32>
    %cst_411 = arith.constant 0.00999999977 : f32
    %771 = vector.broadcast %cst_411 : f32 to vector<8x32xf32>
    %772 = arith.mulf %771, %770 : vector<8x32xf32>
    %773 = arith.maximumf %770, %772 : vector<8x32xf32>
    %c1_412 = arith.constant 1 : index
    %c0_413 = arith.constant 0 : index
    %c0_414 = arith.constant 0 : index
    %774 = vector.load %arg35[%c1_412, %c0_413, %c0_414] : memref<3x1x32xf32, #tpu.memory_space<vmem>>, vector<1x1x32xf32>
    %775 = vector.shape_cast %774 : vector<1x1x32xf32> to vector<1x32xf32>
    %c1_415 = arith.constant 1 : index
    %c0_416 = arith.constant 0 : index
    %c0_417 = arith.constant 0 : index
    %776 = vector.load %arg34[%c1_415, %c0_416, %c0_417] : memref<3x1x32xf32, #tpu.memory_space<vmem>>, vector<1x1x32xf32>
    %777 = vector.shape_cast %776 : vector<1x1x32xf32> to vector<1x32xf32>
    %cst_418 = arith.constant dense<0.000000e+00> : vector<32xf32>
    %778 = vector.multi_reduction <add>, %773, %cst_418 [0] : vector<8x32xf32> to vector<32xf32>
    %779 = vector.shape_cast %778 : vector<32xf32> to vector<1x32xf32>
    %cst_419 = arith.constant 8.000000e+00 : f32
    %780 = vector.broadcast %cst_419 : f32 to vector<1x32xf32>
    %781 = arith.divf %779, %780 : vector<1x32xf32>
    %782 = arith.mulf %773, %773 : vector<8x32xf32>
    %cst_420 = arith.constant dense<0.000000e+00> : vector<32xf32>
    %783 = vector.multi_reduction <add>, %782, %cst_420 [0] : vector<8x32xf32> to vector<32xf32>
    %784 = vector.shape_cast %783 : vector<32xf32> to vector<1x32xf32>
    %cst_421 = arith.constant 8.000000e+00 : f32
    %785 = vector.broadcast %cst_421 : f32 to vector<1x32xf32>
    %786 = arith.divf %784, %785 : vector<1x32xf32>
    %787 = arith.mulf %781, %781 : vector<1x32xf32>
    %788 = arith.subf %786, %787 : vector<1x32xf32>
    %cst_422 = arith.constant 0.000000e+00 : f32
    %789 = vector.broadcast %cst_422 : f32 to vector<1x32xf32>
    %790 = arith.maximumf %788, %789 : vector<1x32xf32>
    %791 = vector.broadcast %781 : vector<1x32xf32> to vector<8x32xf32>
    %792 = arith.subf %773, %791 : vector<8x32xf32>
    %cst_423 = arith.constant 9.99999974E-6 : f32
    %793 = vector.broadcast %cst_423 : f32 to vector<1x32xf32>
    %794 = arith.addf %790, %793 : vector<1x32xf32>
    %795 = math.rsqrt %794 : vector<1x32xf32>
    %796 = vector.broadcast %795 : vector<1x32xf32> to vector<8x32xf32>
    %797 = arith.mulf %792, %796 : vector<8x32xf32>
    %798 = vector.broadcast %775 : vector<1x32xf32> to vector<8x32xf32>
    %799 = arith.mulf %797, %798 : vector<8x32xf32>
    %800 = vector.broadcast %777 : vector<1x32xf32> to vector<8x32xf32>
    %801 = arith.addf %799, %800 : vector<8x32xf32>
    %c2_424 = arith.constant 2 : index
    %c0_425 = arith.constant 0 : index
    %c0_426 = arith.constant 0 : index
    %802 = vector.load %arg36[%c2_424, %c0_425, %c0_426] : memref<3x32x32xf32, #tpu.memory_space<vmem>>, vector<1x32x32xf32>
    %803 = vector.shape_cast %802 : vector<1x32x32xf32> to vector<32x32xf32>
    %cst_427 = arith.constant dense<0.000000e+00> : vector<8x32xf32>
    %804 = tpu.matmul %801, %803, %cst_427 {dimension_numbers = #tpu.dot_dimension_numbers<[1], [0], [0], [1], [0, 0, 1, 1], [], []>} : vector<8x32xf32>, vector<32x32xf32>, vector<8x32xf32> -> vector<8x32xf32>
    %c2_428 = arith.constant 2 : index
    %c0_429 = arith.constant 0 : index
    %c0_430 = arith.constant 0 : index
    %805 = vector.load %arg33[%c2_428, %c0_429, %c0_430] : memref<3x1x32xf32, #tpu.memory_space<vmem>>, vector<1x1x32xf32>
    %806 = vector.shape_cast %805 : vector<1x1x32xf32> to vector<1x32xf32>
    %807 = vector.broadcast %806 : vector<1x32xf32> to vector<8x32xf32>
    %808 = arith.addf %804, %807 : vector<8x32xf32>
    %cst_431 = arith.constant 0.00999999977 : f32
    %809 = vector.broadcast %cst_431 : f32 to vector<8x32xf32>
    %810 = arith.mulf %809, %808 : vector<8x32xf32>
    %811 = arith.maximumf %808, %810 : vector<8x32xf32>
    %c2_432 = arith.constant 2 : index
    %c0_433 = arith.constant 0 : index
    %c0_434 = arith.constant 0 : index
    %812 = vector.load %arg35[%c2_432, %c0_433, %c0_434] : memref<3x1x32xf32, #tpu.memory_space<vmem>>, vector<1x1x32xf32>
    %813 = vector.shape_cast %812 : vector<1x1x32xf32> to vector<1x32xf32>
    %c2_435 = arith.constant 2 : index
    %c0_436 = arith.constant 0 : index
    %c0_437 = arith.constant 0 : index
    %814 = vector.load %arg34[%c2_435, %c0_436, %c0_437] : memref<3x1x32xf32, #tpu.memory_space<vmem>>, vector<1x1x32xf32>
    %815 = vector.shape_cast %814 : vector<1x1x32xf32> to vector<1x32xf32>
    %cst_438 = arith.constant dense<0.000000e+00> : vector<32xf32>
    %816 = vector.multi_reduction <add>, %811, %cst_438 [0] : vector<8x32xf32> to vector<32xf32>
    %817 = vector.shape_cast %816 : vector<32xf32> to vector<1x32xf32>
    %cst_439 = arith.constant 8.000000e+00 : f32
    %818 = vector.broadcast %cst_439 : f32 to vector<1x32xf32>
    %819 = arith.divf %817, %818 : vector<1x32xf32>
    %820 = arith.mulf %811, %811 : vector<8x32xf32>
    %cst_440 = arith.constant dense<0.000000e+00> : vector<32xf32>
    %821 = vector.multi_reduction <add>, %820, %cst_440 [0] : vector<8x32xf32> to vector<32xf32>
    %822 = vector.shape_cast %821 : vector<32xf32> to vector<1x32xf32>
    %cst_441 = arith.constant 8.000000e+00 : f32
    %823 = vector.broadcast %cst_441 : f32 to vector<1x32xf32>
    %824 = arith.divf %822, %823 : vector<1x32xf32>
    %825 = arith.mulf %819, %819 : vector<1x32xf32>
    %826 = arith.subf %824, %825 : vector<1x32xf32>
    %cst_442 = arith.constant 0.000000e+00 : f32
    %827 = vector.broadcast %cst_442 : f32 to vector<1x32xf32>
    %828 = arith.maximumf %826, %827 : vector<1x32xf32>
    %829 = vector.broadcast %819 : vector<1x32xf32> to vector<8x32xf32>
    %830 = arith.subf %811, %829 : vector<8x32xf32>
    %cst_443 = arith.constant 9.99999974E-6 : f32
    %831 = vector.broadcast %cst_443 : f32 to vector<1x32xf32>
    %832 = arith.addf %828, %831 : vector<1x32xf32>
    %833 = math.rsqrt %832 : vector<1x32xf32>
    %834 = vector.broadcast %833 : vector<1x32xf32> to vector<8x32xf32>
    %835 = arith.mulf %830, %834 : vector<8x32xf32>
    %836 = vector.broadcast %813 : vector<1x32xf32> to vector<8x32xf32>
    %837 = arith.mulf %835, %836 : vector<8x32xf32>
    %838 = vector.broadcast %815 : vector<1x32xf32> to vector<8x32xf32>
    %839 = arith.addf %837, %838 : vector<8x32xf32>
    %840 = arith.addf %839, %725 : vector<8x32xf32>
    %c0_444 = arith.constant 0 : index
    %c0_445 = arith.constant 0 : index
    %c0_446 = arith.constant 0 : index
    %841 = vector.load %arg40[%c0_444, %c0_445, %c0_446] : memref<3x32x32xf32, #tpu.memory_space<vmem>>, vector<1x32x32xf32>
    %842 = vector.shape_cast %841 : vector<1x32x32xf32> to vector<32x32xf32>
    %cst_447 = arith.constant dense<0.000000e+00> : vector<8x32xf32>
    %843 = tpu.matmul %840, %842, %cst_447 {dimension_numbers = #tpu.dot_dimension_numbers<[1], [0], [0], [1], [0, 0, 1, 1], [], []>} : vector<8x32xf32>, vector<32x32xf32>, vector<8x32xf32> -> vector<8x32xf32>
    %c0_448 = arith.constant 0 : index
    %c0_449 = arith.constant 0 : index
    %c0_450 = arith.constant 0 : index
    %844 = vector.load %arg37[%c0_448, %c0_449, %c0_450] : memref<3x1x32xf32, #tpu.memory_space<vmem>>, vector<1x1x32xf32>
    %845 = vector.shape_cast %844 : vector<1x1x32xf32> to vector<1x32xf32>
    %846 = vector.broadcast %845 : vector<1x32xf32> to vector<8x32xf32>
    %847 = arith.addf %843, %846 : vector<8x32xf32>
    %cst_451 = arith.constant 0.00999999977 : f32
    %848 = vector.broadcast %cst_451 : f32 to vector<8x32xf32>
    %849 = arith.mulf %848, %847 : vector<8x32xf32>
    %850 = arith.maximumf %847, %849 : vector<8x32xf32>
    %c0_452 = arith.constant 0 : index
    %c0_453 = arith.constant 0 : index
    %c0_454 = arith.constant 0 : index
    %851 = vector.load %arg39[%c0_452, %c0_453, %c0_454] : memref<3x1x32xf32, #tpu.memory_space<vmem>>, vector<1x1x32xf32>
    %852 = vector.shape_cast %851 : vector<1x1x32xf32> to vector<1x32xf32>
    %c0_455 = arith.constant 0 : index
    %c0_456 = arith.constant 0 : index
    %c0_457 = arith.constant 0 : index
    %853 = vector.load %arg38[%c0_455, %c0_456, %c0_457] : memref<3x1x32xf32, #tpu.memory_space<vmem>>, vector<1x1x32xf32>
    %854 = vector.shape_cast %853 : vector<1x1x32xf32> to vector<1x32xf32>
    %cst_458 = arith.constant dense<0.000000e+00> : vector<32xf32>
    %855 = vector.multi_reduction <add>, %850, %cst_458 [0] : vector<8x32xf32> to vector<32xf32>
    %856 = vector.shape_cast %855 : vector<32xf32> to vector<1x32xf32>
    %cst_459 = arith.constant 8.000000e+00 : f32
    %857 = vector.broadcast %cst_459 : f32 to vector<1x32xf32>
    %858 = arith.divf %856, %857 : vector<1x32xf32>
    %859 = arith.mulf %850, %850 : vector<8x32xf32>
    %cst_460 = arith.constant dense<0.000000e+00> : vector<32xf32>
    %860 = vector.multi_reduction <add>, %859, %cst_460 [0] : vector<8x32xf32> to vector<32xf32>
    %861 = vector.shape_cast %860 : vector<32xf32> to vector<1x32xf32>
    %cst_461 = arith.constant 8.000000e+00 : f32
    %862 = vector.broadcast %cst_461 : f32 to vector<1x32xf32>
    %863 = arith.divf %861, %862 : vector<1x32xf32>
    %864 = arith.mulf %858, %858 : vector<1x32xf32>
    %865 = arith.subf %863, %864 : vector<1x32xf32>
    %cst_462 = arith.constant 0.000000e+00 : f32
    %866 = vector.broadcast %cst_462 : f32 to vector<1x32xf32>
    %867 = arith.maximumf %865, %866 : vector<1x32xf32>
    %868 = vector.broadcast %858 : vector<1x32xf32> to vector<8x32xf32>
    %869 = arith.subf %850, %868 : vector<8x32xf32>
    %cst_463 = arith.constant 9.99999974E-6 : f32
    %870 = vector.broadcast %cst_463 : f32 to vector<1x32xf32>
    %871 = arith.addf %867, %870 : vector<1x32xf32>
    %872 = math.rsqrt %871 : vector<1x32xf32>
    %873 = vector.broadcast %872 : vector<1x32xf32> to vector<8x32xf32>
    %874 = arith.mulf %869, %873 : vector<8x32xf32>
    %875 = vector.broadcast %852 : vector<1x32xf32> to vector<8x32xf32>
    %876 = arith.mulf %874, %875 : vector<8x32xf32>
    %877 = vector.broadcast %854 : vector<1x32xf32> to vector<8x32xf32>
    %878 = arith.addf %876, %877 : vector<8x32xf32>
    %c1_464 = arith.constant 1 : index
    %c0_465 = arith.constant 0 : index
    %c0_466 = arith.constant 0 : index
    %879 = vector.load %arg40[%c1_464, %c0_465, %c0_466] : memref<3x32x32xf32, #tpu.memory_space<vmem>>, vector<1x32x32xf32>
    %880 = vector.shape_cast %879 : vector<1x32x32xf32> to vector<32x32xf32>
    %cst_467 = arith.constant dense<0.000000e+00> : vector<8x32xf32>
    %881 = tpu.matmul %878, %880, %cst_467 {dimension_numbers = #tpu.dot_dimension_numbers<[1], [0], [0], [1], [0, 0, 1, 1], [], []>} : vector<8x32xf32>, vector<32x32xf32>, vector<8x32xf32> -> vector<8x32xf32>
    %c1_468 = arith.constant 1 : index
    %c0_469 = arith.constant 0 : index
    %c0_470 = arith.constant 0 : index
    %882 = vector.load %arg37[%c1_468, %c0_469, %c0_470] : memref<3x1x32xf32, #tpu.memory_space<vmem>>, vector<1x1x32xf32>
    %883 = vector.shape_cast %882 : vector<1x1x32xf32> to vector<1x32xf32>
    %884 = vector.broadcast %883 : vector<1x32xf32> to vector<8x32xf32>
    %885 = arith.addf %881, %884 : vector<8x32xf32>
    %cst_471 = arith.constant 0.00999999977 : f32
    %886 = vector.broadcast %cst_471 : f32 to vector<8x32xf32>
    %887 = arith.mulf %886, %885 : vector<8x32xf32>
    %888 = arith.maximumf %885, %887 : vector<8x32xf32>
    %c1_472 = arith.constant 1 : index
    %c0_473 = arith.constant 0 : index
    %c0_474 = arith.constant 0 : index
    %889 = vector.load %arg39[%c1_472, %c0_473, %c0_474] : memref<3x1x32xf32, #tpu.memory_space<vmem>>, vector<1x1x32xf32>
    %890 = vector.shape_cast %889 : vector<1x1x32xf32> to vector<1x32xf32>
    %c1_475 = arith.constant 1 : index
    %c0_476 = arith.constant 0 : index
    %c0_477 = arith.constant 0 : index
    %891 = vector.load %arg38[%c1_475, %c0_476, %c0_477] : memref<3x1x32xf32, #tpu.memory_space<vmem>>, vector<1x1x32xf32>
    %892 = vector.shape_cast %891 : vector<1x1x32xf32> to vector<1x32xf32>
    %cst_478 = arith.constant dense<0.000000e+00> : vector<32xf32>
    %893 = vector.multi_reduction <add>, %888, %cst_478 [0] : vector<8x32xf32> to vector<32xf32>
    %894 = vector.shape_cast %893 : vector<32xf32> to vector<1x32xf32>
    %cst_479 = arith.constant 8.000000e+00 : f32
    %895 = vector.broadcast %cst_479 : f32 to vector<1x32xf32>
    %896 = arith.divf %894, %895 : vector<1x32xf32>
    %897 = arith.mulf %888, %888 : vector<8x32xf32>
    %cst_480 = arith.constant dense<0.000000e+00> : vector<32xf32>
    %898 = vector.multi_reduction <add>, %897, %cst_480 [0] : vector<8x32xf32> to vector<32xf32>
    %899 = vector.shape_cast %898 : vector<32xf32> to vector<1x32xf32>
    %cst_481 = arith.constant 8.000000e+00 : f32
    %900 = vector.broadcast %cst_481 : f32 to vector<1x32xf32>
    %901 = arith.divf %899, %900 : vector<1x32xf32>
    %902 = arith.mulf %896, %896 : vector<1x32xf32>
    %903 = arith.subf %901, %902 : vector<1x32xf32>
    %cst_482 = arith.constant 0.000000e+00 : f32
    %904 = vector.broadcast %cst_482 : f32 to vector<1x32xf32>
    %905 = arith.maximumf %903, %904 : vector<1x32xf32>
    %906 = vector.broadcast %896 : vector<1x32xf32> to vector<8x32xf32>
    %907 = arith.subf %888, %906 : vector<8x32xf32>
    %cst_483 = arith.constant 9.99999974E-6 : f32
    %908 = vector.broadcast %cst_483 : f32 to vector<1x32xf32>
    %909 = arith.addf %905, %908 : vector<1x32xf32>
    %910 = math.rsqrt %909 : vector<1x32xf32>
    %911 = vector.broadcast %910 : vector<1x32xf32> to vector<8x32xf32>
    %912 = arith.mulf %907, %911 : vector<8x32xf32>
    %913 = vector.broadcast %890 : vector<1x32xf32> to vector<8x32xf32>
    %914 = arith.mulf %912, %913 : vector<8x32xf32>
    %915 = vector.broadcast %892 : vector<1x32xf32> to vector<8x32xf32>
    %916 = arith.addf %914, %915 : vector<8x32xf32>
    %c2_484 = arith.constant 2 : index
    %c0_485 = arith.constant 0 : index
    %c0_486 = arith.constant 0 : index
    %917 = vector.load %arg40[%c2_484, %c0_485, %c0_486] : memref<3x32x32xf32, #tpu.memory_space<vmem>>, vector<1x32x32xf32>
    %918 = vector.shape_cast %917 : vector<1x32x32xf32> to vector<32x32xf32>
    %cst_487 = arith.constant dense<0.000000e+00> : vector<8x32xf32>
    %919 = tpu.matmul %916, %918, %cst_487 {dimension_numbers = #tpu.dot_dimension_numbers<[1], [0], [0], [1], [0, 0, 1, 1], [], []>} : vector<8x32xf32>, vector<32x32xf32>, vector<8x32xf32> -> vector<8x32xf32>
    %c2_488 = arith.constant 2 : index
    %c0_489 = arith.constant 0 : index
    %c0_490 = arith.constant 0 : index
    %920 = vector.load %arg37[%c2_488, %c0_489, %c0_490] : memref<3x1x32xf32, #tpu.memory_space<vmem>>, vector<1x1x32xf32>
    %921 = vector.shape_cast %920 : vector<1x1x32xf32> to vector<1x32xf32>
    %922 = vector.broadcast %921 : vector<1x32xf32> to vector<8x32xf32>
    %923 = arith.addf %919, %922 : vector<8x32xf32>
    %cst_491 = arith.constant 0.00999999977 : f32
    %924 = vector.broadcast %cst_491 : f32 to vector<8x32xf32>
    %925 = arith.mulf %924, %923 : vector<8x32xf32>
    %926 = arith.maximumf %923, %925 : vector<8x32xf32>
    %c2_492 = arith.constant 2 : index
    %c0_493 = arith.constant 0 : index
    %c0_494 = arith.constant 0 : index
    %927 = vector.load %arg39[%c2_492, %c0_493, %c0_494] : memref<3x1x32xf32, #tpu.memory_space<vmem>>, vector<1x1x32xf32>
    %928 = vector.shape_cast %927 : vector<1x1x32xf32> to vector<1x32xf32>
    %c2_495 = arith.constant 2 : index
    %c0_496 = arith.constant 0 : index
    %c0_497 = arith.constant 0 : index
    %929 = vector.load %arg38[%c2_495, %c0_496, %c0_497] : memref<3x1x32xf32, #tpu.memory_space<vmem>>, vector<1x1x32xf32>
    %930 = vector.shape_cast %929 : vector<1x1x32xf32> to vector<1x32xf32>
    %cst_498 = arith.constant dense<0.000000e+00> : vector<32xf32>
    %931 = vector.multi_reduction <add>, %926, %cst_498 [0] : vector<8x32xf32> to vector<32xf32>
    %932 = vector.shape_cast %931 : vector<32xf32> to vector<1x32xf32>
    %cst_499 = arith.constant 8.000000e+00 : f32
    %933 = vector.broadcast %cst_499 : f32 to vector<1x32xf32>
    %934 = arith.divf %932, %933 : vector<1x32xf32>
    %935 = arith.mulf %926, %926 : vector<8x32xf32>
    %cst_500 = arith.constant dense<0.000000e+00> : vector<32xf32>
    %936 = vector.multi_reduction <add>, %935, %cst_500 [0] : vector<8x32xf32> to vector<32xf32>
    %937 = vector.shape_cast %936 : vector<32xf32> to vector<1x32xf32>
    %cst_501 = arith.constant 8.000000e+00 : f32
    %938 = vector.broadcast %cst_501 : f32 to vector<1x32xf32>
    %939 = arith.divf %937, %938 : vector<1x32xf32>
    %940 = arith.mulf %934, %934 : vector<1x32xf32>
    %941 = arith.subf %939, %940 : vector<1x32xf32>
    %cst_502 = arith.constant 0.000000e+00 : f32
    %942 = vector.broadcast %cst_502 : f32 to vector<1x32xf32>
    %943 = arith.maximumf %941, %942 : vector<1x32xf32>
    %944 = vector.broadcast %934 : vector<1x32xf32> to vector<8x32xf32>
    %945 = arith.subf %926, %944 : vector<8x32xf32>
    %cst_503 = arith.constant 9.99999974E-6 : f32
    %946 = vector.broadcast %cst_503 : f32 to vector<1x32xf32>
    %947 = arith.addf %943, %946 : vector<1x32xf32>
    %948 = math.rsqrt %947 : vector<1x32xf32>
    %949 = vector.broadcast %948 : vector<1x32xf32> to vector<8x32xf32>
    %950 = arith.mulf %945, %949 : vector<8x32xf32>
    %951 = vector.broadcast %928 : vector<1x32xf32> to vector<8x32xf32>
    %952 = arith.mulf %950, %951 : vector<8x32xf32>
    %953 = vector.broadcast %930 : vector<1x32xf32> to vector<8x32xf32>
    %954 = arith.addf %952, %953 : vector<8x32xf32>
    %955 = arith.addf %954, %840 : vector<8x32xf32>
    %c0_504 = arith.constant 0 : index
    %c0_505 = arith.constant 0 : index
    %956 = vector.load %arg41[%c0_504, %c0_505] : memref<8x32xf32, #tpu.memory_space<vmem>>, vector<8x32xf32>
    tpu.vector_store %arg41[%c0_504, %c0_505], %955 {strides = array<i32>} : memref<8x32xf32, #tpu.memory_space<vmem>>, vector<8x32xf32>,
    return
  }
}

</mosaic_0001>

<bundles_post_ra>
// kernel: run.1
= control target key start
LH: loop header
LB: loop body
LE: loop exit
PB: predicated region body
PF: predicated region fallthrough
CT: control target
= control target key end

     0   :  { %s5698_s6 = smov 1   ;;  %s5699_s10 = smov 2   ;;  %s6531_s0 = inlined_call_operand.smem [shape: u32[42], index: -1, kind: input, shape index: {}] }
   0x1   :  { %s5791_s5 = sld [smem:[%s6531_s0]]   ;;  %s5700_s14 = smov 3  }
   0x2   :  { %s5796_s9 = sld [smem:[%s6531_s0 + %s5698_s6]]   ;;  %s5701_s18 = smov 4  }
   0x3   :  { %s5801_s13 = sld [smem:[%s6531_s0 + %s5699_s10]]   ;;  %s5702_s22 = smov 5  }
   0x4   :  { %s5806_s17 = sld [smem:[%s6531_s0 + %s5700_s14]]   ;;  %s5703_s26 = smov 6  }
   0x5   :  { %s5811_s21 = sld [smem:[%s6531_s0 + %s5701_s18]]   ;;  %s5704_s30 = smov 7  }
   0x6   :  { %s5816_s25 = sld [smem:[%s6531_s0 + %s5702_s22]]   ;;  %s5705_s4 = smov 8  }
   0x7   :  { %6555 = sst [smem:[#allocation79_spill]] %s5791_s5  ;;  %s5706_s10 = smov 9  }
   0x8   :  { %s5821_s29 = sld [smem:[%s6531_s0 + %s5703_s26]]   ;;  %s5707_s15 = smov 10  }
   0x9   :  { %6556 = sst [smem:[#allocation80_spill]] %s5801_s13  ;;  %s5708_s20 = smov 11  }
   0xa   :  { %s5826_s3 = sld [smem:[%s6531_s0 + %s5704_s30]]   ;;  %s5709_s26 = smov 12  }
   0xb   :  { %6557 = sst [smem:[#allocation81_spill]] %s5811_s21  ;;  %s5710_s1 = smov 13  }
   0xc   :  { %s5831_s8 = sld [smem:[%s6531_s0 + %s5705_s4]]   ;;  %s5711_s7 = smov 14  }
   0xd   :  { %s5836_s14 = sld [smem:[%s6531_s0 + %s5706_s10]]   ;;  %s5713_s22 = smov 16  }
   0xe   :  { %6558 = sst [smem:[#allocation82_spill]] %s5821_s29  ;;  %s5714_s28 = smov 17  }
   0xf   :  { %s5841_s19 = sld [smem:[%s6531_s0 + %s5707_s15]]   ;;  %s5712_s15 = smov 15  }
  0x10   :  { %s5846_s24 = sld [smem:[%s6531_s0 + %s5708_s20]]  }
  0x11   :  { %s5851_s30 = sld [smem:[%s6531_s0 + %s5709_s26]]  }
  0x12   :  { %6559 = sst [smem:[#allocation83_spill]] %s5831_s8 }
  0x13   :  { %s5856_s6 = sld [smem:[%s6531_s0 + %s5710_s1]]  }
  0x14   :  { %s5861_s12 = sld [smem:[%s6531_s0 + %s5711_s7]]   ;;  %s5715_s7 = smov 18  }
  0x15   :  { %6560 = sst [smem:[#allocation84_spill]] %s5841_s19 }
  0x16   :  { %s5866_s20 = sld [smem:[%s6531_s0 + %s5712_s15]]   ;;  %s5716_s15 = smov 19  }
  0x17   :  { %6561 = sst [smem:[#allocation85_spill]] %s5851_s30 }
  0x18   :  { %s5871_s27 = sld [smem:[%s6531_s0 + %s5713_s22]]   ;;  %s5717_s22 = smov 20  }
  0x19   :  { %s5876_s4 = sld [smem:[%s6531_s0 + %s5714_s28]]   ;;  %s5718_s28 = smov 21  }
  0x1a   :  { %6562 = sst [smem:[#allocation86_spill]] %s5861_s12 }
  0x1b   :  { %s5881_s12 = sld [smem:[%s6531_s0 + %s5715_s7]]   ;;  %s5719_s7 = smov 22  }
  0x1c   :  { %s5886_s30 = sld [smem:[%s6531_s0 + %s5716_s15]]   ;;  %s5720_s15 = smov 23  }
  0x1d   :  { %s5896_s19 = sld [smem:[%s6531_s0 + %s5718_s28]]   ;;  %s5722_s28 = smov 25  }
  0x1e   :  { %6563 = sst [smem:[#allocation87_spill]] %s5871_s27 }
  0x1f   :  { %s5891_s27 = sld [smem:[%s6531_s0 + %s5717_s22]]   ;;  %s5721_s22 = smov 24  }
  0x20   :  { %s5906_s8 = sld [smem:[%s6531_s0 + %s5720_s15]]   ;;  %s5724_s15 = smov 27  }
  0x21   :  { %6564 = sst [smem:[#allocation88_spill]] %s5881_s12 }
  0x22   :  { %s5901_s12 = sld [smem:[%s6531_s0 + %s5719_s7]]   ;;  %s5723_s7 = smov 26  }
  0x23   :  { %s5916_s29 = sld [smem:[%s6531_s0 + %s5722_s28]]   ;;  %s5726_s28 = smov 29  }
  0x24   :  { %s5926_s21 = sld [smem:[%s6531_s0 + %s5724_s15]]   ;;  %s5728_s15 = smov 31  }
  0x25   :  { %6565 = sst [smem:[#allocation89_spill]] %s5891_s27 }
  0x26   :  { %s5911_s27 = sld [smem:[%s6531_s0 + %s5721_s22]]   ;;  %s5725_s22 = smov 28  }
  0x27   :  { %s5936_s13 = sld [smem:[%s6531_s0 + %s5726_s28]]   ;;  %s5730_s28 = smov 33  }
  0x28   :  { %6566 = sst [smem:[#allocation90_spill]] %s5901_s12 }
  0x29   :  { %s5921_s12 = sld [smem:[%s6531_s0 + %s5723_s7]]   ;;  %s5727_s7 = smov 30  }
  0x2a   :  { %s5946_s5 = sld [smem:[%s6531_s0 + %s5728_s15]]   ;;  %s5732_s15 = smov 35  }
  0x2c   :  { %6567 = sst [smem:[#allocation91_spill]] %s5911_s27 }
  0x2d   :  { %s5931_s27 = sld [smem:[%s6531_s0 + %s5725_s22]]   ;;  %s5729_s22 = smov 32  }
  0x2e   :  { %6570 = sst [smem:[#allocation94_spill]] %s5936_s13 }
  0x2f   :  { %6568 = sst [smem:[#allocation92_spill]] %s5921_s12 }
  0x30   :  { %s5941_s12 = sld [smem:[%s6531_s0 + %s5727_s7]]   ;;  %s5731_s7 = smov 34  }
  0x31   :  { %6572 = sst [smem:[#allocation96_spill]] %s5946_s5 }
  0x32   :  { %s5956_s13 = sld [smem:[%s6531_s0 + %s5730_s28]]   ;;  %s5734_s28 = smov 37  }
  0x33   :  { %6569 = sst [smem:[#allocation93_spill]] %s5931_s27 }
  0x34   :  { %s5951_s27 = sld [smem:[%s6531_s0 + %s5729_s22]]   ;;  %s5733_s22 = smov 36  }
  0x35   :  { %s5966_s5 = sld [smem:[%s6531_s0 + %s5732_s15]]   ;;  %s5736_s15 = smov 39  }
  0x36   :  { %6571 = sst [smem:[#allocation95_spill]] %s5941_s12 }
  0x37   :  { %s5961_s12 = sld [smem:[%s6531_s0 + %s5731_s7]]   ;;  %s5735_s7 = smov 38  }
  0x38   :  { %6574 = sst [smem:[#allocation98_spill]] %s5956_s13 }
  0x39   :  { %s5976_s13 = sld [smem:[%s6531_s0 + %s5734_s28]]   ;;  %s5738_s28 = smov 41  }
  0x3a   :  { %6573 = sst [smem:[#allocation97_spill]] %s5951_s27 }
  0x3b   :  { %6576 = sst [smem:[#allocation100_spill]] %s5966_s5 }
  0x3c   :  { %s5971_s27 = sld [smem:[%s6531_s0 + %s5733_s22]]   ;;  %s5737_s22 = smov 40  }
  0x3d   :  { %6575 = sst [smem:[#allocation99_spill]] %s5961_s12 }
  0x3e   :  { %s5981_s12 = sld [smem:[%s6531_s0 + %s5735_s7]]  }
  0x3f   :  { %6578 = sst [smem:[#allocation102_spill]] %s5976_s13 }
  0x40   :  { %s5986_s5 = sld [smem:[%s6531_s0 + %s5736_s15]]  }
  0x41   :  { %s5996_s13 = sld [smem:[%s6531_s0 + %s5738_s28]]  }
  0x42   :  { %6577 = sst [smem:[#allocation101_spill]] %s5971_s27 }
  0x43   :  { %s5991_s27 = sld [smem:[%s6531_s0 + %s5737_s22]]  }
  0x44   :  { %88 = vsyncpa [#allocation3], 0 }
  0x45   :  { %89 = vsyncpa [#allocation6], 0 }
  0x46   :  { %90 = vsyncpa [#allocation9], 0 }
  0x47   :  { %91 = vsyncpa [#allocation12], 0 }
  0x48   :  { %92 = vsyncpa [#allocation15], 0 }
  0x49   :  { %93 = vsyncpa [#allocation18], 0 }
  0x4a   :  { %94 = vsyncpa [#allocation21], 0 }
  0x4b   :  { %95 = vsyncpa [#allocation24], 0 }
  0x4c   :  { %96 = vsyncpa [#allocation27], 0 }
  0x4d   :  { %97 = vsyncpa [#allocation30], 0 }
  0x4e   :  { %98 = vsyncpa [#allocation33], 0 }
  0x4f   :  { %99 = vsyncpa [#allocation36], 0 }
  0x50   :  { %100 = vsyncpa [#allocation39], 0 }
  0x51   :  { %101 = vsyncpa [#allocation42], 0 }
  0x52   :  { %102 = vsyncpa [#allocation45], 0 }
  0x53   :  { %103 = vsyncpa [#allocation48], 0 }
  0x54   :  { %104 = vsyncpa [#allocation51], 0 }
  0x55   :  { %105 = vsyncpa [#allocation54], 0 }
  0x56   :  { %106 = vsyncpa [#allocation57], 0 }
  0x57   :  { %107 = vsyncpa [#allocation4], 0  ;;  %s5739_s0 = smov [#allocation5]   ;;  %s5740_s10 = smov [#allocation8]  }
  0x58   :  { %s124_s7 = sshll.u32 %s5739_s0, 4  ;;  %s145_s11 = sshll.u32 %s5740_s10, 4  ;;  %s125_s7 = int_to_ptr.vmem [resolvable:$true] %s124_s7  ;;  %s5998_s11 = int_to_ptr.vmem [resolvable:$true] %s145_s11 }
  0x59   :  { %s4844_s15 = scalar_lea.hbm %s5796_s9, 16 }
  0x5a   :  { %p4845_p0 = scmp.ne.s32.totalorder %s5796_s9, %s4844_s15  ;;  %p4848_p1 = scmp.lt.u32.totalorder %s4844_s15, %s5796_s9 }
  0x5c   :  { %p4850_p2 = pnand %p4848_p1, %p4845_p0 }
  0x5e   :  { %4853 = shalt.err (!%p4850_p2)
}
  0x5f   :  { %s4854_s16 = scalar_lea.vmem %s125_s7, 16  ;;  %s4858_s18 = scalar_lea.vmem %s125_s7, 32 }
  0x60   :  { %p4855_p3 = scmp.ne.s32.totalorder %s125_s7, %s4854_s16  ;;  %p4859_p4 = scmp.lt.s32.totalorder %s125_s7, %s125_s7 }
  0x61   :  { %p4860_p5 = scmp.lt.s32.totalorder %s4858_s18, %s4854_s16 }
  0x63   :  { %p4861_p6 = por %p4860_p5, %p4859_p4 }
  0x65   :  { %p4862_p7 = pnand %p4861_p6, %p4855_p3 }
  0x67   :  { %4865 = shalt.err (!%p4862_p7)
}
  0x68   :  { %127 = dma.hbm_to_vmem [thread:$0]  %s5796_s9, 16, %s125_s7, [#allocation6]  }
  0x69   :  { %s4866_s22 = scalar_lea.hbm %s5806_s17, 48 }
  0x6a   :  { %p4867_p8 = scmp.ne.s32.totalorder %s5806_s17, %s4866_s22  ;;  %p4870_p9 = scmp.lt.u32.totalorder %s4866_s22, %s5806_s17 }
  0x6c   :  { %p4872_p10 = pnand %p4870_p9, %p4867_p8 }
  0x6e   :  { %4875 = shalt.err (!%p4872_p10)
}
  0x6f   :  { %s4876_s23 = scalar_lea.vmem %s5998_s11, 48  ;;  %s4880_s26 = scalar_lea.vmem %s5998_s11, 64 }
  0x70   :  { %p4877_p11 = scmp.ne.s32.totalorder %s5998_s11, %s4876_s23  ;;  %p4881_p12 = scmp.lt.s32.totalorder %s5998_s11, %s5998_s11 }
  0x71   :  { %p4882_p13 = scmp.lt.s32.totalorder %s4880_s26, %s4876_s23 }
  0x73   :  { %p4883_p0 = por %p4882_p13, %p4881_p12 }
  0x75   :  { %p4884_p1 = pnand %p4883_p0, %p4877_p11 }
  0x77   :  { %4887 = shalt.err (!%p4884_p1)
}
  0x78   :  { %s5741_s28 = smov 16   ;;  %s5742_s9 = smov 1  }
  0x79   :  { %151 = dma.hbm_to_vmem [thread:$0]  %s5806_s17, 48, %s5998_s11, [#allocation9], %s5741_s28, %s5741_s28, %s5742_s9  }
  0x7a   :  { %s5743_s1 = smov [#allocation11]   ;;  %s5744_s0 = smov [#allocation14]  }
  0x7b   :  { %s169_s2 = sshll.u32 %s5743_s1, 4  ;;  %s193_s7 = sshll.u32 %s5744_s0, 4  ;;  %s170_s2 = int_to_ptr.vmem [resolvable:$true] %s169_s2  ;;  %s6017_s7 = int_to_ptr.vmem [resolvable:$true] %s193_s7 }
  0x7c   :  { %s4888_s10 = scalar_lea.hbm %s5816_s25, 48 }
  0x7d   :  { %p4889_p2 = scmp.ne.s32.totalorder %s5816_s25, %s4888_s10  ;;  %p4892_p3 = scmp.lt.u32.totalorder %s4888_s10, %s5816_s25 }
  0x7f   :  { %p4894_p4 = pnand %p4892_p3, %p4889_p2 }
  0x81   :  { %4897 = shalt.err (!%p4894_p4)
}
  0x82   :  { %s4898_s15 = scalar_lea.vmem %s170_s2, 48  ;;  %s4902_s16 = scalar_lea.vmem %s170_s2, 64 }
  0x83   :  { %p4899_p5 = scmp.ne.s32.totalorder %s170_s2, %s4898_s15  ;;  %p4903_p6 = scmp.lt.s32.totalorder %s170_s2, %s170_s2 }
  0x84   :  { %p4904_p7 = scmp.lt.s32.totalorder %s4902_s16, %s4898_s15 }
  0x86   :  { %p4905_p8 = por %p4904_p7, %p4903_p6 }
  0x88   :  { %p4906_p9 = pnand %p4905_p8, %p4899_p5 }
  0x8a   :  { %4909 = shalt.err (!%p4906_p9)
}
  0x8b   :  { %175 = dma.hbm_to_vmem [thread:$0]  %s5816_s25, 48, %s170_s2, [#allocation12], %s5741_s28, %s5741_s28, %s5742_s9  }
  0x8c   :  { %s4910_s17 = scalar_lea.hbm %s5826_s3, 48 }
  0x8d   :  { %p4911_p10 = scmp.ne.s32.totalorder %s5826_s3, %s4910_s17  ;;  %p4914_p11 = scmp.lt.u32.totalorder %s4910_s17, %s5826_s3 }
  0x8f   :  { %p4916_p12 = pnand %p4914_p11, %p4911_p10 }
  0x91   :  { %4919 = shalt.err (!%p4916_p12)
}
  0x92   :  { %s4920_s11 = scalar_lea.vmem %s6017_s7, 48  ;;  %s4924_s18 = scalar_lea.vmem %s6017_s7, 64 }
  0x93   :  { %p4921_p13 = scmp.ne.s32.totalorder %s6017_s7, %s4920_s11  ;;  %p4925_p0 = scmp.lt.s32.totalorder %s6017_s7, %s6017_s7 }
  0x94   :  { %p4926_p1 = scmp.lt.s32.totalorder %s4924_s18, %s4920_s11 }
  0x96   :  { %p4927_p2 = por %p4926_p1, %p4925_p0 }
  0x98   :  { %p4928_p3 = pnand %p4927_p2, %p4921_p13 }
  0x9a   :  { %4931 = shalt.err (!%p4928_p3)
}
  0x9b   :  { %199 = dma.hbm_to_vmem [thread:$0]  %s5826_s3, 48, %s6017_s7, [#allocation15], %s5741_s28, %s5741_s28, %s5742_s9  }
  0x9c   :  { %s5745_s25 = smov [#allocation17]   ;;  %s5746_s23 = smov [#allocation20]  }
  0x9d   :  { %s217_s22 = sshll.u32 %s5745_s25, 4  ;;  %s242_s26 = sshll.u32 %s5746_s23, 4  ;;  %s218_s22 = int_to_ptr.vmem [resolvable:$true] %s217_s22  ;;  %s243_s26 = int_to_ptr.vmem [resolvable:$true] %s242_s26 }
  0x9e   :  { %s4932_s1 = scalar_lea.hbm %s5836_s14, 48 }
  0x9f   :  { %p4933_p4 = scmp.ne.s32.totalorder %s5836_s14, %s4932_s1  ;;  %p4936_p5 = scmp.lt.u32.totalorder %s4932_s1, %s5836_s14 }
  0xa1   :  { %p4938_p6 = pnand %p4936_p5, %p4933_p4 }
  0xa3   :  { %4941 = shalt.err (!%p4938_p6)
}
  0xa4   :  { %s4942_s2 = scalar_lea.vmem %s218_s22, 48  ;;  %s4946_s0 = scalar_lea.vmem %s218_s22, 64 }
  0xa5   :  { %p4943_p7 = scmp.ne.s32.totalorder %s218_s22, %s4942_s2  ;;  %p4947_p8 = scmp.lt.s32.totalorder %s218_s22, %s218_s22 }
  0xa6   :  { %p4948_p9 = scmp.lt.s32.totalorder %s4946_s0, %s4942_s2 }
  0xa8   :  { %p4949_p10 = por %p4948_p9, %p4947_p8 }
  0xaa   :  { %p4950_p11 = pnand %p4949_p10, %p4943_p7 }
  0xac   :  { %4953 = shalt.err (!%p4950_p11)
}
  0xad   :  { %223 = dma.hbm_to_vmem [thread:$0]  %s5836_s14, 48, %s218_s22, [#allocation18], %s5741_s28, %s5741_s28, %s5742_s9  }
  0xae   :  { %s4954_s3 = scalar_lea.hbm %s5846_s24, 16 }
  0xaf   :  { %p4955_p12 = scmp.ne.s32.totalorder %s5846_s24, %s4954_s3  ;;  %p4958_p13 = scmp.lt.u32.totalorder %s4954_s3, %s5846_s24 }
  0xb1   :  { %p4960_p0 = pnand %p4958_p13, %p4955_p12 }
  0xb3   :  { %4963 = shalt.err (!%p4960_p0)
}
  0xb4   :  { %s4964_s7 = scalar_lea.vmem %s243_s26, 16  ;;  %s4968_s10 = scalar_lea.vmem %s243_s26, 32 }
  0xb5   :  { %p4965_p1 = scmp.ne.s32.totalorder %s243_s26, %s4964_s7  ;;  %p4969_p2 = scmp.lt.s32.totalorder %s243_s26, %s243_s26 }
  0xb6   :  { %p4970_p3 = scmp.lt.s32.totalorder %s4968_s10, %s4964_s7 }
  0xb8   :  { %p4971_p4 = por %p4970_p3, %p4969_p2 }
  0xba   :  { %p4972_p5 = pnand %p4971_p4, %p4965_p1 }
  0xbc   :  { %4975 = shalt.err (!%p4972_p5)
}
  0xbd   :  { %245 = dma.hbm_to_vmem [thread:$0]  %s5846_s24, 16, %s243_s26, [#allocation21]  }
  0xbe   :  { %s5747_s15 = smov [#allocation23]   ;;  %s5748_s16 = smov [#allocation26]  }
  0xbf   :  { %s263_s14 = sshll.u32 %s5747_s15, 4  ;;  %s287_s17 = sshll.u32 %s5748_s16, 4  ;;  %s264_s14 = int_to_ptr.vmem [resolvable:$true] %s263_s14  ;;  %s6050_s17 = int_to_ptr.vmem [resolvable:$true] %s287_s17 }
  0xc0   :  { %s4976_s11 = scalar_lea.hbm %s5856_s6, 48 }
  0xc1   :  { %p4977_p6 = scmp.ne.s32.totalorder %s5856_s6, %s4976_s11  ;;  %p4980_p7 = scmp.lt.u32.totalorder %s4976_s11, %s5856_s6 }
  0xc3   :  { %p4982_p8 = pnand %p4980_p7, %p4977_p6 }
  0xc5   :  { %4985 = shalt.err (!%p4982_p8)
}
  0xc6   :  { %s4986_s18 = scalar_lea.vmem %s264_s14, 48  ;;  %s4990_s25 = scalar_lea.vmem %s264_s14, 64 }
  0xc7   :  { %p4987_p9 = scmp.ne.s32.totalorder %s264_s14, %s4986_s18  ;;  %p4991_p10 = scmp.lt.s32.totalorder %s264_s14, %s264_s14 }
  0xc8   :  { %p4992_p11 = scmp.lt.s32.totalorder %s4990_s25, %s4986_s18 }
  0xca   :  { %p4993_p12 = por %p4992_p11, %p4991_p10 }
  0xcc   :  { %p4994_p13 = pnand %p4993_p12, %p4987_p9 }
  0xce   :  { %4997 = shalt.err (!%p4994_p13)
}
  0xcf   :  { %269 = dma.hbm_to_vmem [thread:$0]  %s5856_s6, 48, %s264_s14, [#allocation24], %s5741_s28, %s5741_s28, %s5742_s9  }
  0xd0   :  { %s4998_s24 = scalar_lea.hbm %s5866_s20, 48 }
  0xd1   :  { %p4999_p0 = scmp.ne.s32.totalorder %s5866_s20, %s4998_s24  ;;  %p5002_p1 = scmp.lt.u32.totalorder %s4998_s24, %s5866_s20 }
  0xd3   :  { %p5004_p2 = pnand %p5002_p1, %p4999_p0 }
  0xd5   :  { %5007 = shalt.err (!%p5004_p2)
}
  0xd6   :  { %s5008_s22 = scalar_lea.vmem %s6050_s17, 48  ;;  %s5012_s23 = scalar_lea.vmem %s6050_s17, 64 }
  0xd7   :  { %p5009_p3 = scmp.ne.s32.totalorder %s6050_s17, %s5008_s22  ;;  %p5013_p4 = scmp.lt.s32.totalorder %s6050_s17, %s6050_s17 }
  0xd8   :  { %p5014_p5 = scmp.lt.s32.totalorder %s5012_s23, %s5008_s22 }
  0xda   :  { %p5015_p6 = por %p5014_p5, %p5013_p4 }
  0xdc   :  { %p5016_p7 = pnand %p5015_p6, %p5009_p3 }
  0xde   :  { %5019 = shalt.err (!%p5016_p7)
}
  0xdf   :  { %293 = dma.hbm_to_vmem [thread:$0]  %s5866_s20, 48, %s6050_s17, [#allocation27], %s5741_s28, %s5741_s28, %s5742_s9  }
  0xe0   :  { %s5749_s6 = smov [#allocation29]   ;;  %s5750_s1 = smov [#allocation32]  }
  0xe1   :  { %s311_s26 = sshll.u32 %s5749_s6, 4  ;;  %s335_s2 = sshll.u32 %s5750_s1, 4  ;;  %s312_s26 = int_to_ptr.vmem [resolvable:$true] %s311_s26  ;;  %s6072_s2 = int_to_ptr.vmem [resolvable:$true] %s335_s2 }
  0xe2   :  { %s5020_s0 = scalar_lea.hbm %s5876_s4, 48 }
  0xe3   :  { %p5021_p8 = scmp.ne.s32.totalorder %s5876_s4, %s5020_s0  ;;  %p5024_p9 = scmp.lt.u32.totalorder %s5020_s0, %s5876_s4 }
  0xe5   :  { %p5026_p10 = pnand %p5024_p9, %p5021_p8 }
  0xe7   :  { %5029 = shalt.err (!%p5026_p10)
}
  0xe8   :  { %s5030_s3 = scalar_lea.vmem %s312_s26, 48  ;;  %s5034_s7 = scalar_lea.vmem %s312_s26, 64 }
  0xe9   :  { %p5031_p11 = scmp.ne.s32.totalorder %s312_s26, %s5030_s3  ;;  %p5035_p12 = scmp.lt.s32.totalorder %s312_s26, %s312_s26 }
  0xea   :  { %p5036_p13 = scmp.lt.s32.totalorder %s5034_s7, %s5030_s3 }
  0xec   :  { %p5037_p0 = por %p5036_p13, %p5035_p12 }
  0xee   :  { %p5038_p1 = pnand %p5037_p0, %p5031_p11 }
  0xf0   :  { %5041 = shalt.err (!%p5038_p1)
}
  0xf1   :  { %317 = dma.hbm_to_vmem [thread:$0]  %s5876_s4, 48, %s312_s26, [#allocation30], %s5741_s28, %s5741_s28, %s5742_s9  }
  0xf2   :  { %s5042_s20 = scalar_lea.hbm %s5886_s30, 48 }
  0xf3   :  { %p5043_p2 = scmp.ne.s32.totalorder %s5886_s30, %s5042_s20  ;;  %p5046_p3 = scmp.lt.u32.totalorder %s5042_s20, %s5886_s30 }
  0xf5   :  { %p5048_p4 = pnand %p5046_p3, %p5043_p2 }
  0xf7   :  { %5051 = shalt.err (!%p5048_p4)
}
  0xf8   :  { %s5052_s10 = scalar_lea.vmem %s6072_s2, 48  ;;  %s5056_s15 = scalar_lea.vmem %s6072_s2, 64 }
  0xf9   :  { %p5053_p5 = scmp.ne.s32.totalorder %s6072_s2, %s5052_s10  ;;  %p5057_p6 = scmp.lt.s32.totalorder %s6072_s2, %s6072_s2 }
  0xfa   :  { %p5058_p7 = scmp.lt.s32.totalorder %s5056_s15, %s5052_s10 }
  0xfc   :  { %p5059_p8 = por %p5058_p7, %p5057_p6 }
  0xfe   :  { %p5060_p9 = pnand %p5059_p8, %p5053_p5 }
 0x100   :  { %5063 = shalt.err (!%p5060_p9)
}
 0x101   :  { %341 = dma.hbm_to_vmem [thread:$0]  %s5886_s30, 48, %s6072_s2, [#allocation33], %s5741_s28, %s5741_s28, %s5742_s9  }
 0x102   :  { %s5751_s4 = smov [#allocation35]   ;;  %s5752_s16 = smov [#allocation38]  }
 0x103   :  { %s360_s14 = sshll.u32 %s5751_s4, 4  ;;  %s379_s17 = sshll.u32 %s5752_s16, 4  ;;  %s361_s14 = int_to_ptr.vmem [resolvable:$true] %s360_s14  ;;  %s6094_s17 = int_to_ptr.vmem [resolvable:$true] %s379_s17 }
 0x104   :  { %s5064_s11 = scalar_lea.hbm %s5896_s19, 16 }
 0x105   :  { %p5065_p10 = scmp.ne.s32.totalorder %s5896_s19, %s5064_s11  ;;  %p5068_p11 = scmp.lt.u32.totalorder %s5064_s11, %s5896_s19 }
 0x107   :  { %p5070_p12 = pnand %p5068_p11, %p5065_p10 }
 0x109   :  { %5073 = shalt.err (!%p5070_p12)
}
 0x10a   :  { %s5074_s18 = scalar_lea.vmem %s361_s14, 16  ;;  %s5078_s25 = scalar_lea.vmem %s361_s14, 32 }
 0x10b   :  { %p5075_p13 = scmp.ne.s32.totalorder %s361_s14, %s5074_s18  ;;  %p5079_p0 = scmp.lt.s32.totalorder %s361_s14, %s361_s14 }
 0x10c   :  { %p5080_p1 = scmp.lt.s32.totalorder %s5078_s25, %s5074_s18 }
 0x10e   :  { %p5081_p2 = por %p5080_p1, %p5079_p0 }
 0x110   :  { %p5082_p3 = pnand %p5081_p2, %p5075_p13 }
 0x112   :  { %5085 = shalt.err (!%p5082_p3)
}
 0x113   :  { %363 = dma.hbm_to_vmem [thread:$0]  %s5896_s19, 16, %s361_s14, [#allocation36]  }
 0x114   :  { %s5086_s30 = scalar_lea.hbm %s5906_s8, 48 }
 0x115   :  { %p5087_p4 = scmp.ne.s32.totalorder %s5906_s8, %s5086_s30  ;;  %p5090_p5 = scmp.lt.u32.totalorder %s5086_s30, %s5906_s8 }
 0x117   :  { %p5092_p6 = pnand %p5090_p5, %p5087_p4 }
 0x119   :  { %5095 = shalt.err (!%p5092_p6)
}
 0x11a   :  { %s5096_s24 = scalar_lea.vmem %s6094_s17, 48  ;;  %s5100_s22 = scalar_lea.vmem %s6094_s17, 64 }
 0x11b   :  { %p5097_p7 = scmp.ne.s32.totalorder %s6094_s17, %s5096_s24  ;;  %p5101_p8 = scmp.lt.s32.totalorder %s6094_s17, %s6094_s17 }
 0x11c   :  { %p5102_p9 = scmp.lt.s32.totalorder %s5100_s22, %s5096_s24 }
 0x11e   :  { %p5103_p10 = por %p5102_p9, %p5101_p8 }
 0x120   :  { %p5104_p11 = pnand %p5103_p10, %p5097_p7 }
 0x122   :  { %5107 = shalt.err (!%p5104_p11)
}
 0x123   :  { %385 = dma.hbm_to_vmem [thread:$0]  %s5906_s8, 48, %s6094_s17, [#allocation39], %s5741_s28, %s5741_s28, %s5742_s9  }
 0x124   :  { %s5753_s19 = smov [#allocation41]   ;;  %s5754_s6 = smov [#allocation44]  }
 0x125   :  { %s403_s23 = sshll.u32 %s5753_s19, 4  ;;  %s427_s26 = sshll.u32 %s5754_s6, 4  ;;  %s404_s23 = int_to_ptr.vmem [resolvable:$true] %s403_s23  ;;  %s6113_s26 = int_to_ptr.vmem [resolvable:$true] %s427_s26 }
 0x126   :  { %s5108_s1 = scalar_lea.hbm %s5916_s29, 48 }
 0x127   :  { %p5109_p12 = scmp.ne.s32.totalorder %s5916_s29, %s5108_s1  ;;  %p5112_p13 = scmp.lt.u32.totalorder %s5108_s1, %s5916_s29 }
 0x129   :  { %p5114_p0 = pnand %p5112_p13, %p5109_p12 }
 0x12b   :  { %5117 = shalt.err (!%p5114_p0)
}
 0x12c   :  { %s5118_s2 = scalar_lea.vmem %s404_s23, 48  ;;  %s5122_s0 = scalar_lea.vmem %s404_s23, 64 }
 0x12d   :  { %p5119_p1 = scmp.ne.s32.totalorder %s404_s23, %s5118_s2  ;;  %p5123_p2 = scmp.lt.s32.totalorder %s404_s23, %s404_s23 }
 0x12e   :  { %p5124_p3 = scmp.lt.s32.totalorder %s5122_s0, %s5118_s2 }
 0x130   :  { %p5125_p4 = por %p5124_p3, %p5123_p2 }
 0x132   :  { %p5126_p5 = pnand %p5125_p4, %p5119_p1 }
 0x134   :  { %5129 = shalt.err (!%p5126_p5)
}
 0x135   :  { %409 = dma.hbm_to_vmem [thread:$0]  %s5916_s29, 48, %s404_s23, [#allocation42], %s5741_s28, %s5741_s28, %s5742_s9  }
 0x136   :  { %s5130_s8 = scalar_lea.hbm %s5926_s21, 48 }
 0x137   :  { %p5131_p6 = scmp.ne.s32.totalorder %s5926_s21, %s5130_s8  ;;  %p5134_p7 = scmp.lt.u32.totalorder %s5130_s8, %s5926_s21 }
 0x139   :  { %p5136_p8 = pnand %p5134_p7, %p5131_p6 }
 0x13b   :  { %5139 = shalt.err (!%p5136_p8)
}
 0x13c   :  { %s5140_s3 = scalar_lea.vmem %s6113_s26, 48  ;;  %s5144_s7 = scalar_lea.vmem %s6113_s26, 64 }
 0x13d   :  { %p5141_p9 = scmp.ne.s32.totalorder %s6113_s26, %s5140_s3  ;;  %p5145_p10 = scmp.lt.s32.totalorder %s6113_s26, %s6113_s26 }
 0x13e   :  { %p5146_p11 = scmp.lt.s32.totalorder %s5144_s7, %s5140_s3 }
 0x140   :  { %p5147_p12 = por %p5146_p11, %p5145_p10 }
 0x142   :  { %p5148_p13 = pnand %p5147_p12, %p5141_p9 }
 0x144   :  { %5151 = shalt.err (!%p5148_p13)
}
 0x145   :  { %s6579_s29 = sld [smem:[#allocation94_spill]]  ;;  %s5755_s20 = smov [#allocation47]  }
 0x146   :  { %433 = dma.hbm_to_vmem [thread:$0]  %s5926_s21, 48, %s6113_s26, [#allocation45], %s5741_s28, %s5741_s28, %s5742_s9  }
 0x147   :  { %s451_s10 = sshll.u32 %s5755_s20, 4  ;;  %s5756_s15 = smov [#allocation50]   ;;  %s452_s10 = int_to_ptr.vmem [resolvable:$true] %s451_s10 }
 0x148   :  { %s479_s4 = sshll.u32 %s5756_s15, 4  ;;  %s6135_s4 = int_to_ptr.vmem [resolvable:$true] %s479_s4 }
 0x14b   :  { %s5152_s14 = scalar_lea.hbm %s6579_s29, 48 }
 0x14c   :  { %p5153_p0 = scmp.ne.s32.totalorder %s6579_s29, %s5152_s14  ;;  %p5156_p1 = scmp.lt.u32.totalorder %s5152_s14, %s6579_s29 }
 0x14e   :  { %p5158_p2 = pnand %p5156_p1, %p5153_p0 }
 0x150   :  { %5161 = shalt.err (!%p5158_p2)
}
 0x151   :  { %s5162_s16 = scalar_lea.vmem %s452_s10, 48  ;;  %s5166_s17 = scalar_lea.vmem %s452_s10, 64 }
 0x152   :  { %p5163_p3 = scmp.ne.s32.totalorder %s452_s10, %s5162_s16  ;;  %p5167_p4 = scmp.lt.s32.totalorder %s452_s10, %s452_s10 }
 0x153   :  { %p5168_p5 = scmp.lt.s32.totalorder %s5166_s17, %s5162_s16 }
 0x155   :  { %p5169_p6 = por %p5168_p5, %p5167_p4 }
 0x157   :  { %p5170_p7 = pnand %p5169_p6, %p5163_p3 }
 0x159   :  { %5173 = shalt.err (!%p5170_p7)
}
 0x15a   :  { %s6580_s21 = sld [smem:[#allocation98_spill]] }
 0x15b   :  { %457 = dma.hbm_to_vmem [thread:$0]  %s6579_s29, 48, %s452_s10, [#allocation48], %s5741_s28, %s5741_s28, %s5742_s9  }
 0x160   :  { %s5174_s11 = scalar_lea.hbm %s6580_s21, 48 }
 0x161   :  { %p5175_p8 = scmp.ne.s32.totalorder %s6580_s21, %s5174_s11  ;;  %p5178_p9 = scmp.lt.u32.totalorder %s5174_s11, %s6580_s21 }
 0x163   :  { %p5180_p10 = pnand %p5178_p9, %p5175_p8 }
 0x165   :  { %5183 = shalt.err (!%p5180_p10)
}
 0x166   :  { %s5184_s18 = scalar_lea.vmem %s6135_s4, 48  ;;  %s5188_s25 = scalar_lea.vmem %s6135_s4, 64 }
 0x167   :  { %p5185_p11 = scmp.ne.s32.totalorder %s6135_s4, %s5184_s18  ;;  %p5189_p12 = scmp.lt.s32.totalorder %s6135_s4, %s6135_s4 }
 0x168   :  { %p5190_p13 = scmp.lt.s32.totalorder %s5188_s25, %s5184_s18 }
 0x16a   :  { %p5191_p0 = por %p5190_p13, %p5189_p12 }
 0x16c   :  { %p5192_p1 = pnand %p5191_p0, %p5185_p11 }
 0x16e   :  { %5195 = shalt.err (!%p5192_p1)
}
 0x16f   :  { %s6581_s30 = sld [smem:[#allocation100_spill]]  ;;  %s5757_s24 = smov [#allocation53]  }
 0x170   :  { %485 = dma.hbm_to_vmem [thread:$0]  %s6580_s21, 48, %s6135_s4, [#allocation51], %s5741_s28, %s5741_s28, %s5742_s9  }
 0x171   :  { %s503_s22 = sshll.u32 %s5757_s24, 4  ;;  %s5758_s19 = smov [#allocation2]   ;;  %s504_s22 = int_to_ptr.vmem [resolvable:$true] %s503_s22 }
 0x172   :  { %s114_s23 = sshll.u32 %s5758_s19, 4  ;;  %s115_s23 = int_to_ptr.vmem [resolvable:$true] %s114_s23 }
 0x175   :  { %s5196_s6 = scalar_lea.hbm %s6581_s30, 48 }
 0x176   :  { %p5197_p2 = scmp.ne.s32.totalorder %s6581_s30, %s5196_s6  ;;  %p5200_p3 = scmp.lt.u32.totalorder %s5196_s6, %s6581_s30 }
 0x178   :  { %p5202_p4 = pnand %p5200_p3, %p5197_p2 }
 0x17a   :  { %5205 = shalt.err (!%p5202_p4)
}
 0x17b   :  { %s5206_s26 = scalar_lea.vmem %s504_s22, 48  ;;  %s5210_s1 = scalar_lea.vmem %s504_s22, 64 }
 0x17c   :  { %p5207_p5 = scmp.ne.s32.totalorder %s504_s22, %s5206_s26  ;;  %p5211_p6 = scmp.lt.s32.totalorder %s504_s22, %s504_s22 }
 0x17d   :  { %p5212_p7 = scmp.lt.s32.totalorder %s5210_s1, %s5206_s26 }
 0x17f   :  { %p5213_p8 = por %p5212_p7, %p5211_p6 }
 0x181   :  { %p5214_p9 = pnand %p5213_p8, %p5207_p5 }
 0x183   :  { %5217 = shalt.err (!%p5214_p9)
}
 0x184   :  { %s6582_s2 = sld [smem:[#allocation79_spill]] }
 0x185   :  { %509 = dma.hbm_to_vmem [thread:$0]  %s6581_s30, 48, %s504_s22, [#allocation54], %s5741_s28, %s5741_s28, %s5742_s9  }
 0x18a   :  { %s5218_s0 = scalar_lea.hbm %s6582_s2, 128 }
 0x18b   :  { %p5219_p10 = scmp.ne.s32.totalorder %s6582_s2, %s5218_s0  ;;  %p5222_p11 = scmp.lt.u32.totalorder %s5218_s0, %s6582_s2 }
 0x18d   :  { %p5224_p12 = pnand %p5222_p11, %p5219_p10 }
 0x18f   :  { %5227 = shalt.err (!%p5224_p12)
}
 0x190   :  { %s5228_s8 = scalar_lea.vmem %s115_s23, 128  ;;  %p5233_p0 = scmp.lt.s32.totalorder %s115_s23, %s115_s23 }
 0x191   :  { %p5229_p13 = scmp.ne.s32.totalorder %s115_s23, %s5228_s8  ;;  %p5234_p1 = scmp.lt.s32.totalorder %s5228_s8, %s5228_s8 }
 0x193   :  { %p5235_p2 = por %p5234_p1, %p5233_p0 }
 0x195   :  { %p5236_p3 = pnand %p5235_p2, %p5229_p13 }
 0x197   :  { %5239 = shalt.err (!%p5236_p3)
}
 0x198   :  { %s6583_s3 = sld [smem:[#allocation80_spill]]  ;;  %s5759_s7 = smov [#allocation7]  }
 0x199   :  { %117 = dma.hbm_to_vmem [thread:$0]  %s6582_s2, 128, %s115_s23, [#allocation3]  }
 0x19a   :  { %s133_s29 = sshll.u32 %s5759_s7, 4  ;;  %s134_s29 = int_to_ptr.vmem [resolvable:$true] %s133_s29 }
 0x19e   :  { %s5240_s20 = scalar_lea.hbm %s6583_s3, 512 }
 0x19f   :  { %p5241_p4 = scmp.ne.s32.totalorder %s6583_s3, %s5240_s20  ;;  %p5244_p5 = scmp.lt.u32.totalorder %s5240_s20, %s6583_s3 }
 0x1a1   :  { %p5246_p6 = pnand %p5244_p5, %p5241_p4 }
 0x1a3   :  { %5249 = shalt.err (!%p5246_p6)
}
 0x1a4   :  { %s5250_s10 = scalar_lea.vmem %s134_s29, 512  ;;  %p5255_p8 = scmp.lt.s32.totalorder %s134_s29, %s134_s29 }
 0x1a5   :  { %p5251_p7 = scmp.ne.s32.totalorder %s134_s29, %s5250_s10  ;;  %p5256_p9 = scmp.lt.s32.totalorder %s5250_s10, %s5250_s10 }
 0x1a7   :  { %p5257_p10 = por %p5256_p9, %p5255_p8 }
 0x1a9   :  { %p5258_p11 = pnand %p5257_p10, %p5251_p7 }
 0x1ab   :  { %5261 = shalt.err (!%p5258_p11)
}
 0x1ac   :  { %s5760_s15 = smov 128   ;;  %s6584_s4 = sld [smem:[#allocation81_spill]] }
 0x1ad   :  { %s5761_s14 = smov 8   ;;  %s5762_s16 = smov [#allocation10]  }
 0x1ae   :  { %139 = dma.hbm_to_vmem [thread:$0]  %s6583_s3, 512, %s134_s29, [#allocation6], %s5760_s15, %s5760_s15, %s5761_s14  }
 0x1af   :  { %s157_s17 = sshll.u32 %s5762_s16, 4  ;;  %s5763_s21 = smov [#allocation13]   ;;  %s158_s17 = int_to_ptr.vmem [resolvable:$true] %s157_s17 }
 0x1b0   :  { %s181_s11 = sshll.u32 %s5763_s21, 4  ;;  %s182_s11 = int_to_ptr.vmem [resolvable:$true] %s181_s11 }
 0x1b2   :  { %s5262_s18 = scalar_lea.hbm %s6584_s4, 48 }
 0x1b3   :  { %p5263_p12 = scmp.ne.s32.totalorder %s6584_s4, %s5262_s18  ;;  %p5266_p13 = scmp.lt.u32.totalorder %s5262_s18, %s6584_s4 }
 0x1b5   :  { %p5268_p0 = pnand %p5266_p13, %p5263_p12 }
 0x1b7   :  { %5271 = shalt.err (!%p5268_p0)
}
 0x1b8   :  { %s5272_s25 = scalar_lea.vmem %s158_s17, 48  ;;  %s5276_s30 = scalar_lea.vmem %s158_s17, 64 }
 0x1b9   :  { %p5273_p1 = scmp.ne.s32.totalorder %s158_s17, %s5272_s25  ;;  %p5277_p2 = scmp.lt.s32.totalorder %s158_s17, %s158_s17 }
 0x1ba   :  { %p5278_p3 = scmp.lt.s32.totalorder %s5276_s30, %s5272_s25 }
 0x1bc   :  { %p5279_p4 = por %p5278_p3, %p5277_p2 }
 0x1be   :  { %p5280_p5 = pnand %p5279_p4, %p5273_p1 }
 0x1c0   :  { %5283 = shalt.err (!%p5280_p5)
}
 0x1c1   :  { %s6585_s24 = sld [smem:[#allocation82_spill]] }
 0x1c2   :  { %163 = dma.hbm_to_vmem [thread:$0]  %s6584_s4, 48, %s158_s17, [#allocation9], %s5741_s28, %s5741_s28, %s5742_s9  }
 0x1c7   :  { %s5284_s22 = scalar_lea.hbm %s6585_s24, 768 }
 0x1c8   :  { %p5285_p6 = scmp.ne.s32.totalorder %s6585_s24, %s5284_s22  ;;  %p5288_p7 = scmp.lt.u32.totalorder %s5284_s22, %s6585_s24 }
 0x1ca   :  { %p5290_p8 = pnand %p5288_p7, %p5285_p6 }
 0x1cc   :  { %5293 = shalt.err (!%p5290_p8)
}
 0x1cd   :  { %s5294_s19 = scalar_lea.vmem %s182_s11, 768  ;;  %p5299_p10 = scmp.lt.s32.totalorder %s182_s11, %s182_s11 }
 0x1ce   :  { %p5295_p9 = scmp.ne.s32.totalorder %s182_s11, %s5294_s19  ;;  %p5300_p11 = scmp.lt.s32.totalorder %s5294_s19, %s5294_s19 }
 0x1d0   :  { %p5301_p12 = por %p5300_p11, %p5299_p10 }
 0x1d2   :  { %p5302_p13 = pnand %p5301_p12, %p5295_p9 }
 0x1d4   :  { %5305 = shalt.err (!%p5302_p13)
}
 0x1d5   :  { %s6586_s23 = sld [smem:[#allocation83_spill]]  ;;  %s5764_s6 = smov [#allocation16]  }
 0x1d6   :  { %187 = dma.hbm_to_vmem [thread:$0]  %s6585_s24, 768, %s182_s11, [#allocation12], %s5760_s15, %s5760_s15, %s5761_s14  }
 0x1d7   :  { %s205_s26 = sshll.u32 %s5764_s6, 4  ;;  %s5765_s1 = smov [#allocation19]   ;;  %s206_s26 = int_to_ptr.vmem [resolvable:$true] %s205_s26 }
 0x1d8   :  { %s229_s2 = sshll.u32 %s5765_s1, 4  ;;  %s230_s2 = int_to_ptr.vmem [resolvable:$true] %s229_s2 }
 0x1db   :  { %s5306_s0 = scalar_lea.hbm %s6586_s23, 48 }
 0x1dc   :  { %p5307_p0 = scmp.ne.s32.totalorder %s6586_s23, %s5306_s0  ;;  %p5310_p1 = scmp.lt.u32.totalorder %s5306_s0, %s6586_s23 }
 0x1de   :  { %p5312_p2 = pnand %p5310_p1, %p5307_p0 }
 0x1e0   :  { %5315 = shalt.err (!%p5312_p2)
}
 0x1e1   :  { %s5316_s8 = scalar_lea.vmem %s206_s26, 48  ;;  %s5320_s3 = scalar_lea.vmem %s206_s26, 64 }
 0x1e2   :  { %p5317_p3 = scmp.ne.s32.totalorder %s206_s26, %s5316_s8  ;;  %p5321_p4 = scmp.lt.s32.totalorder %s206_s26, %s206_s26 }
 0x1e3   :  { %p5322_p5 = scmp.lt.s32.totalorder %s5320_s3, %s5316_s8 }
 0x1e5   :  { %p5323_p6 = por %p5322_p5, %p5321_p4 }
 0x1e7   :  { %p5324_p7 = pnand %p5323_p6, %p5317_p3 }
 0x1e9   :  { %5327 = shalt.err (!%p5324_p7)
}
 0x1ea   :  { %s6587_s7 = sld [smem:[#allocation84_spill]] }
 0x1eb   :  { %211 = dma.hbm_to_vmem [thread:$0]  %s6586_s23, 48, %s206_s26, [#allocation15], %s5741_s28, %s5741_s28, %s5742_s9  }
 0x1f0   :  { %s5328_s29 = scalar_lea.hbm %s6587_s7, 768 }
 0x1f1   :  { %p5329_p8 = scmp.ne.s32.totalorder %s6587_s7, %s5328_s29  ;;  %p5332_p9 = scmp.lt.u32.totalorder %s5328_s29, %s6587_s7 }
 0x1f3   :  { %p5334_p10 = pnand %p5332_p9, %p5329_p8 }
 0x1f5   :  { %5337 = shalt.err (!%p5334_p10)
}
 0x1f6   :  { %s5338_s20 = scalar_lea.vmem %s230_s2, 768  ;;  %p5343_p12 = scmp.lt.s32.totalorder %s230_s2, %s230_s2 }
 0x1f7   :  { %p5339_p11 = scmp.ne.s32.totalorder %s230_s2, %s5338_s20  ;;  %p5344_p13 = scmp.lt.s32.totalorder %s5338_s20, %s5338_s20 }
 0x1f9   :  { %p5345_p0 = por %p5344_p13, %p5343_p12 }
 0x1fb   :  { %p5346_p1 = pnand %p5345_p0, %p5339_p11 }
 0x1fd   :  { %5349 = shalt.err (!%p5346_p1)
}
 0x1fe   :  { %s6588_s10 = sld [smem:[#allocation85_spill]]  ;;  %s5766_s4 = smov [#allocation22]  }
 0x1ff   :  { %235 = dma.hbm_to_vmem [thread:$0]  %s6587_s7, 768, %s230_s2, [#allocation18], %s5760_s15, %s5760_s15, %s5761_s14  }
 0x200   :  { %s251_s16 = sshll.u32 %s5766_s4, 4  ;;  %s5767_s17 = smov [#allocation25]   ;;  %s252_s16 = int_to_ptr.vmem [resolvable:$true] %s251_s16 }
 0x201   :  { %s275_s21 = sshll.u32 %s5767_s17, 4  ;;  %s276_s21 = int_to_ptr.vmem [resolvable:$true] %s275_s21 }
 0x204   :  { %s5350_s11 = scalar_lea.hbm %s6588_s10, 256 }
 0x205   :  { %p5351_p2 = scmp.ne.s32.totalorder %s6588_s10, %s5350_s11  ;;  %p5354_p3 = scmp.lt.u32.totalorder %s5350_s11, %s6588_s10 }
 0x207   :  { %p5356_p4 = pnand %p5354_p3, %p5351_p2 }
 0x209   :  { %5359 = shalt.err (!%p5356_p4)
}
 0x20a   :  { %s5360_s18 = scalar_lea.vmem %s252_s16, 256  ;;  %p5365_p6 = scmp.lt.s32.totalorder %s252_s16, %s252_s16 }
 0x20b   :  { %p5361_p5 = scmp.ne.s32.totalorder %s252_s16, %s5360_s18  ;;  %p5366_p7 = scmp.lt.s32.totalorder %s5360_s18, %s5360_s18 }
 0x20d   :  { %p5367_p8 = por %p5366_p7, %p5365_p6 }
 0x20f   :  { %p5368_p9 = pnand %p5367_p8, %p5361_p5 }
 0x211   :  { %5371 = shalt.err (!%p5368_p9)
}
 0x212   :  { %s6589_s25 = sld [smem:[#allocation86_spill]] }
 0x213   :  { %257 = dma.hbm_to_vmem [thread:$0]  %s6588_s10, 256, %s252_s16, [#allocation21], %s5760_s15, %s5760_s15, %s5761_s14  }
 0x218   :  { %s5372_s30 = scalar_lea.hbm %s6589_s25, 48 }
 0x219   :  { %p5373_p10 = scmp.ne.s32.totalorder %s6589_s25, %s5372_s30  ;;  %p5376_p11 = scmp.lt.u32.totalorder %s5372_s30, %s6589_s25 }
 0x21b   :  { %p5378_p12 = pnand %p5376_p11, %p5373_p10 }
 0x21d   :  { %5381 = shalt.err (!%p5378_p12)
}
 0x21e   :  { %s5382_s24 = scalar_lea.vmem %s276_s21, 48  ;;  %s5386_s22 = scalar_lea.vmem %s276_s21, 64 }
 0x21f   :  { %p5383_p13 = scmp.ne.s32.totalorder %s276_s21, %s5382_s24  ;;  %p5387_p0 = scmp.lt.s32.totalorder %s276_s21, %s276_s21 }
 0x220   :  { %p5388_p1 = scmp.lt.s32.totalorder %s5386_s22, %s5382_s24 }
 0x222   :  { %p5389_p2 = por %p5388_p1, %p5387_p0 }
 0x224   :  { %p5390_p3 = pnand %p5389_p2, %p5383_p13 }
 0x226   :  { %5393 = shalt.err (!%p5390_p3)
}
 0x227   :  { %s6590_s19 = sld [smem:[#allocation87_spill]]  ;;  %s5768_s23 = smov [#allocation28]  }
 0x228   :  { %281 = dma.hbm_to_vmem [thread:$0]  %s6589_s25, 48, %s276_s21, [#allocation24], %s5741_s28, %s5741_s28, %s5742_s9  }
 0x229   :  { %s299_s6 = sshll.u32 %s5768_s23, 4  ;;  %s5769_s26 = smov [#allocation31]   ;;  %s300_s6 = int_to_ptr.vmem [resolvable:$true] %s299_s6 }
 0x22a   :  { %s323_s1 = sshll.u32 %s5769_s26, 4  ;;  %s324_s1 = int_to_ptr.vmem [resolvable:$true] %s323_s1 }
 0x22d   :  { %s5394_s2 = scalar_lea.hbm %s6590_s19, 384 }
 0x22e   :  { %p5395_p4 = scmp.ne.s32.totalorder %s6590_s19, %s5394_s2  ;;  %p5398_p5 = scmp.lt.u32.totalorder %s5394_s2, %s6590_s19 }
 0x230   :  { %p5400_p6 = pnand %p5398_p5, %p5395_p4 }
 0x232   :  { %5403 = shalt.err (!%p5400_p6)
}
 0x233   :  { %s5404_s0 = scalar_lea.vmem %s300_s6, 384  ;;  %p5409_p8 = scmp.lt.s32.totalorder %s300_s6, %s300_s6 }
 0x234   :  { %p5405_p7 = scmp.ne.s32.totalorder %s300_s6, %s5404_s0  ;;  %p5410_p9 = scmp.lt.s32.totalorder %s5404_s0, %s5404_s0 }
 0x236   :  { %p5411_p10 = por %p5410_p9, %p5409_p8 }
 0x238   :  { %p5412_p11 = pnand %p5411_p10, %p5405_p7 }
 0x23a   :  { %5415 = shalt.err (!%p5412_p11)
}
 0x23b   :  { %s6591_s8 = sld [smem:[#allocation88_spill]] }
 0x23c   :  { %305 = dma.hbm_to_vmem [thread:$0]  %s6590_s19, 384, %s300_s6, [#allocation27], %s5760_s15, %s5760_s15, %s5761_s14  }
 0x241   :  { %s5416_s3 = scalar_lea.hbm %s6591_s8, 48 }
 0x242   :  { %p5417_p12 = scmp.ne.s32.totalorder %s6591_s8, %s5416_s3  ;;  %p5420_p13 = scmp.lt.u32.totalorder %s5416_s3, %s6591_s8 }
 0x244   :  { %p5422_p0 = pnand %p5420_p13, %p5417_p12 }
 0x246   :  { %5425 = shalt.err (!%p5422_p0)
}
 0x247   :  { %s5426_s7 = scalar_lea.vmem %s324_s1, 48  ;;  %s5430_s29 = scalar_lea.vmem %s324_s1, 64 }
 0x248   :  { %p5427_p1 = scmp.ne.s32.totalorder %s324_s1, %s5426_s7  ;;  %p5431_p2 = scmp.lt.s32.totalorder %s324_s1, %s324_s1 }
 0x249   :  { %p5432_p3 = scmp.lt.s32.totalorder %s5430_s29, %s5426_s7 }
 0x24b   :  { %p5433_p4 = por %p5432_p3, %p5431_p2 }
 0x24d   :  { %p5434_p5 = pnand %p5433_p4, %p5427_p1 }
 0x24f   :  { %5437 = shalt.err (!%p5434_p5)
}
 0x250   :  { %s6592_s20 = sld [smem:[#allocation89_spill]]  ;;  %s5770_s10 = smov [#allocation34]  }
 0x251   :  { %329 = dma.hbm_to_vmem [thread:$0]  %s6591_s8, 48, %s324_s1, [#allocation30], %s5741_s28, %s5741_s28, %s5742_s9  }
 0x252   :  { %s347_s4 = sshll.u32 %s5770_s10, 4  ;;  %s5771_s16 = smov [#allocation37]   ;;  %s348_s4 = int_to_ptr.vmem [resolvable:$true] %s347_s4 }
 0x253   :  { %s370_s17 = sshll.u32 %s5771_s16, 4  ;;  %s371_s17 = int_to_ptr.vmem [resolvable:$true] %s370_s17 }
 0x256   :  { %s5438_s21 = scalar_lea.hbm %s6592_s20, 384 }
 0x257   :  { %p5439_p6 = scmp.ne.s32.totalorder %s6592_s20, %s5438_s21  ;;  %p5442_p7 = scmp.lt.u32.totalorder %s5438_s21, %s6592_s20 }
 0x259   :  { %p5444_p8 = pnand %p5442_p7, %p5439_p6 }
 0x25b   :  { %5447 = shalt.err (!%p5444_p8)
}
 0x25c   :  { %s5448_s11 = scalar_lea.vmem %s348_s4, 384  ;;  %p5453_p10 = scmp.lt.s32.totalorder %s348_s4, %s348_s4 }
 0x25d   :  { %p5449_p9 = scmp.ne.s32.totalorder %s348_s4, %s5448_s11  ;;  %p5454_p11 = scmp.lt.s32.totalorder %s5448_s11, %s5448_s11 }
 0x25f   :  { %p5455_p12 = por %p5454_p11, %p5453_p10 }
 0x261   :  { %p5456_p13 = pnand %p5455_p12, %p5449_p9 }
 0x263   :  { %5459 = shalt.err (!%p5456_p13)
}
 0x264   :  { %s6593_s18 = sld [smem:[#allocation90_spill]] }
 0x265   :  { %353 = dma.hbm_to_vmem [thread:$0]  %s6592_s20, 384, %s348_s4, [#allocation33], %s5760_s15, %s5760_s15, %s5761_s14  }
 0x26a   :  { %s5460_s25 = scalar_lea.hbm %s6593_s18, 128 }
 0x26b   :  { %p5461_p0 = scmp.ne.s32.totalorder %s6593_s18, %s5460_s25  ;;  %p5464_p1 = scmp.lt.u32.totalorder %s5460_s25, %s6593_s18 }
 0x26d   :  { %p5466_p2 = pnand %p5464_p1, %p5461_p0 }
 0x26f   :  { %5469 = shalt.err (!%p5466_p2)
}
 0x270   :  { %s5470_s30 = scalar_lea.vmem %s371_s17, 128  ;;  %p5475_p4 = scmp.lt.s32.totalorder %s371_s17, %s371_s17 }
 0x271   :  { %p5471_p3 = scmp.ne.s32.totalorder %s371_s17, %s5470_s30  ;;  %p5476_p5 = scmp.lt.s32.totalorder %s5470_s30, %s5470_s30 }
 0x273   :  { %p5477_p6 = por %p5476_p5, %p5475_p4 }
 0x275   :  { %p5478_p7 = pnand %p5477_p6, %p5471_p3 }
 0x277   :  { %5481 = shalt.err (!%p5478_p7)
}
 0x278   :  { %s6594_s24 = sld [smem:[#allocation91_spill]]  ;;  %s5772_s22 = smov [#allocation40]  }
 0x279   :  { %373 = dma.hbm_to_vmem [thread:$0]  %s6593_s18, 128, %s371_s17, [#allocation36]  }
 0x27a   :  { %s391_s19 = sshll.u32 %s5772_s22, 4  ;;  %s5773_s23 = smov [#allocation43]   ;;  %s392_s19 = int_to_ptr.vmem [resolvable:$true] %s391_s19 }
 0x27b   :  { %s415_s6 = sshll.u32 %s5773_s23, 4  ;;  %s416_s6 = int_to_ptr.vmem [resolvable:$true] %s415_s6 }
 0x27e   :  { %s5482_s26 = scalar_lea.hbm %s6594_s24, 48 }
 0x27f   :  { %p5483_p8 = scmp.ne.s32.totalorder %s6594_s24, %s5482_s26  ;;  %p5486_p9 = scmp.lt.u32.totalorder %s5482_s26, %s6594_s24 }
 0x281   :  { %p5488_p10 = pnand %p5486_p9, %p5483_p8 }
 0x283   :  { %5491 = shalt.err (!%p5488_p10)
}
 0x284   :  { %s5492_s1 = scalar_lea.vmem %s392_s19, 48  ;;  %s5496_s2 = scalar_lea.vmem %s392_s19, 64 }
 0x285   :  { %p5493_p11 = scmp.ne.s32.totalorder %s392_s19, %s5492_s1  ;;  %p5497_p12 = scmp.lt.s32.totalorder %s392_s19, %s392_s19 }
 0x286   :  { %p5498_p13 = scmp.lt.s32.totalorder %s5496_s2, %s5492_s1 }
 0x288   :  { %p5499_p0 = por %p5498_p13, %p5497_p12 }
 0x28a   :  { %p5500_p1 = pnand %p5499_p0, %p5493_p11 }
 0x28c   :  { %5503 = shalt.err (!%p5500_p1)
}
 0x28d   :  { %s6595_s0 = sld [smem:[#allocation92_spill]] }
 0x28e   :  { %397 = dma.hbm_to_vmem [thread:$0]  %s6594_s24, 48, %s392_s19, [#allocation39], %s5741_s28, %s5741_s28, %s5742_s9  }
 0x293   :  { %s5504_s8 = scalar_lea.hbm %s6595_s0, 768 }
 0x294   :  { %p5505_p2 = scmp.ne.s32.totalorder %s6595_s0, %s5504_s8  ;;  %p5508_p3 = scmp.lt.u32.totalorder %s5504_s8, %s6595_s0 }
 0x296   :  { %p5510_p4 = pnand %p5508_p3, %p5505_p2 }
 0x298   :  { %5513 = shalt.err (!%p5510_p4)
}
 0x299   :  { %s5514_s3 = scalar_lea.vmem %s416_s6, 768  ;;  %p5519_p6 = scmp.lt.s32.totalorder %s416_s6, %s416_s6 }
 0x29a   :  { %p5515_p5 = scmp.ne.s32.totalorder %s416_s6, %s5514_s3  ;;  %p5520_p7 = scmp.lt.s32.totalorder %s5514_s3, %s5514_s3 }
 0x29c   :  { %p5521_p8 = por %p5520_p7, %p5519_p6 }
 0x29e   :  { %p5522_p9 = pnand %p5521_p8, %p5515_p5 }
 0x2a0   :  { %5525 = shalt.err (!%p5522_p9)
}
 0x2a1   :  { %s6596_s7 = sld [smem:[#allocation93_spill]]  ;;  %s5774_s29 = smov [#allocation46]  }
 0x2a2   :  { %421 = dma.hbm_to_vmem [thread:$0]  %s6595_s0, 768, %s416_s6, [#allocation42], %s5760_s15, %s5760_s15, %s5761_s14  }
 0x2a3   :  { %s439_s20 = sshll.u32 %s5774_s29, 4  ;;  %s5775_s10 = smov [#allocation49]   ;;  %s440_s20 = int_to_ptr.vmem [resolvable:$true] %s439_s20 }
 0x2a4   :  { %s467_s4 = sshll.u32 %s5775_s10, 4  ;;  %s468_s4 = int_to_ptr.vmem [resolvable:$true] %s467_s4 }
 0x2a7   :  { %s5526_s16 = scalar_lea.hbm %s6596_s7, 48 }
 0x2a8   :  { %p5527_p10 = scmp.ne.s32.totalorder %s6596_s7, %s5526_s16  ;;  %p5530_p11 = scmp.lt.u32.totalorder %s5526_s16, %s6596_s7 }
 0x2aa   :  { %p5532_p12 = pnand %p5530_p11, %p5527_p10 }
 0x2ac   :  { %5535 = shalt.err (!%p5532_p12)
}
 0x2ad   :  { %s5536_s17 = scalar_lea.vmem %s440_s20, 48  ;;  %s5540_s21 = scalar_lea.vmem %s440_s20, 64 }
 0x2ae   :  { %p5537_p13 = scmp.ne.s32.totalorder %s440_s20, %s5536_s17  ;;  %p5541_p0 = scmp.lt.s32.totalorder %s440_s20, %s440_s20 }
 0x2af   :  { %p5542_p1 = scmp.lt.s32.totalorder %s5540_s21, %s5536_s17 }
 0x2b1   :  { %p5543_p2 = por %p5542_p1, %p5541_p0 }
 0x2b3   :  { %p5544_p3 = pnand %p5543_p2, %p5537_p13 }
 0x2b5   :  { %5547 = shalt.err (!%p5544_p3)
}
 0x2b6   :  { %s6597_s11 = sld [smem:[#allocation97_spill]] }
 0x2b7   :  { %445 = dma.hbm_to_vmem [thread:$0]  %s6596_s7, 48, %s440_s20, [#allocation45], %s5741_s28, %s5741_s28, %s5742_s9  }
 0x2bc   :  { %s5548_s18 = scalar_lea.hbm %s6597_s11, 512 }
 0x2bd   :  { %p5549_p4 = scmp.ne.s32.totalorder %s6597_s11, %s5548_s18  ;;  %p5552_p5 = scmp.lt.u32.totalorder %s5548_s18, %s6597_s11 }
 0x2bf   :  { %p5554_p6 = pnand %p5552_p5, %p5549_p4 }
 0x2c1   :  { %5557 = shalt.err (!%p5554_p6)
}
 0x2c2   :  { %s5558_s25 = scalar_lea.vmem %s468_s4, 512  ;;  %p5563_p8 = scmp.lt.s32.totalorder %s468_s4, %s468_s4 }
 0x2c3   :  { %p5559_p7 = scmp.ne.s32.totalorder %s468_s4, %s5558_s25  ;;  %p5564_p9 = scmp.lt.s32.totalorder %s5558_s25, %s5558_s25 }
 0x2c5   :  { %p5565_p10 = por %p5564_p9, %p5563_p8 }
 0x2c7   :  { %p5566_p11 = pnand %p5565_p10, %p5559_p7 }
 0x2c9   :  { %5569 = shalt.err (!%p5566_p11)
}
 0x2ca   :  { %s6598_s30 = sld [smem:[#allocation99_spill]]  ;;  %s5776_s24 = smov [#allocation52]  }
 0x2cb   :  { %473 = dma.hbm_to_vmem [thread:$0]  %s6597_s11, 512, %s468_s4, [#allocation48], %s5760_s15, %s5760_s15, %s5761_s14  }
 0x2cc   :  { %s491_s22 = sshll.u32 %s5776_s24, 4  ;;  %s5777_s19 = smov [#allocation55]   ;;  %s492_s22 = int_to_ptr.vmem [resolvable:$true] %s491_s22 }
 0x2cd   :  { %s515_s23 = sshll.u32 %s5777_s19, 4  ;;  %s516_s23 = int_to_ptr.vmem [resolvable:$true] %s515_s23 }
 0x2d0   :  { %s5570_s6 = scalar_lea.hbm %s6598_s30, 48 }
 0x2d1   :  { %p5571_p12 = scmp.ne.s32.totalorder %s6598_s30, %s5570_s6  ;;  %p5574_p13 = scmp.lt.u32.totalorder %s5570_s6, %s6598_s30 }
 0x2d3   :  { %p5576_p0 = pnand %p5574_p13, %p5571_p12 }
 0x2d5   :  { %5579 = shalt.err (!%p5576_p0)
}
 0x2d6   :  { %s5580_s26 = scalar_lea.vmem %s492_s22, 48  ;;  %s5584_s1 = scalar_lea.vmem %s492_s22, 64 }
 0x2d7   :  { %p5581_p1 = scmp.ne.s32.totalorder %s492_s22, %s5580_s26  ;;  %p5585_p2 = scmp.lt.s32.totalorder %s492_s22, %s492_s22 }
 0x2d8   :  { %p5586_p3 = scmp.lt.s32.totalorder %s5584_s1, %s5580_s26 }
 0x2da   :  { %p5587_p4 = por %p5586_p3, %p5585_p2 }
 0x2dc   :  { %p5588_p5 = pnand %p5587_p4, %p5581_p1 }
 0x2de   :  { %5591 = shalt.err (!%p5588_p5)
}
 0x2df   :  { %s6599_s2 = sld [smem:[#allocation101_spill]] }
 0x2e0   :  { %497 = dma.hbm_to_vmem [thread:$0]  %s6598_s30, 48, %s492_s22, [#allocation51], %s5741_s28, %s5741_s28, %s5742_s9  }
 0x2e5   :  { %s5592_s0 = scalar_lea.hbm %s6599_s2, 1536 }
 0x2e6   :  { %p5593_p6 = scmp.ne.s32.totalorder %s6599_s2, %s5592_s0  ;;  %p5596_p7 = scmp.lt.u32.totalorder %s5592_s0, %s6599_s2 }
 0x2e8   :  { %p5598_p8 = pnand %p5596_p7, %p5593_p6 }
 0x2ea   :  { %5601 = shalt.err (!%p5598_p8)
}
 0x2eb   :  { %s5602_s8 = scalar_lea.vmem %s516_s23, 1536  ;;  %p5607_p10 = scmp.lt.s32.totalorder %s516_s23, %s516_s23 }
 0x2ec   :  { %p5603_p9 = scmp.ne.s32.totalorder %s516_s23, %s5602_s8  ;;  %p5608_p11 = scmp.lt.s32.totalorder %s5602_s8, %s5602_s8 }
 0x2ee   :  { %p5609_p12 = por %p5608_p11, %p5607_p10 }
 0x2f0   :  { %p5610_p13 = pnand %p5609_p12, %p5603_p9 }
 0x2f2   :  { %5613 = shalt.err (!%p5610_p13)
}
 0x2f3   :  { %s6600_s3 = sld [smem:[#allocation102_spill]]  ;;  %s5778_s7 = smov [#allocation56]  }
 0x2f4   :  { %521 = dma.hbm_to_vmem [thread:$0]  %s6599_s2, 1536, %s516_s23, [#allocation54], %s5760_s15, %s5760_s15, %s5761_s14  }
 0x2f5   :  { %s527_s29 = sshll.u32 %s5778_s7, 4  ;;  %s528_s29 = int_to_ptr.vmem [resolvable:$true] %s527_s29 }
 0x2f9   :  { %s5614_s20 = scalar_lea.hbm %s6600_s3, 48 }
 0x2fa   :  { %p5615_p0 = scmp.ne.s32.totalorder %s6600_s3, %s5614_s20  ;;  %p5618_p1 = scmp.lt.u32.totalorder %s5614_s20, %s6600_s3 }
 0x2fc   :  { %p5620_p2 = pnand %p5618_p1, %p5615_p0 }
 0x2fe   :  { %5623 = shalt.err (!%p5620_p2)
}
 0x2ff   :  { %s5624_s10 = scalar_lea.vmem %s528_s29, 48  ;;  %s5628_s4 = scalar_lea.vmem %s528_s29, 64 }
 0x300   :  { %p5625_p3 = scmp.ne.s32.totalorder %s528_s29, %s5624_s10  ;;  %p5629_p4 = scmp.lt.s32.totalorder %s528_s29, %s528_s29 }
 0x301   :  { %p5630_p5 = scmp.lt.s32.totalorder %s5628_s4, %s5624_s10 }
 0x303   :  { %p5631_p6 = por %p5630_p5, %p5629_p4 }
 0x305   :  { %p5632_p7 = pnand %p5631_p6, %p5625_p3 }
 0x307   :  { %5635 = shalt.err (!%p5632_p7)
}
 0x308   :  { %533 = dma.hbm_to_vmem [thread:$0]  %s6600_s3, 48, %s528_s29, [#allocation57], %s5741_s28, %s5741_s28, %s5742_s9  }
 0x309   :  { %5658 = dma.done.wait [#allocation3], 128  }
 0x30a   :  { %5659 = vsyncadd [#allocation3], 4294967168 }
 0x30b   :  { %5660 = dma.done.wait [#allocation6], 528  }
 0x30c   :  { %5661 = vsyncadd [#allocation6], 4294966768 }
 0x30d   :  { %5662 = dma.done.wait [#allocation9], 96  }
 0x30e   :  { %5663 = vsyncadd [#allocation9], 4294967200 }
 0x30f   :  { %5664 = dma.done.wait [#allocation12], 816  }
 0x310   :  { %5665 = vsyncadd [#allocation12], 4294966480 }
 0x311   :  { %5666 = dma.done.wait [#allocation15], 96  }
 0x312   :  { %5667 = vsyncadd [#allocation15], 4294967200 }
 0x313   :  { %5668 = dma.done.wait [#allocation18], 816  }
 0x314   :  { %5669 = vsyncadd [#allocation18], 4294966480 }
 0x315   :  { %5670 = dma.done.wait [#allocation21], 272  }
 0x316   :  { %5671 = vsyncadd [#allocation21], 4294967024 }
 0x317   :  { %5672 = dma.done.wait [#allocation24], 96  }
 0x318   :  { %5673 = vsyncadd [#allocation24], 4294967200 }
 0x319   :  { %5674 = dma.done.wait [#allocation27], 432  }
 0x31a   :  { %5675 = vsyncadd [#allocation27], 4294966864 }
 0x31b   :  { %5676 = dma.done.wait [#allocation30], 96  }
 0x31c   :  { %5677 = vsyncadd [#allocation30], 4294967200 }
 0x31d   :  { %5678 = dma.done.wait [#allocation33], 432  }
 0x31e   :  { %5679 = vsyncadd [#allocation33], 4294966864 }
 0x31f   :  { %5680 = dma.done.wait [#allocation36], 144  }
 0x320   :  { %5681 = vsyncadd [#allocation36], 4294967152 }
 0x321   :  { %5682 = dma.done.wait [#allocation39], 96  }
 0x322   :  { %5683 = vsyncadd [#allocation39], 4294967200 }
 0x323   :  { %5684 = dma.done.wait [#allocation42], 816  }
 0x324   :  { %5685 = vsyncadd [#allocation42], 4294966480 }
 0x325   :  { %5686 = dma.done.wait [#allocation45], 96  }
 0x326   :  { %5687 = vsyncadd [#allocation45], 4294967200 }
 0x327   :  { %5688 = dma.done.wait [#allocation48], 560  }
 0x328   :  { %5689 = vsyncadd [#allocation48], 4294966736 }
 0x329   :  { %5690 = dma.done.wait [#allocation51], 96  }
 0x32a   :  { %5691 = vsyncadd [#allocation51], 4294967200 }
 0x32b   :  { %5692 = dma.done.wait [#allocation54], 1584  }
 0x32c   :  { %5693 = vsyncadd [#allocation54], 4294965712 }
 0x32d   :  { %5694 = dma.done.wait [#allocation57], 48  }
 0x32e   :  { %5695 = vsyncadd [#allocation57], 4294967248  ;;  %v5779_v0 = vmov 0.0|0.0   ;;  %vm5780_vm0 = vmmov 0   ;;  %v5781_v1 = vmov 0.0   ;;  %v649_v2 = vld [vmem:[#allocation7] sm:$0xff] }
 0x32f   :  { %4624 = vmatprep.subr.bf16.mxu0 %v5779_v0  ;;  %4415 = vmatprep.mubr.msk.f32.mxu0 %vm5780_vm0, %v5781_v1  ;;  %v650_v3 = vld [vmem:[#allocation7 + $0x8] sm:$0xff]  ;;  %v651_v4 = vld [vmem:[#allocation7 + $0x10] sm:$0xff]  ;;  %v652_v6 = vld [vmem:[#allocation7 + $0x18] sm:$0xff]  ;;  %vm660_vm1 = vcmask 261120   ;;  %vm745_vm2 = vcmask 130048   ;;  %vm1592_vm3 = vcmask 64512  }
 0x330   :  { %4630 = vmatprep.subr.bf16.mxu1 %v5779_v0  ;;  %4422 = vmatprep.mubr.msk.f32.mxu1 %vm5780_vm0, %v5781_v1  ;;  %v4625_v5 = vpack.c.bf16 %v650_v3, %v649_v2  ;;  %v4628_v7 = vpack.c.bf16 %v652_v6, %v651_v4  ;;  %v648_v8 = vld [vmem:[#allocation2] sm:$0xff]  ;;  %v736_v9 = vld [vmem:[#allocation13] sm:$0xff]  ;;  %v4192_v12 = vld [vmem:[#allocation5] ss:$0 sm:$0xff]  ;;  %s6601_s28 = sld [smem:[#allocation95_spill]]  ;;  %s6602_s9 = sld [smem:[#allocation96_spill]] }
 0x331   :  { %v737_v10 = vld [vmem:[#allocation13 + $0x8] sm:$0xff]  ;;  %v863_v18 = vld [vmem:[#allocation13 + $0x10] sm:$0xff]  ;;  %v864_v19 = vld [vmem:[#allocation13 + $0x18] sm:$0xff] }
 0x332   :  { %4626 = vmatpush3.bf16.msra.mxu0 %v4625_v5  ;;  %v4631_v11 = vpack.c.bf16 %v737_v10, %v736_v9  ;;  %v4634_v20 = vpack.c.bf16 %v864_v19, %v863_v18  ;;  %v4194_v21 = vld [vmem:[#allocation8] ss:$0 sm:$0xff]  ;;  %v4196_v50 = vld [vmem:[#allocation11] ss:$0 sm:$0xff]  ;;  %v4197_v52 = vld [vmem:[#allocation10] ss:$0 sm:$0xff] }
 0x333   :  { %4627 = vmatprep.subr.bf16.mxu0 %v5779_v0  ;;  %v991_v55 = vld [vmem:[#allocation13 + $0x20] sm:$0xff]  ;;  %v992_v56 = vld [vmem:[#allocation13 + $0x28] sm:$0xff]  ;;  %v4198_v58 = vld [vmem:[#allocation8 + $0x1] ss:$0 sm:$0xff] }
 0x334   :  { %4632 = vmatpush3.bf16.msra.mxu1 %v4631_v11  ;;  %v4637_v57 = vpack.c.bf16 %v992_v56, %v991_v55 }
 0x335   :  { %4633 = vmatprep.subr.bf16.mxu1 %v5779_v0 }
 0x336   :  { %4629 = vmatpush3.bf16.msra.mxu0 %v4628_v7 }
 0x337   :  { %4636 = vmatprep.subr.bf16.mxu0 %v5779_v0 }
 0x339   :  { %4416 = vmatmul.mubr.msk.f32.vlgmr.msra.gmra.mrb[0].mxu0 %vm660_vm1, %v648_v8 }
 0x33a   :  { %4436 = vmatprep.mubr.msk.f32.mxu0 %vm5780_vm0, %v5781_v1  ;;  %4638 = vmatpush3.bf16.msra.mxu0 %v4637_v57 }
 0x33b   :  { %4642 = vmatprep.subr.bf16.mxu0 %v5779_v0 }
 0x40c   :  { %v730_v13 = vpop.f32.mrb[0].mxu0 }
 0x40d   :  { %v731_v14 = vadd.f32 %v4192_v12, %v730_v13  ;;  %v4417_v15 = vpop.f32.mrb[1].mxu0 }
 0x40f   :  { %v734_v16 = vmul.f32 0.01, %v731_v14 }
 0x411   :  { %v6303_v17 = vmax.f32 %v731_v14, %v734_v16 }
 0x413   :  { %4423 = vmatmul.mubr.msk.f32.vlgmr.msra.gmra.mrb[0].mxu1 %vm745_vm2, %v6303_v17 }
 0x414   :  { %4429 = vmatprep.mubr.msk.f32.mxu1 %vm5780_vm0, %v5781_v1  ;;  %4635 = vmatpush3.bf16.msra.mxu1 %v4634_v20 }
 0x415   :  { %4639 = vmatprep.subr.bf16.mxu1 %v5779_v0 }
 0x4e6   :  { %v815_v22 = vpop.f32.mrb[0].mxu1 }
 0x4e7   :  { %v816_v23 = vadd.f32 %v4194_v21, %v815_v22  ;;  %v4424_v24 = vpop.f32.mrb[1].mxu1 }
 0x4e9   :  { %v819_v25 = vmul.f32 0.01, %v816_v23 }
 0x4eb   :  { %v820_v26 = vmax.f32 %v816_v23, %v819_v25 }
 0x4ed   :  { %v823_v27 = vsel %vm745_vm2, %v820_v26, 0.0  ;;  %v832_v28 = vmul.f32 %v820_v26, %v820_v26 }
 0x4ee   :  { %v824_v29 = vrot.slane %v823_v27, 4 }
 0x4ef   :  { %v833_v30 = vsel %vm745_vm2, %v832_v28, 0.0  ;;  %v4201_v28 = vld [vmem:[#allocation10 + $0x1] ss:$0 sm:$0xff] }
 0x4f0   :  { %v825_v31 = vadd.f32 %v824_v29, %v823_v27  ;;  %v834_v32 = vrot.slane %v833_v30, 4 }
 0x4f2   :  { %v826_v33 = vrot.slane %v825_v31, 2  ;;  %v835_v34 = vadd.f32 %v834_v32, %v833_v30  ;;  %v1120_v32 = vld [vmem:[#allocation19 + $0x8] sm:$0xff] }
 0x4f4   :  { %v827_v35 = vadd.f32 %v826_v33, %v825_v31  ;;  %v836_v36 = vrot.slane %v835_v34, 2  ;;  %v1119_v31 = vld [vmem:[#allocation19] sm:$0xff] }
 0x4f5   :  { %v4640_v33 = vpack.c.bf16 %v1120_v32, %v1119_v31 }
 0x4f6   :  { %v828_v37 = vrot.slane %v827_v35, 1  ;;  %v837_v38 = vadd.f32 %v836_v36, %v835_v34  ;;  %v4202_v34 = vld [vmem:[#allocation8 + $0x2] ss:$0 sm:$0xff] }
 0x4f8   :  { %v829_v39 = vadd.f32 %v828_v37, %v827_v35  ;;  %v838_v40 = vrot.slane %v837_v38, 1 }
 0x4fa   :  { %v831_v41 = vmul.f32 0.125, %v829_v39  ;;  %v839_v42 = vadd.f32 %v838_v40, %v837_v38 }
 0x4fc   :  { %v840_v43 = vmul.f32 0.125, %v839_v42  ;;  %v841_v44 = vmul.f32 %v831_v41, %v831_v41  ;;  %v844_v48 = vsub.f32 %v820_v26, %v831_v41  ;;  %v4200_v26 = vld [vmem:[#allocation11 + $0x1] ss:$0 sm:$0xff] }
 0x4fe   :  { %v842_v45 = vsub.f32 %v840_v43, %v841_v44 }
 0x500   :  { %v843_v46 = vmax.f32 %v842_v45, 0.0 }
 0x502   :  { %v845_v47 = vadd.f32 1e-05, %v843_v46 }
 0x504   :  { %4796 = vrsqrt.f32 %v845_v47 }
 0x50e   :  { %v4797_v49 = vpop.eup %4796 }
 0x50f   :  { %v847_v51 = vmul.f32 %v4797_v49, %v844_v48 }
 0x511   :  { %v854_v53 = vmul.f32 %v4196_v50, %v847_v51 }
 0x513   :  { %v861_v54 = vadd.f32 %v4197_v52, %v854_v53 }
 0x515   :  { %4430 = vmatmul.mubr.msk.f32.vlgmr.msra.gmra.mrb[2].mxu1 %vm745_vm2, %v861_v54 }
 0x516   :  { %4443 = vmatprep.mubr.msk.f32.mxu1 %vm5780_vm0, %v5781_v1  ;;  %4641 = vmatpush3.bf16.msra.mxu1 %v4640_v33 }
 0x517   :  { %4645 = vmatprep.subr.bf16.mxu1 %v5779_v0 }
 0x5e8   :  { %v942_v59 = vpop.f32.mrb[2].mxu1 }
 0x5e9   :  { %v943_v60 = vadd.f32 %v4198_v58, %v942_v59  ;;  %v4431_v61 = vpop.f32.mrb[3].mxu1 }
 0x5eb   :  { %v946_v62 = vmul.f32 0.01, %v943_v60 }
 0x5ed   :  { %v947_v63 = vmax.f32 %v943_v60, %v946_v62 }
 0x5ef   :  { %v952_v2 = vsel %vm745_vm2, %v947_v63, 0.0  ;;  %v960_v3 = vmul.f32 %v947_v63, %v947_v63 }
 0x5f0   :  { %v953_v4 = vrot.slane %v952_v2, 4 }
 0x5f1   :  { %v961_v5 = vsel %vm745_vm2, %v960_v3, 0.0  ;;  %v4205_v3 = vld [vmem:[#allocation10 + $0x2] ss:$0 sm:$0xff] }
 0x5f2   :  { %v954_v6 = vadd.f32 %v953_v4, %v952_v2  ;;  %v962_v7 = vrot.slane %v961_v5, 4 }
 0x5f4   :  { %v955_v8 = vrot.slane %v954_v6, 2  ;;  %v963_v9 = vadd.f32 %v962_v7, %v961_v5  ;;  %v1244_v7 = vld [vmem:[#allocation19 + $0x10] sm:$0xff] }
 0x5f6   :  { %v956_v10 = vadd.f32 %v955_v8, %v954_v6  ;;  %v964_v11 = vrot.slane %v963_v9, 2  ;;  %v1245_v8 = vld [vmem:[#allocation19 + $0x18] sm:$0xff] }
 0x5f8   :  { %v957_v12 = vrot.slane %v956_v10, 1  ;;  %v965_v13 = vadd.f32 %v964_v11, %v963_v9  ;;  %v4643_v9 = vpack.c.bf16 %v1245_v8, %v1244_v7 }
 0x5fa   :  { %v958_v14 = vadd.f32 %v957_v12, %v956_v10  ;;  %v966_v15 = vrot.slane %v965_v13, 1  ;;  %v4206_v10 = vld [vmem:[#allocation14] ss:$0 sm:$0xff] }
 0x5fc   :  { %v959_v16 = vmul.f32 0.125, %v958_v14  ;;  %v967_v18 = vadd.f32 %v966_v15, %v965_v13 }
 0x5fe   :  { %v968_v19 = vmul.f32 0.125, %v967_v18  ;;  %v969_v20 = vmul.f32 %v959_v16, %v959_v16  ;;  %v972_v24 = vsub.f32 %v947_v63, %v959_v16  ;;  %v4204_v63 = vld [vmem:[#allocation11 + $0x2] ss:$0 sm:$0xff] }
 0x600   :  { %v970_v21 = vsub.f32 %v968_v19, %v969_v20 }
 0x602   :  { %v971_v22 = vmax.f32 %v970_v21, 0.0 }
 0x604   :  { %v973_v23 = vadd.f32 1e-05, %v971_v22 }
 0x606   :  { %4798 = vrsqrt.f32 %v973_v23 }
 0x610   :  { %v4799_v25 = vpop.eup %4798 }
 0x611   :  { %v975_v27 = vmul.f32 %v4799_v25, %v972_v24 }
 0x613   :  { %v982_v29 = vmul.f32 %v4200_v26, %v975_v27 }
 0x615   :  { %v989_v30 = vadd.f32 %v4201_v28, %v982_v29 }
 0x617   :  { %4437 = vmatmul.mubr.msk.f32.vlgmr.msra.gmra.mrb[2].mxu0 %vm745_vm2, %v989_v30 }
 0x618   :  { %4450 = vmatprep.mubr.msk.f32.mxu0 %vm5780_vm0, %v5781_v1  ;;  %4644 = vmatpush3.bf16.msra.mxu0 %v4643_v9 }
 0x619   :  { %4648 = vmatprep.subr.bf16.mxu0 %v5779_v0 }
 0x6ea   :  { %v1070_v35 = vpop.f32.mrb[2].mxu0 }
 0x6eb   :  { %v1071_v36 = vadd.f32 %v4202_v34, %v1070_v35  ;;  %v4438_v37 = vpop.f32.mrb[3].mxu0 }
 0x6ed   :  { %v1074_v38 = vmul.f32 0.01, %v1071_v36 }
 0x6ef   :  { %v1075_v39 = vmax.f32 %v1071_v36, %v1074_v38 }
 0x6f1   :  { %v1080_v40 = vsel %vm745_vm2, %v1075_v39, 0.0  ;;  %v1088_v41 = vmul.f32 %v1075_v39, %v1075_v39 }
 0x6f2   :  { %v1081_v42 = vrot.slane %v1080_v40, 4 }
 0x6f3   :  { %v1089_v43 = vsel %vm745_vm2, %v1088_v41, 0.0  ;;  %v4209_v41 = vld [vmem:[#allocation16] ss:$0 sm:$0xff] }
 0x6f4   :  { %v1082_v44 = vadd.f32 %v1081_v42, %v1080_v40  ;;  %v1090_v45 = vrot.slane %v1089_v43, 4 }
 0x6f6   :  { %v1083_v46 = vrot.slane %v1082_v44, 2  ;;  %v1091_v47 = vadd.f32 %v1090_v45, %v1089_v43  ;;  %v1373_v45 = vld [vmem:[#allocation19 + $0x28] sm:$0xff] }
 0x6f8   :  { %v1084_v48 = vadd.f32 %v1083_v46, %v1082_v44  ;;  %v1092_v49 = vrot.slane %v1091_v47, 2  ;;  %v1372_v44 = vld [vmem:[#allocation19 + $0x20] sm:$0xff] }
 0x6f9   :  { %v4646_v46 = vpack.c.bf16 %v1373_v45, %v1372_v44 }
 0x6fa   :  { %v1085_v50 = vrot.slane %v1084_v48, 1  ;;  %v1093_v51 = vadd.f32 %v1092_v49, %v1091_v47  ;;  %v4210_v47 = vld [vmem:[#allocation14 + $0x1] ss:$0 sm:$0xff] }
 0x6fc   :  { %v1086_v52 = vadd.f32 %v1085_v50, %v1084_v48  ;;  %v1094_v53 = vrot.slane %v1093_v51, 1 }
 0x6fe   :  { %v1087_v54 = vmul.f32 0.125, %v1086_v52  ;;  %v1095_v55 = vadd.f32 %v1094_v53, %v1093_v51 }
 0x700   :  { %v1096_v56 = vmul.f32 0.125, %v1095_v55  ;;  %v1097_v57 = vmul.f32 %v1087_v54, %v1087_v54  ;;  %v1100_v61 = vsub.f32 %v1075_v39, %v1087_v54  ;;  %v4208_v39 = vld [vmem:[#allocation17] ss:$0 sm:$0xff] }
 0x702   :  { %v1098_v58 = vsub.f32 %v1096_v56, %v1097_v57 }
 0x704   :  { %v1099_v59 = vmax.f32 %v1098_v58, 0.0 }
 0x706   :  { %v1101_v60 = vadd.f32 1e-05, %v1099_v59 }
 0x708   :  { %4800 = vrsqrt.f32 %v1101_v60 }
 0x712   :  { %v4801_v62 = vpop.eup %4800 }
 0x713   :  { %v1103_v2 = vmul.f32 %v4801_v62, %v1100_v61 }
 0x715   :  { %v1110_v4 = vmul.f32 %v4204_v63, %v1103_v2 }
 0x717   :  { %v1117_v5 = vadd.f32 %v4205_v3, %v1110_v4 }
 0x719   :  { %v6325_v6 = vadd.f32 %v1117_v5, %v6303_v17 }
 0x71b   :  { %4444 = vmatmul.mubr.msk.f32.vlgmr.msra.gmra.mrb[4].mxu1 %vm745_vm2, %v6325_v6 }
 0x71c   :  { %4457 = vmatprep.mubr.msk.f32.mxu1 %vm5780_vm0, %v5781_v1  ;;  %4647 = vmatpush3.bf16.msra.mxu1 %v4646_v46 }
 0x71d   :  { %4467 = vmatprep.subr.mxu1 %v5781_v1 }
 0x7ee   :  { %v1197_v11 = vpop.f32.mrb[4].mxu1 }
 0x7ef   :  { %v1198_v12 = vadd.f32 %v4206_v10, %v1197_v11  ;;  %v4445_v13 = vpop.f32.mrb[5].mxu1 }
 0x7f1   :  { %v1201_v14 = vmul.f32 0.01, %v1198_v12 }
 0x7f3   :  { %v1202_v15 = vmax.f32 %v1198_v12, %v1201_v14 }
 0x7f5   :  { %v1205_v17 = vsel %vm745_vm2, %v1202_v15, 0.0  ;;  %v1213_v16 = vmul.f32 %v1202_v15, %v1202_v15 }
 0x7f6   :  { %v1206_v18 = vrot.slane %v1205_v17, 4 }
 0x7f7   :  { %v1214_v19 = vsel %vm745_vm2, %v1213_v16, 0.0  ;;  %v4213_v16 = vld [vmem:[#allocation16 + $0x1] ss:$0 sm:$0xff] }
 0x7f8   :  { %v1207_v20 = vadd.f32 %v1206_v18, %v1205_v17  ;;  %v1215_v21 = vrot.slane %v1214_v19, 4 }
 0x7fa   :  { %v1208_v22 = vrot.slane %v1207_v20, 2  ;;  %v1216_v23 = vadd.f32 %v1215_v21, %v1214_v19  ;;  %v1501_v21 = vld [vmem:[#allocation22 + $0x8] sm:$0xff] }
 0x7fc   :  { %v1209_v24 = vadd.f32 %v1208_v22, %v1207_v20  ;;  %v1217_v25 = vrot.slane %v1216_v23, 2  ;;  %v1500_v20 = vld [vmem:[#allocation22] sm:$0xff] }
 0x7fd   :  { %v4649_v22 = vpack.c.bf16 %v1501_v21, %v1500_v20 }
 0x7fe   :  { %v1210_v26 = vrot.slane %v1209_v24, 1  ;;  %v1218_v27 = vadd.f32 %v1217_v25, %v1216_v23  ;;  %v4214_v23 = vld [vmem:[#allocation14 + $0x2] ss:$0 sm:$0xff] }
 0x800   :  { %v1211_v28 = vadd.f32 %v1210_v26, %v1209_v24  ;;  %v1219_v29 = vrot.slane %v1218_v27, 1 }
 0x802   :  { %v1212_v30 = vmul.f32 0.125, %v1211_v28  ;;  %v1220_v31 = vadd.f32 %v1219_v29, %v1218_v27 }
 0x804   :  { %v1221_v32 = vmul.f32 0.125, %v1220_v31  ;;  %v1222_v33 = vmul.f32 %v1212_v30, %v1212_v30  ;;  %v1225_v37 = vsub.f32 %v1202_v15, %v1212_v30  ;;  %v4212_v15 = vld [vmem:[#allocation17 + $0x1] ss:$0 sm:$0xff] }
 0x806   :  { %v1223_v34 = vsub.f32 %v1221_v32, %v1222_v33 }
 0x808   :  { %v1224_v35 = vmax.f32 %v1223_v34, 0.0 }
 0x80a   :  { %v1226_v36 = vadd.f32 1e-05, %v1224_v35 }
 0x80c   :  { %4802 = vrsqrt.f32 %v1226_v36 }
 0x816   :  { %v4803_v38 = vpop.eup %4802 }
 0x817   :  { %v1228_v40 = vmul.f32 %v4803_v38, %v1225_v37 }
 0x819   :  { %v1235_v42 = vmul.f32 %v4208_v39, %v1228_v40 }
 0x81b   :  { %v1242_v43 = vadd.f32 %v4209_v41, %v1235_v42 }
 0x81d   :  { %4451 = vmatmul.mubr.msk.f32.vlgmr.msra.gmra.mrb[4].mxu0 %vm745_vm2, %v1242_v43 }
 0x81e   :  { %4464 = vmatprep.mubr.msk.f32.mxu0 %vm5780_vm0, %v5781_v1  ;;  %4650 = vmatpush3.bf16.msra.mxu0 %v4649_v22 }
 0x81f   :  { %4472 = vmatprep.subr.mxu0 %v5781_v1 }
 0x8f0   :  { %v1323_v48 = vpop.f32.mrb[4].mxu0 }
 0x8f1   :  { %v1324_v49 = vadd.f32 %v4210_v47, %v1323_v48  ;;  %v4452_v50 = vpop.f32.mrb[5].mxu0 }
 0x8f3   :  { %v1327_v51 = vmul.f32 0.01, %v1324_v49 }
 0x8f5   :  { %v1328_v52 = vmax.f32 %v1324_v49, %v1327_v51 }
 0x8f7   :  { %v1333_v53 = vsel %vm745_vm2, %v1328_v52, 0.0  ;;  %v1341_v54 = vmul.f32 %v1328_v52, %v1328_v52 }
 0x8f8   :  { %v1334_v55 = vrot.slane %v1333_v53, 4 }
 0x8f9   :  { %v1342_v56 = vsel %vm745_vm2, %v1341_v54, 0.0  ;;  %v4217_v54 = vld [vmem:[#allocation16 + $0x2] ss:$0 sm:$0xff] }
 0x8fa   :  { %v1335_v57 = vadd.f32 %v1334_v55, %v1333_v53  ;;  %v1343_v58 = vrot.slane %v1342_v56, 4 }
 0x8fc   :  { %v1336_v59 = vrot.slane %v1335_v57, 2  ;;  %v1344_v60 = vadd.f32 %v1343_v58, %v1342_v56  ;;  %v1584_v58 = vld [vmem:[#allocation28] sm:$0xff] }
 0x8fe   :  { %v1337_v61 = vadd.f32 %v1336_v59, %v1335_v57  ;;  %v1345_v62 = vrot.slane %v1344_v60, 2  ;;  %v4218_v59 = vld [vmem:[#allocation20] ss:$0 sm:$0xff] }
 0x900   :  { %v1338_v63 = vrot.slane %v1337_v61, 1  ;;  %v1346_v2 = vadd.f32 %v1345_v62, %v1344_v60 }
 0x902   :  { %v1339_v3 = vadd.f32 %v1338_v63, %v1337_v61  ;;  %v1347_v4 = vrot.slane %v1346_v2, 1 }
 0x904   :  { %v1340_v5 = vmul.f32 0.125, %v1339_v3  ;;  %v1348_v7 = vadd.f32 %v1347_v4, %v1346_v2  ;;  %v4220_v3 = vld [vmem:[#allocation23] ss:$0 sm:$0xff] }
 0x906   :  { %v1349_v8 = vmul.f32 0.125, %v1348_v7  ;;  %v1350_v9 = vmul.f32 %v1340_v5, %v1340_v5  ;;  %v1353_v13 = vsub.f32 %v1328_v52, %v1340_v5  ;;  %v4216_v52 = vld [vmem:[#allocation17 + $0x2] ss:$0 sm:$0xff] }
 0x908   :  { %v1351_v10 = vsub.f32 %v1349_v8, %v1350_v9 }
 0x90a   :  { %v1352_v11 = vmax.f32 %v1351_v10, 0.0 }
 0x90c   :  { %v1354_v12 = vadd.f32 1e-05, %v1352_v11 }
 0x90e   :  { %4804 = vrsqrt.f32 %v1354_v12 }
 0x918   :  { %v4805_v14 = vpop.eup %4804 }
 0x919   :  { %v1356_v17 = vmul.f32 %v4805_v14, %v1353_v13 }
 0x91b   :  { %v1363_v18 = vmul.f32 %v4212_v15, %v1356_v17 }
 0x91d   :  { %v1370_v19 = vadd.f32 %v4213_v16, %v1363_v18 }
 0x91f   :  { %4458 = vmatmul.mubr.msk.f32.vlgmr.msra.gmra.mrb[6].mxu1 %vm745_vm2, %v1370_v19 }
 0x920   :  { %4469 = vmatprep.mubr.msk.f32.mxu1 %vm5780_vm0, %v5781_v1  ;;  %4468 = vmatpush3.msra.mxu1 %v1584_v58 }
 0x921   :  { %4477 = vmatprep.subr.mxu1 %v5781_v1 }
 0x9f2   :  { %v1451_v24 = vpop.f32.mrb[6].mxu1 }
 0x9f3   :  { %v1452_v25 = vadd.f32 %v4214_v23, %v1451_v24  ;;  %v4459_v26 = vpop.f32.mrb[7].mxu1 }
 0x9f5   :  { %v1455_v27 = vmul.f32 0.01, %v1452_v25 }
 0x9f7   :  { %v1456_v28 = vmax.f32 %v1452_v25, %v1455_v27 }
 0x9f9   :  { %v1461_v29 = vsel %vm745_vm2, %v1456_v28, 0.0  ;;  %v1469_v30 = vmul.f32 %v1456_v28, %v1456_v28 }
 0x9fa   :  { %v1462_v31 = vrot.slane %v1461_v29, 4 }
 0x9fb   :  { %v1470_v32 = vsel %vm745_vm2, %v1469_v30, 0.0 }
 0x9fc   :  { %v1463_v33 = vadd.f32 %v1462_v31, %v1461_v29  ;;  %v1471_v34 = vrot.slane %v1470_v32, 4 }
 0x9fe   :  { %v1464_v35 = vrot.slane %v1463_v33, 2  ;;  %v1472_v36 = vadd.f32 %v1471_v34, %v1470_v32 }
 0xa00   :  { %v1465_v37 = vadd.f32 %v1464_v35, %v1463_v33  ;;  %v1473_v38 = vrot.slane %v1472_v36, 2  ;;  %v4222_v33 = vld [vmem:[#allocation26] ss:$0 sm:$0xff]  ;;  %v4223_v35 = vld [vmem:[#allocation25] ss:$0 sm:$0xff] }
 0xa02   :  { %v1466_v39 = vrot.slane %v1465_v37, 1  ;;  %v1474_v40 = vadd.f32 %v1473_v38, %v1472_v36  ;;  %v1836_v38 = vld [vmem:[#allocation28 + $0x10] sm:$0xff] }
 0xa04   :  { %v1467_v41 = vadd.f32 %v1466_v39, %v1465_v37  ;;  %v1475_v42 = vrot.slane %v1474_v40, 1  ;;  %v4224_v39 = vld [vmem:[#allocation23 + $0x1] ss:$0 sm:$0xff] }
 0xa06   :  { %v1468_v43 = vmul.f32 0.125, %v1467_v41  ;;  %v1476_v44 = vadd.f32 %v1475_v42, %v1474_v40 }
 0xa08   :  { %v1477_v45 = vmul.f32 0.125, %v1476_v44  ;;  %v1478_v46 = vmul.f32 %v1468_v43, %v1468_v43  ;;  %v1481_v50 = vsub.f32 %v1456_v28, %v1468_v43 }
 0xa0a   :  { %v1479_v47 = vsub.f32 %v1477_v45, %v1478_v46 }
 0xa0c   :  { %v1480_v48 = vmax.f32 %v1479_v47, 0.0 }
 0xa0e   :  { %v1482_v49 = vadd.f32 1e-05, %v1480_v48 }
 0xa10   :  { %4806 = vrsqrt.f32 %v1482_v49 }
 0xa1a   :  { %v4807_v51 = vpop.eup %4806 }
 0xa1b   :  { %v1484_v53 = vmul.f32 %v4807_v51, %v1481_v50 }
 0xa1d   :  { %v1491_v55 = vmul.f32 %v4216_v52, %v1484_v53 }
 0xa1f   :  { %v1498_v56 = vadd.f32 %v4217_v54, %v1491_v55 }
 0xa21   :  { %v6347_v57 = vadd.f32 %v1498_v56, %v6325_v6  ;;  %v1709_v6 = vld [vmem:[#allocation28 + $0x8] sm:$0xff] }
 0xa23   :  { %4465 = vmatmul.mubr.msk.f32.vlgmr.msra.gmra.mrb[6].mxu0 %vm745_vm2, %v6347_v57 }
 0xa24   :  { %4474 = vmatprep.mubr.msk.f32.mxu0 %vm5780_vm0, %v5781_v1  ;;  %4473 = vmatpush3.msra.mxu0 %v1709_v6 }
 0xa25   :  { %4482 = vmatprep.subr.mxu0 %v5781_v1 }
 0xaf6   :  { %v1578_v60 = vpop.f32.mrb[6].mxu0 }
 0xaf7   :  { %v1579_v61 = vadd.f32 %v4218_v59, %v1578_v60  ;;  %v4466_v62 = vpop.f32.mrb[7].mxu0 }
 0xaf9   :  { %v1582_v63 = vmul.f32 0.01, %v1579_v61 }
 0xafb   :  { %v6354_v2 = vmax.f32 %v1579_v61, %v1582_v63 }
 0xafd   :  { %4470 = vmatmul.mubr.msk.f32.vlgmr.msra.gmra.mrb[8].mxu1 %vm1592_vm3, %v6354_v2 }
 0xafe   :  { %4479 = vmatprep.mubr.msk.f32.mxu1 %vm5780_vm0, %v5781_v1  ;;  %4478 = vmatpush3.msra.mxu1 %v1836_v38 }
 0xaff   :  { %4487 = vmatprep.subr.mxu1 %v5781_v1 }
 0xbd0   :  { %v1662_v4 = vpop.f32.mrb[8].mxu1 }
 0xbd1   :  { %v1663_v5 = vadd.f32 %v4220_v3, %v1662_v4  ;;  %v4471_v7 = vpop.f32.mrb[9].mxu1 }
 0xbd3   :  { %v1666_v8 = vmul.f32 0.01, %v1663_v5 }
 0xbd5   :  { %v1667_v9 = vmax.f32 %v1663_v5, %v1666_v8  ;;  %v4226_v8 = vld [vmem:[#allocation26 + $0x1] ss:$0 sm:$0xff] }
 0xbd7   :  { %v1670_v10 = vsel %vm1592_vm3, %v1667_v9, 0.0  ;;  %v1678_v11 = vmul.f32 %v1667_v9, %v1667_v9 }
 0xbd8   :  { %v1671_v12 = vrot.slane %v1670_v10, 4 }
 0xbd9   :  { %v1679_v13 = vsel %vm1592_vm3, %v1678_v11, 0.0 }
 0xbda   :  { %v1672_v14 = vadd.f32 %v1671_v12, %v1670_v10  ;;  %v1680_v15 = vrot.slane %v1679_v13, 4  ;;  %v4227_v10 = vld [vmem:[#allocation25 + $0x1] ss:$0 sm:$0xff] }
 0xbdc   :  { %v1673_v17 = vrot.slane %v1672_v14, 2  ;;  %v1681_v16 = vadd.f32 %v1680_v15, %v1679_v13  ;;  %v1963_v13 = vld [vmem:[#allocation34] sm:$0xff] }
 0xbde   :  { %v1674_v18 = vadd.f32 %v1673_v17, %v1672_v14  ;;  %v1682_v19 = vrot.slane %v1681_v16, 2  ;;  %v4228_v14 = vld [vmem:[#allocation23 + $0x2] ss:$0 sm:$0xff] }
 0xbe0   :  { %v1675_v20 = vrot.slane %v1674_v18, 1  ;;  %v1683_v21 = vadd.f32 %v1682_v19, %v1681_v16 }
 0xbe2   :  { %v1676_v22 = vadd.f32 %v1675_v20, %v1674_v18  ;;  %v1684_v23 = vrot.slane %v1683_v21, 1 }
 0xbe4   :  { %v1677_v24 = vmul.f32 0.125, %v1676_v22  ;;  %v1685_v25 = vadd.f32 %v1684_v23, %v1683_v21 }
 0xbe6   :  { %v1686_v26 = vmul.f32 0.125, %v1685_v25  ;;  %v1687_v27 = vmul.f32 %v1677_v24, %v1677_v24  ;;  %v1690_v31 = vsub.f32 %v1667_v9, %v1677_v24 }
 0xbe8   :  { %v1688_v28 = vsub.f32 %v1686_v26, %v1687_v27 }
 0xbea   :  { %v1689_v29 = vmax.f32 %v1688_v28, 0.0 }
 0xbec   :  { %v1691_v30 = vadd.f32 1e-05, %v1689_v29 }
 0xbee   :  { %4808 = vrsqrt.f32 %v1691_v30 }
 0xbf8   :  { %v4809_v32 = vpop.eup %4808 }
 0xbf9   :  { %v1693_v34 = vmul.f32 %v4809_v32, %v1690_v31 }
 0xbfb   :  { %v1700_v36 = vmul.f32 %v4222_v33, %v1693_v34 }
 0xbfd   :  { %v1707_v37 = vadd.f32 %v4223_v35, %v1700_v36 }
 0xbff   :  { %4475 = vmatmul.mubr.msk.f32.vlgmr.msra.gmra.mrb[8].mxu0 %vm1592_vm3, %v1707_v37 }
 0xc00   :  { %4484 = vmatprep.mubr.msk.f32.mxu0 %vm5780_vm0, %v5781_v1  ;;  %4483 = vmatpush3.msra.mxu0 %v1963_v13 }
 0xc01   :  { %4492 = vmatprep.subr.mxu0 %v5781_v1 }
 0xcd2   :  { %v1787_v40 = vpop.f32.mrb[8].mxu0 }
 0xcd3   :  { %v1788_v41 = vadd.f32 %v4224_v39, %v1787_v40  ;;  %v4476_v42 = vpop.f32.mrb[9].mxu0 }
 0xcd5   :  { %v1791_v43 = vmul.f32 0.01, %v1788_v41 }
 0xcd7   :  { %v1792_v44 = vmax.f32 %v1788_v41, %v1791_v43  ;;  %v4230_v43 = vld [vmem:[#allocation26 + $0x2] ss:$0 sm:$0xff] }
 0xcd9   :  { %v1797_v45 = vsel %vm1592_vm3, %v1792_v44, 0.0  ;;  %v1805_v46 = vmul.f32 %v1792_v44, %v1792_v44 }
 0xcda   :  { %v1798_v47 = vrot.slane %v1797_v45, 4 }
 0xcdb   :  { %v1806_v48 = vsel %vm1592_vm3, %v1805_v46, 0.0 }
 0xcdc   :  { %v1799_v49 = vadd.f32 %v1798_v47, %v1797_v45  ;;  %v1807_v50 = vrot.slane %v1806_v48, 4  ;;  %v4231_v45 = vld [vmem:[#allocation25 + $0x2] ss:$0 sm:$0xff] }
 0xcde   :  { %v1800_v51 = vrot.slane %v1799_v49, 2  ;;  %v1808_v52 = vadd.f32 %v1807_v50, %v1806_v48  ;;  %v4232_v50 = vld [vmem:[#allocation29] ss:$0 sm:$0xff] }
 0xce0   :  { %v1801_v53 = vadd.f32 %v1800_v51, %v1799_v49  ;;  %v1809_v54 = vrot.slane %v1808_v52, 2  ;;  %v2087_v49 = vld [vmem:[#allocation34 + $0x8] sm:$0xff] }
 0xce2   :  { %v1802_v55 = vrot.slane %v1801_v53, 1  ;;  %v1810_v56 = vadd.f32 %v1809_v54, %v1808_v52 }
 0xce4   :  { %v1803_v58 = vadd.f32 %v1802_v55, %v1801_v53  ;;  %v1811_v59 = vrot.slane %v1810_v56, 1 }
 0xce6   :  { %v1804_v60 = vmul.f32 0.125, %v1803_v58  ;;  %v1812_v61 = vadd.f32 %v1811_v59, %v1810_v56 }
 0xce8   :  { %v1813_v62 = vmul.f32 0.125, %v1812_v61  ;;  %v1814_v63 = vmul.f32 %v1804_v60, %v1804_v60  ;;  %v1817_v5 = vsub.f32 %v1792_v44, %v1804_v60 }
 0xcea   :  { %v1815_v6 = vsub.f32 %v1813_v62, %v1814_v63 }
 0xcec   :  { %v1816_v3 = vmax.f32 %v1815_v6, 0.0 }
 0xcee   :  { %v1818_v4 = vadd.f32 1e-05, %v1816_v3 }
 0xcf0   :  { %4810 = vrsqrt.f32 %v1818_v4 }
 0xcfa   :  { %v4811_v7 = vpop.eup %4810 }
 0xcfb   :  { %v1820_v9 = vmul.f32 %v4811_v7, %v1817_v5 }
 0xcfd   :  { %v1827_v11 = vmul.f32 %v4226_v8, %v1820_v9 }
 0xcff   :  { %v1834_v12 = vadd.f32 %v4227_v10, %v1827_v11 }
 0xd01   :  { %4480 = vmatmul.mubr.msk.f32.vlgmr.msra.gmra.mrb[10].mxu1 %vm1592_vm3, %v1834_v12 }
 0xd02   :  { %4489 = vmatprep.mubr.msk.f32.mxu1 %vm5780_vm0, %v5781_v1  ;;  %4488 = vmatpush3.msra.mxu1 %v2087_v49 }
 0xd03   :  { %4497 = vmatprep.subr.mxu1 %v5781_v1 }
 0xdd4   :  { %v1914_v15 = vpop.f32.mrb[10].mxu1 }
 0xdd5   :  { %v1915_v17 = vadd.f32 %v4228_v14, %v1914_v15  ;;  %v4481_v16 = vpop.f32.mrb[11].mxu1 }
 0xdd7   :  { %v1918_v18 = vmul.f32 0.01, %v1915_v17 }
 0xdd9   :  { %v1919_v19 = vmax.f32 %v1915_v17, %v1918_v18  ;;  %v4234_v18 = vld [vmem:[#allocation32] ss:$0 sm:$0xff] }
 0xddb   :  { %v1924_v20 = vsel %vm1592_vm3, %v1919_v19, 0.0  ;;  %v1932_v21 = vmul.f32 %v1919_v19, %v1919_v19 }
 0xddc   :  { %v1925_v22 = vrot.slane %v1924_v20, 4 }
 0xddd   :  { %v1933_v23 = vsel %vm1592_vm3, %v1932_v21, 0.0 }
 0xdde   :  { %v1926_v24 = vadd.f32 %v1925_v22, %v1924_v20  ;;  %v1934_v25 = vrot.slane %v1933_v23, 4  ;;  %v4235_v20 = vld [vmem:[#allocation31] ss:$0 sm:$0xff] }
 0xde0   :  { %v1927_v26 = vrot.slane %v1926_v24, 2  ;;  %v1935_v27 = vadd.f32 %v1934_v25, %v1933_v23  ;;  %v2214_v23 = vld [vmem:[#allocation34 + $0x10] sm:$0xff] }
 0xde2   :  { %v1928_v28 = vadd.f32 %v1927_v26, %v1926_v24  ;;  %v1936_v29 = vrot.slane %v1935_v27, 2  ;;  %v4236_v24 = vld [vmem:[#allocation29 + $0x1] ss:$0 sm:$0xff] }
 0xde4   :  { %v1929_v30 = vrot.slane %v1928_v28, 1  ;;  %v1937_v31 = vadd.f32 %v1936_v29, %v1935_v27 }
 0xde6   :  { %v1930_v32 = vadd.f32 %v1929_v30, %v1928_v28  ;;  %v1938_v33 = vrot.slane %v1937_v31, 1 }
 0xde8   :  { %v1931_v34 = vmul.f32 0.125, %v1930_v32  ;;  %v1939_v35 = vadd.f32 %v1938_v33, %v1937_v31 }
 0xdea   :  { %v1940_v36 = vmul.f32 0.125, %v1939_v35  ;;  %v1941_v37 = vmul.f32 %v1931_v34, %v1931_v34  ;;  %v1944_v41 = vsub.f32 %v1919_v19, %v1931_v34 }
 0xdec   :  { %v1942_v38 = vsub.f32 %v1940_v36, %v1941_v37 }
 0xdee   :  { %v1943_v39 = vmax.f32 %v1942_v38, 0.0 }
 0xdf0   :  { %v1945_v40 = vadd.f32 1e-05, %v1943_v39 }
 0xdf2   :  { %4812 = vrsqrt.f32 %v1945_v40 }
 0xdfc   :  { %v4813_v42 = vpop.eup %4812 }
 0xdfd   :  { %v1947_v44 = vmul.f32 %v4813_v42, %v1944_v41 }
 0xdff   :  { %v1954_v46 = vmul.f32 %v4230_v43, %v1947_v44 }
 0xe01   :  { %v1961_v47 = vadd.f32 %v4231_v45, %v1954_v46 }
 0xe03   :  { %v6376_v48 = vadd.f32 %v1961_v47, %v6354_v2 }
 0xe05   :  { %4485 = vmatmul.mubr.msk.f32.vlgmr.msra.gmra.mrb[10].mxu0 %vm1592_vm3, %v6376_v48 }
 0xe06   :  { %4494 = vmatprep.mubr.msk.f32.mxu0 %vm5780_vm0, %v5781_v1  ;;  %4493 = vmatpush3.msra.mxu0 %v2214_v23 }
 0xe07   :  { %4651 = vmatprep.subr.bf16.mxu0 %v5779_v0 }
 0xed8   :  { %v2040_v51 = vpop.f32.mrb[10].mxu0 }
 0xed9   :  { %v2041_v52 = vadd.f32 %v4232_v50, %v2040_v51  ;;  %v4486_v53 = vpop.f32.mrb[11].mxu0 }
 0xedb   :  { %v2044_v54 = vmul.f32 0.01, %v2041_v52 }
 0xedd   :  { %v2045_v55 = vmax.f32 %v2041_v52, %v2044_v54  ;;  %v4238_v54 = vld [vmem:[#allocation32 + $0x1] ss:$0 sm:$0xff] }
 0xedf   :  { %v2048_v56 = vsel %vm1592_vm3, %v2045_v55, 0.0  ;;  %v2056_v2 = vmul.f32 %v2045_v55, %v2045_v55 }
 0xee0   :  { %v2049_v58 = vrot.slane %v2048_v56, 4 }
 0xee1   :  { %v2057_v59 = vsel %vm1592_vm3, %v2056_v2, 0.0 }
 0xee2   :  { %v2050_v60 = vadd.f32 %v2049_v58, %v2048_v56  ;;  %v2058_v61 = vrot.slane %v2057_v59, 4  ;;  %v4239_v56 = vld [vmem:[#allocation31 + $0x1] ss:$0 sm:$0xff] }
 0xee4   :  { %v2051_v62 = vrot.slane %v2050_v60, 2  ;;  %v2059_v63 = vadd.f32 %v2058_v61, %v2057_v59  ;;  %v2341_v59 = vld [vmem:[#allocation37] sm:$0xff] }
 0xee6   :  { %v2052_v6 = vadd.f32 %v2051_v62, %v2050_v60  ;;  %v2060_v3 = vrot.slane %v2059_v63, 2  ;;  %v4240_v60 = vld [vmem:[#allocation29 + $0x2] ss:$0 sm:$0xff] }
 0xee8   :  { %v2053_v4 = vrot.slane %v2052_v6, 1  ;;  %v2061_v5 = vadd.f32 %v2060_v3, %v2059_v63 }
 0xeea   :  { %v2054_v7 = vadd.f32 %v2053_v4, %v2052_v6  ;;  %v2062_v8 = vrot.slane %v2061_v5, 1 }
 0xeec   :  { %v2055_v9 = vmul.f32 0.125, %v2054_v7  ;;  %v2063_v10 = vadd.f32 %v2062_v8, %v2061_v5 }
 0xeee   :  { %v2064_v11 = vmul.f32 0.125, %v2063_v10  ;;  %v2065_v12 = vmul.f32 %v2055_v9, %v2055_v9  ;;  %v2068_v17 = vsub.f32 %v2045_v55, %v2055_v9 }
 0xef0   :  { %v2066_v13 = vsub.f32 %v2064_v11, %v2065_v12 }
 0xef2   :  { %v2067_v14 = vmax.f32 %v2066_v13, 0.0 }
 0xef4   :  { %v2069_v15 = vadd.f32 1e-05, %v2067_v14 }
 0xef6   :  { %4814 = vrsqrt.f32 %v2069_v15 }
 0xf00   :  { %v4815_v16 = vpop.eup %4814 }
 0xf01   :  { %v2071_v19 = vmul.f32 %v4815_v16, %v2068_v17 }
 0xf03   :  { %v2078_v21 = vmul.f32 %v4234_v18, %v2071_v19 }
 0xf05   :  { %v2085_v22 = vadd.f32 %v4235_v20, %v2078_v21 }
 0xf07   :  { %4490 = vmatmul.mubr.msk.f32.vlgmr.msra.gmra.mrb[12].mxu1 %vm1592_vm3, %v2085_v22 }
 0xf08   :  { %4499 = vmatprep.mubr.msk.f32.mxu1 %vm5780_vm0, %v5781_v1  ;;  %4498 = vmatpush3.msra.mxu1 %v2341_v59 }
 0xf09   :  { %4654 = vmatprep.subr.bf16.mxu1 %v5779_v0 }
 0xfda   :  { %v2165_v25 = vpop.f32.mrb[12].mxu1 }
 0xfdb   :  { %v2166_v26 = vadd.f32 %v4236_v24, %v2165_v25  ;;  %v4491_v27 = vpop.f32.mrb[13].mxu1 }
 0xfdd   :  { %v2169_v28 = vmul.f32 0.01, %v2166_v26 }
 0xfdf   :  { %v2170_v29 = vmax.f32 %v2166_v26, %v2169_v28  ;;  %v4242_v28 = vld [vmem:[#allocation32 + $0x2] ss:$0 sm:$0xff] }
 0xfe1   :  { %v2175_v30 = vsel %vm1592_vm3, %v2170_v29, 0.0  ;;  %v2183_v31 = vmul.f32 %v2170_v29, %v2170_v29 }
 0xfe2   :  { %v2176_v32 = vrot.slane %v2175_v30, 4 }
 0xfe3   :  { %v2184_v33 = vsel %vm1592_vm3, %v2183_v31, 0.0 }
 0xfe4   :  { %v2177_v34 = vadd.f32 %v2176_v32, %v2175_v30  ;;  %v2185_v35 = vrot.slane %v2184_v33, 4  ;;  %v4243_v30 = vld [vmem:[#allocation31 + $0x2] ss:$0 sm:$0xff] }
 0xfe6   :  { %v2178_v36 = vrot.slane %v2177_v34, 2  ;;  %v2186_v37 = vadd.f32 %v2185_v35, %v2184_v33  ;;  %v2425_v35 = vld [vmem:[#allocation43 + $0x8] sm:$0xff] }
 0xfe8   :  { %v2179_v38 = vadd.f32 %v2178_v36, %v2177_v34  ;;  %v2187_v39 = vrot.slane %v2186_v37, 2  ;;  %v2424_v34 = vld [vmem:[#allocation43] sm:$0xff] }
 0xfe9   :  { %v4652_v36 = vpack.c.bf16 %v2425_v35, %v2424_v34 }
 0xfea   :  { %v2180_v40 = vrot.slane %v2179_v38, 1  ;;  %v2188_v41 = vadd.f32 %v2187_v39, %v2186_v37  ;;  %v4244_v37 = vld [vmem:[#allocation35] ss:$0 sm:$0xff] }
 0xfec   :  { %v2181_v42 = vadd.f32 %v2180_v40, %v2179_v38  ;;  %v2189_v43 = vrot.slane %v2188_v41, 1 }
 0xfee   :  { %v2182_v44 = vmul.f32 0.125, %v2181_v42  ;;  %v2190_v45 = vadd.f32 %v2189_v43, %v2188_v41  ;;  %v2550_v43 = vld [vmem:[#allocation43 + $0x18] sm:$0xff] }
 0xff0   :  { %v2191_v46 = vmul.f32 0.125, %v2190_v45  ;;  %v2192_v47 = vmul.f32 %v2182_v44, %v2182_v44  ;;  %v2195_v52 = vsub.f32 %v2170_v29, %v2182_v44  ;;  %v4246_v45 = vld [vmem:[#allocation38] ss:$0 sm:$0xff] }
 0xff2   :  { %v2193_v49 = vsub.f32 %v2191_v46, %v2192_v47 }
 0xff4   :  { %v2194_v50 = vmax.f32 %v2193_v49, 0.0 }
 0xff6   :  { %v2196_v51 = vadd.f32 1e-05, %v2194_v50 }
 0xff8   :  { %4816 = vrsqrt.f32 %v2196_v51 }
0x1002   :  { %v4817_v53 = vpop.eup %4816 }
0x1003   :  { %v2198_v55 = vmul.f32 %v4817_v53, %v2195_v52 }
0x1005   :  { %v2205_v2 = vmul.f32 %v4238_v54, %v2198_v55 }
0x1007   :  { %v2212_v58 = vadd.f32 %v4239_v56, %v2205_v2 }
0x1009   :  { %4495 = vmatmul.mubr.msk.f32.vlgmr.msra.gmra.mrb[12].mxu0 %vm1592_vm3, %v2212_v58 }
0x100a   :  { %4506 = vmatprep.mubr.msk.f32.mxu0 %vm5780_vm0, %v5781_v1  ;;  %4653 = vmatpush3.bf16.msra.mxu0 %v4652_v36 }
0x100b   :  { %4657 = vmatprep.subr.bf16.mxu0 %v5779_v0 }
0x10dc   :  { %v2292_v61 = vpop.f32.mrb[12].mxu0 }
0x10dd   :  { %v2293_v62 = vadd.f32 %v4240_v60, %v2292_v61  ;;  %v4496_v63 = vpop.f32.mrb[13].mxu0 }
0x10df   :  { %v2296_v6 = vmul.f32 0.01, %v2293_v62 }
0x10e1   :  { %v2297_v3 = vmax.f32 %v2293_v62, %v2296_v6 }
0x10e3   :  { %v2302_v4 = vsel %vm1592_vm3, %v2297_v3, 0.0  ;;  %v2310_v5 = vmul.f32 %v2297_v3, %v2297_v3 }
0x10e4   :  { %v2303_v7 = vrot.slane %v2302_v4, 4 }
0x10e5   :  { %v2311_v8 = vsel %vm1592_vm3, %v2310_v5, 0.0 }
0x10e6   :  { %v2304_v9 = vadd.f32 %v2303_v7, %v2302_v4  ;;  %v2312_v10 = vrot.slane %v2311_v8, 4 }
0x10e8   :  { %v2305_v11 = vrot.slane %v2304_v9, 2  ;;  %v2313_v12 = vadd.f32 %v2312_v10, %v2311_v8 }
0x10ea   :  { %v2306_v13 = vadd.f32 %v2305_v11, %v2304_v9  ;;  %v2314_v14 = vrot.slane %v2313_v12, 2 }
0x10ec   :  { %v2307_v15 = vrot.slane %v2306_v13, 1  ;;  %v2315_v17 = vadd.f32 %v2314_v14, %v2313_v12  ;;  %v4248_v14 = vld [vmem:[#allocation41] ss:$0 sm:$0xff] }
0x10ee   :  { %v2308_v16 = vadd.f32 %v2307_v15, %v2306_v13  ;;  %v2316_v18 = vrot.slane %v2315_v17, 1 }
0x10f0   :  { %v2309_v19 = vmul.f32 0.125, %v2308_v16  ;;  %v2317_v20 = vadd.f32 %v2316_v18, %v2315_v17  ;;  %v4249_v17 = vld [vmem:[#allocation40] ss:$0 sm:$0xff] }
0x10f2   :  { %v2318_v21 = vmul.f32 0.125, %v2317_v20  ;;  %v2319_v22 = vmul.f32 %v2309_v19, %v2309_v19  ;;  %v2322_v26 = vsub.f32 %v2297_v3, %v2309_v19  ;;  %v2677_v19 = vld [vmem:[#allocation43 + $0x20] sm:$0xff]  ;;  %v2678_v20 = vld [vmem:[#allocation43 + $0x28] sm:$0xff] }
0x10f4   :  { %v2320_v23 = vsub.f32 %v2318_v21, %v2319_v22  ;;  %v4658_v21 = vpack.c.bf16 %v2678_v20, %v2677_v19  ;;  %v4250_v22 = vld [vmem:[#allocation38 + $0x1] ss:$0 sm:$0xff] }
0x10f6   :  { %v2321_v24 = vmax.f32 %v2320_v23, 0.0 }
0x10f8   :  { %v2323_v25 = vadd.f32 1e-05, %v2321_v24 }
0x10fa   :  { %4818 = vrsqrt.f32 %v2323_v25 }
0x1104   :  { %v4819_v27 = vpop.eup %4818 }
0x1105   :  { %v2325_v29 = vmul.f32 %v4819_v27, %v2322_v26 }
0x1107   :  { %v2332_v31 = vmul.f32 %v4242_v28, %v2325_v29 }
0x1109   :  { %v2339_v32 = vadd.f32 %v4243_v30, %v2332_v31 }
0x110b   :  { %v2340_v33 = vadd.f32 %v2339_v32, %v6376_v48  ;;  %v2549_v48 = vld [vmem:[#allocation43 + $0x10] sm:$0xff] }
0x110c   :  { %v4655_v44 = vpack.c.bf16 %v2550_v43, %v2549_v48 }
0x110d   :  { %4500 = vmatmul.mubr.msk.f32.vlgmr.msra.gmra.mrb[14].mxu1 %vm1592_vm3, %v2340_v33 }
0x110e   :  { %4513 = vmatprep.mubr.msk.f32.mxu1 %vm5780_vm0, %v5781_v1  ;;  %4656 = vmatpush3.bf16.msra.mxu1 %v4655_v44 }
0x110f   :  { %4660 = vmatprep.subr.bf16.mxu1 %v5779_v0 }
0x11e0   :  { %v2418_v38 = vpop.f32.mrb[14].mxu1 }
0x11e1   :  { %v2419_v39 = vadd.f32 %v4244_v37, %v2418_v38  ;;  %v4501_v40 = vpop.f32.mrb[15].mxu1 }
0x11e3   :  { %v2422_v41 = vmul.f32 0.01, %v2419_v39 }
0x11e5   :  { %v6402_v42 = vmax.f32 %v2419_v39, %v2422_v41 }
0x11e7   :  { %4507 = vmatmul.mubr.msk.f32.vlgmr.msra.gmra.mrb[14].mxu0 %vm745_vm2, %v6402_v42 }
0x11e8   :  { %4520 = vmatprep.mubr.msk.f32.mxu0 %vm5780_vm0, %v5781_v1  ;;  %4659 = vmatpush3.bf16.msra.mxu0 %v4658_v21 }
0x11e9   :  { %4663 = vmatprep.subr.bf16.mxu0 %v5779_v0 }
0x12ba   :  { %v2502_v46 = vpop.f32.mrb[14].mxu0 }
0x12bb   :  { %v2503_v47 = vadd.f32 %v4246_v45, %v2502_v46  ;;  %v4508_v49 = vpop.f32.mrb[15].mxu0 }
0x12bd   :  { %v2506_v50 = vmul.f32 0.01, %v2503_v47 }
0x12bf   :  { %v2507_v51 = vmax.f32 %v2503_v47, %v2506_v50 }
0x12c1   :  { %v2510_v52 = vsel %vm745_vm2, %v2507_v51, 0.0  ;;  %v2518_v53 = vmul.f32 %v2507_v51, %v2507_v51 }
0x12c2   :  { %v2511_v54 = vrot.slane %v2510_v52, 4 }
0x12c3   :  { %v2519_v55 = vsel %vm745_vm2, %v2518_v53, 0.0 }
0x12c4   :  { %v2512_v56 = vadd.f32 %v2511_v54, %v2510_v52  ;;  %v2520_v2 = vrot.slane %v2519_v55, 4  ;;  %v4252_v52 = vld [vmem:[#allocation41 + $0x1] ss:$0 sm:$0xff]  ;;  %v4253_v54 = vld [vmem:[#allocation40 + $0x1] ss:$0 sm:$0xff] }
0x12c6   :  { %v2513_v58 = vrot.slane %v2512_v56, 2  ;;  %v2521_v59 = vadd.f32 %v2520_v2, %v2519_v55  ;;  %v2805_v2 = vld [vmem:[%s6601_s28] sm:$0xff] }
0x12c8   :  { %v2514_v60 = vadd.f32 %v2513_v58, %v2512_v56  ;;  %v2522_v61 = vrot.slane %v2521_v59, 2  ;;  %v2806_v58 = vld [vmem:[%s6601_s28 + $0x8] sm:$0xff] }
0x12ca   :  { %v2515_v62 = vrot.slane %v2514_v60, 1  ;;  %v2523_v63 = vadd.f32 %v2522_v61, %v2521_v59  ;;  %v4661_v59 = vpack.c.bf16 %v2806_v58, %v2805_v2 }
0x12cc   :  { %v2516_v6 = vadd.f32 %v2515_v62, %v2514_v60  ;;  %v2524_v3 = vrot.slane %v2523_v63, 1  ;;  %v4254_v60 = vld [vmem:[#allocation38 + $0x2] ss:$0 sm:$0xff] }
0x12ce   :  { %v2517_v4 = vmul.f32 0.125, %v2516_v6  ;;  %v2525_v5 = vadd.f32 %v2524_v3, %v2523_v63 }
0x12d0   :  { %v2526_v7 = vmul.f32 0.125, %v2525_v5  ;;  %v2527_v8 = vmul.f32 %v2517_v4, %v2517_v4  ;;  %v2530_v12 = vsub.f32 %v2507_v51, %v2517_v4 }
0x12d2   :  { %v2528_v9 = vsub.f32 %v2526_v7, %v2527_v8 }
0x12d4   :  { %v2529_v10 = vmax.f32 %v2528_v9, 0.0 }
0x12d6   :  { %v2531_v11 = vadd.f32 1e-05, %v2529_v10 }
0x12d8   :  { %4820 = vrsqrt.f32 %v2531_v11 }
0x12e2   :  { %v4821_v13 = vpop.eup %4820 }
0x12e3   :  { %v2533_v15 = vmul.f32 %v4821_v13, %v2530_v12 }
0x12e5   :  { %v2540_v16 = vmul.f32 %v4248_v14, %v2533_v15 }
0x12e7   :  { %v2547_v18 = vadd.f32 %v4249_v17, %v2540_v16 }
0x12e9   :  { %4514 = vmatmul.mubr.msk.f32.vlgmr.msra.gmra.mrb[16].mxu1 %vm745_vm2, %v2547_v18 }
0x12ea   :  { %4527 = vmatprep.mubr.msk.f32.mxu1 %vm5780_vm0, %v5781_v1  ;;  %4662 = vmatpush3.bf16.msra.mxu1 %v4661_v59 }
0x12eb   :  { %4666 = vmatprep.subr.bf16.mxu1 %v5779_v0 }
0x13bc   :  { %v2628_v23 = vpop.f32.mrb[16].mxu1 }
0x13bd   :  { %v2629_v24 = vadd.f32 %v4250_v22, %v2628_v23  ;;  %v4515_v25 = vpop.f32.mrb[17].mxu1 }
0x13bf   :  { %v2632_v26 = vmul.f32 0.01, %v2629_v24 }
0x13c1   :  { %v2633_v27 = vmax.f32 %v2629_v24, %v2632_v26 }
0x13c3   :  { %v2638_v28 = vsel %vm745_vm2, %v2633_v27, 0.0  ;;  %v2646_v29 = vmul.f32 %v2633_v27, %v2633_v27 }
0x13c4   :  { %v2639_v30 = vrot.slane %v2638_v28, 4 }
0x13c5   :  { %v2647_v31 = vsel %vm745_vm2, %v2646_v29, 0.0 }
0x13c6   :  { %v2640_v32 = vadd.f32 %v2639_v30, %v2638_v28  ;;  %v2648_v33 = vrot.slane %v2647_v31, 4  ;;  %v4256_v28 = vld [vmem:[#allocation41 + $0x2] ss:$0 sm:$0xff]  ;;  %v4257_v30 = vld [vmem:[#allocation40 + $0x2] ss:$0 sm:$0xff] }
0x13c8   :  { %v2641_v34 = vrot.slane %v2640_v32, 2  ;;  %v2649_v35 = vadd.f32 %v2648_v33, %v2647_v31 }
0x13ca   :  { %v2642_v36 = vadd.f32 %v2641_v34, %v2640_v32  ;;  %v2650_v37 = vrot.slane %v2649_v35, 2  ;;  %v4262_v34 = vld [vmem:[%s6601_s28 + $0x10] sm:$0xff] }
0x13cc   :  { %v2643_v38 = vrot.slane %v2642_v36, 1  ;;  %v2651_v39 = vadd.f32 %v2650_v37, %v2649_v35  ;;  %v4263_v35 = vld [vmem:[%s6601_s28 + $0x18] sm:$0xff]  ;;  %v4258_v37 = vld [vmem:[#allocation44] ss:$0 sm:$0xff] }
0x13ce   :  { %v2644_v40 = vadd.f32 %v2643_v38, %v2642_v36  ;;  %v2652_v41 = vrot.slane %v2651_v39, 1  ;;  %v4664_v36 = vpack.c.bf16 %v4263_v35, %v4262_v34 }
0x13d0   :  { %v2645_v48 = vmul.f32 0.125, %v2644_v40  ;;  %v2653_v43 = vadd.f32 %v2652_v41, %v2651_v39 }
0x13d2   :  { %v2654_v44 = vmul.f32 0.125, %v2653_v43  ;;  %v2655_v45 = vmul.f32 %v2645_v48, %v2645_v48  ;;  %v2658_v50 = vsub.f32 %v2633_v27, %v2645_v48 }
0x13d4   :  { %v2656_v46 = vsub.f32 %v2654_v44, %v2655_v45 }
0x13d6   :  { %v2657_v47 = vmax.f32 %v2656_v46, 0.0 }
0x13d8   :  { %v2659_v49 = vadd.f32 1e-05, %v2657_v47 }
0x13da   :  { %4822 = vrsqrt.f32 %v2659_v49 }
0x13e4   :  { %v4823_v51 = vpop.eup %4822 }
0x13e5   :  { %v2661_v53 = vmul.f32 %v4823_v51, %v2658_v50 }
0x13e7   :  { %v2668_v55 = vmul.f32 %v4252_v52, %v2661_v53 }
0x13e9   :  { %v2675_v56 = vadd.f32 %v4253_v54, %v2668_v55 }
0x13eb   :  { %4521 = vmatmul.mubr.msk.f32.vlgmr.msra.gmra.mrb[16].mxu0 %vm745_vm2, %v2675_v56 }
0x13ec   :  { %4534 = vmatprep.mubr.msk.f32.mxu0 %vm5780_vm0, %v5781_v1  ;;  %4665 = vmatpush3.bf16.msra.mxu0 %v4664_v36 }
0x13ed   :  { %4669 = vmatprep.subr.bf16.mxu0 %v5779_v0 }
0x14be   :  { %v2756_v61 = vpop.f32.mrb[16].mxu0 }
0x14bf   :  { %v2757_v62 = vadd.f32 %v4254_v60, %v2756_v61  ;;  %v4522_v63 = vpop.f32.mrb[17].mxu0 }
0x14c1   :  { %v2760_v6 = vmul.f32 0.01, %v2757_v62 }
0x14c3   :  { %v2761_v3 = vmax.f32 %v2757_v62, %v2760_v6 }
0x14c5   :  { %v2766_v4 = vsel %vm745_vm2, %v2761_v3, 0.0  ;;  %v2774_v5 = vmul.f32 %v2761_v3, %v2761_v3 }
0x14c6   :  { %v2767_v7 = vrot.slane %v2766_v4, 4 }
0x14c7   :  { %v2775_v8 = vsel %vm745_vm2, %v2774_v5, 0.0 }
0x14c8   :  { %v2768_v9 = vadd.f32 %v2767_v7, %v2766_v4  ;;  %v2776_v10 = vrot.slane %v2775_v8, 4  ;;  %v4260_v4 = vld [vmem:[#allocation47] ss:$0 sm:$0xff]  ;;  %v3188_v7 = vld [vmem:[#allocation49 + $0x10] sm:$0xff] }
0x14ca   :  { %v2769_v11 = vrot.slane %v2768_v9, 2  ;;  %v2777_v12 = vadd.f32 %v2776_v10, %v2775_v8  ;;  %v3189_v8 = vld [vmem:[#allocation49 + $0x18] sm:$0xff] }
0x14cc   :  { %v2770_v13 = vadd.f32 %v2769_v11, %v2768_v9  ;;  %v2778_v14 = vrot.slane %v2777_v12, 2  ;;  %v4261_v9 = vld [vmem:[#allocation46] ss:$0 sm:$0xff]  ;;  %v4670_v11 = vpack.c.bf16 %v3189_v8, %v3188_v7 }
0x14ce   :  { %v2771_v15 = vrot.slane %v2770_v13, 1  ;;  %v2779_v17 = vadd.f32 %v2778_v14, %v2777_v12  ;;  %v4269_v14 = vld [vmem:[%s6601_s28 + $0x28] sm:$0xff] }
0x14d0   :  { %v2772_v16 = vadd.f32 %v2771_v15, %v2770_v13  ;;  %v2780_v18 = vrot.slane %v2779_v17, 1  ;;  %v4268_v13 = vld [vmem:[%s6601_s28 + $0x20] sm:$0xff] }
0x14d1   :  { %v4667_v15 = vpack.c.bf16 %v4269_v14, %v4268_v13 }
0x14d2   :  { %v2773_v19 = vmul.f32 0.125, %v2772_v16  ;;  %v2781_v20 = vadd.f32 %v2780_v18, %v2779_v17  ;;  %v4264_v17 = vld [vmem:[#allocation44 + $0x1] ss:$0 sm:$0xff] }
0x14d4   :  { %v2782_v21 = vmul.f32 0.125, %v2781_v20  ;;  %v2783_v22 = vmul.f32 %v2773_v19, %v2773_v19  ;;  %v2786_v26 = vsub.f32 %v2761_v3, %v2773_v19 }
0x14d6   :  { %v2784_v23 = vsub.f32 %v2782_v21, %v2783_v22 }
0x14d8   :  { %v2785_v24 = vmax.f32 %v2784_v23, 0.0 }
0x14da   :  { %v2787_v25 = vadd.f32 1e-05, %v2785_v24 }
0x14dc   :  { %4824 = vrsqrt.f32 %v2787_v25 }
0x14e6   :  { %v4825_v27 = vpop.eup %4824 }
0x14e7   :  { %v2789_v29 = vmul.f32 %v4825_v27, %v2786_v26 }
0x14e9   :  { %v2796_v31 = vmul.f32 %v4256_v28, %v2789_v29 }
0x14eb   :  { %v2803_v32 = vadd.f32 %v4257_v30, %v2796_v31 }
0x14ed   :  { %v6426_v33 = vadd.f32 %v2803_v32, %v6402_v42 }
0x14ef   :  { %4528 = vmatmul.mubr.msk.f32.vlgmr.msra.gmra.mrb[18].mxu1 %vm745_vm2, %v6426_v33 }
0x14f0   :  { %4541 = vmatprep.mubr.msk.f32.mxu1 %vm5780_vm0, %v5781_v1  ;;  %4668 = vmatpush3.bf16.msra.mxu1 %v4667_v15 }
0x14f1   :  { %4672 = vmatprep.subr.bf16.mxu1 %v5779_v0 }
0x15c2   :  { %v2883_v38 = vpop.f32.mrb[18].mxu1 }
0x15c3   :  { %v2884_v39 = vadd.f32 %v4258_v37, %v2883_v38  ;;  %v4529_v40 = vpop.f32.mrb[19].mxu1 }
0x15c5   :  { %v2887_v41 = vmul.f32 0.01, %v2884_v39 }
0x15c7   :  { %v2888_v48 = vmax.f32 %v2884_v39, %v2887_v41 }
0x15c9   :  { %v2891_v42 = vsel %vm745_vm2, %v2888_v48, 0.0  ;;  %v2899_v43 = vmul.f32 %v2888_v48, %v2888_v48 }
0x15ca   :  { %v2892_v44 = vrot.slane %v2891_v42, 4 }
0x15cb   :  { %v2900_v45 = vsel %vm745_vm2, %v2899_v43, 0.0 }
0x15cc   :  { %v2893_v46 = vadd.f32 %v2892_v44, %v2891_v42  ;;  %v2901_v47 = vrot.slane %v2900_v45, 4 }
0x15ce   :  { %v2894_v49 = vrot.slane %v2893_v46, 2  ;;  %v2902_v50 = vadd.f32 %v2901_v47, %v2900_v45 }
0x15d0   :  { %v2895_v51 = vadd.f32 %v2894_v49, %v2893_v46  ;;  %v2903_v52 = vrot.slane %v2902_v50, 2  ;;  %v4266_v46 = vld [vmem:[#allocation47 + $0x1] ss:$0 sm:$0xff]  ;;  %v4267_v49 = vld [vmem:[#allocation46 + $0x1] ss:$0 sm:$0xff] }
0x15d2   :  { %v2896_v53 = vrot.slane %v2895_v51, 1  ;;  %v2904_v54 = vadd.f32 %v2903_v52, %v2902_v50  ;;  %v3186_v52 = vld [vmem:[#allocation49] sm:$0xff] }
0x15d4   :  { %v2897_v55 = vadd.f32 %v2896_v53, %v2895_v51  ;;  %v2905_v56 = vrot.slane %v2904_v54, 1  ;;  %v3187_v53 = vld [vmem:[#allocation49 + $0x8] sm:$0xff] }
0x15d6   :  { %v2898_v2 = vmul.f32 0.125, %v2897_v55  ;;  %v2906_v58 = vadd.f32 %v2905_v56, %v2904_v54  ;;  %v4673_v54 = vpack.c.bf16 %v3187_v53, %v3186_v52  ;;  %v4270_v55 = vld [vmem:[#allocation44 + $0x2] ss:$0 sm:$0xff] }
0x15d8   :  { %v2907_v59 = vmul.f32 0.125, %v2906_v58  ;;  %v2908_v60 = vmul.f32 %v2898_v2, %v2898_v2  ;;  %v2911_v6 = vsub.f32 %v2888_v48, %v2898_v2 }
0x15da   :  { %v2909_v61 = vsub.f32 %v2907_v59, %v2908_v60 }
0x15dc   :  { %v2910_v62 = vmax.f32 %v2909_v61, 0.0 }
0x15de   :  { %v2912_v63 = vadd.f32 1e-05, %v2910_v62 }
0x15e0   :  { %4826 = vrsqrt.f32 %v2912_v63 }
0x15ea   :  { %v4827_v3 = vpop.eup %4826 }
0x15eb   :  { %v2914_v5 = vmul.f32 %v4827_v3, %v2911_v6 }
0x15ed   :  { %v2921_v10 = vmul.f32 %v4260_v4, %v2914_v5 }
0x15ef   :  { %v2928_v12 = vadd.f32 %v4261_v9, %v2921_v10 }
0x15f1   :  { %4535 = vmatmul.mubr.msk.f32.vlgmr.msra.gmra.mrb[18].mxu0 %vm745_vm2, %v2928_v12 }
0x15f2   :  { %4671 = vmatpush3.bf16.msra.mxu0 %v4670_v11  ;;  %4548 = vmatprep.mubr.msk.f32.mxu0 %vm5780_vm0, %v5781_v1 }
0x15f3   :  { %4675 = vmatprep.subr.bf16.mxu0 %v5779_v0 }
0x15f5   :  { %4549 = vmatmul.mubr.msk.f32.vlgmr.msra.gmra.mrb[20].mxu0 %vm745_vm2, %v6347_v57 }
0x15f6   :  { %4566 = vmatprep.mubr.msk.f32.mxu0 %vm5780_vm0, %v5781_v1 }
0x16c4   :  { %v3009_v16 = vpop.f32.mrb[18].mxu0 }
0x16c5   :  { %v3010_v18 = vadd.f32 %v4264_v17, %v3009_v16  ;;  %v4536_v19 = vpop.f32.mrb[19].mxu0 }
0x16c7   :  { %v3013_v20 = vmul.f32 0.01, %v3010_v18 }
0x16c8   :  { %v6448_v21 = vpop.f32.mrb[20].mxu0 }
0x16c9   :  { %v3014_v22 = vmax.f32 %v3010_v18, %v3013_v20  ;;  %v4550_v23 = vpop.f32.mrb[21].mxu0 }
0x16cb   :  { %v3019_v57 = vsel %vm745_vm2, %v3014_v22, 0.0  ;;  %v3027_v24 = vmul.f32 %v3014_v22, %v3014_v22 }
0x16cc   :  { %v3020_v25 = vrot.slane %v3019_v57, 4 }
0x16cd   :  { %v3028_v26 = vsel %vm745_vm2, %v3027_v24, 0.0 }
0x16ce   :  { %v3021_v27 = vadd.f32 %v3020_v25, %v3019_v57  ;;  %v3029_v28 = vrot.slane %v3028_v26, 4  ;;  %v4272_v57 = vld [vmem:[#allocation47 + $0x2] ss:$0 sm:$0xff]  ;;  %v4273_v25 = vld [vmem:[#allocation46 + $0x2] ss:$0 sm:$0xff] }
0x16d0   :  { %v3022_v29 = vrot.slane %v3021_v27, 2  ;;  %v3030_v30 = vadd.f32 %v3029_v28, %v3028_v26 }
0x16d2   :  { %v3023_v31 = vadd.f32 %v3022_v29, %v3021_v27  ;;  %v3031_v32 = vrot.slane %v3030_v30, 2  ;;  %v3343_v29 = vld [vmem:[#allocation55] sm:$0xff] }
0x16d4   :  { %v3024_v34 = vrot.slane %v3023_v31, 1  ;;  %v3032_v35 = vadd.f32 %v3031_v32, %v3030_v30  ;;  %v3344_v30 = vld [vmem:[#allocation55 + $0x8] sm:$0xff]  ;;  %v3345_v32 = vld [vmem:[#allocation55 + $0x10] sm:$0xff] }
0x16d6   :  { %v3025_v36 = vadd.f32 %v3024_v34, %v3023_v31  ;;  %v3033_v37 = vrot.slane %v3032_v35, 1  ;;  %v4676_v31 = vpack.c.bf16 %v3344_v30, %v3343_v29  ;;  %v3346_v34 = vld [vmem:[#allocation55 + $0x18] sm:$0xff] }
0x16d8   :  { %v3026_v38 = vmul.f32 0.125, %v3025_v36  ;;  %v3034_v39 = vadd.f32 %v3033_v37, %v3032_v35  ;;  %4677 = vmatpush3.bf16.msra.mxu0 %v4676_v31  ;;  %v4679_v35 = vpack.c.bf16 %v3346_v34, %v3345_v32  ;;  %v4276_v37 = vld [vmem:[%s6602_s9] ss:$0 sm:$0xff] }
0x16d9   :  { %4678 = vmatprep.subr.bf16.mxu0 %v5779_v0 }
0x16da   :  { %v3035_v40 = vmul.f32 0.125, %v3034_v39  ;;  %v3036_v41 = vmul.f32 %v3026_v38, %v3026_v38  ;;  %v3039_v44 = vsub.f32 %v3014_v22, %v3026_v38 }
0x16dc   :  { %v3037_v48 = vsub.f32 %v3035_v40, %v3036_v41  ;;  %4680 = vmatpush3.bf16.msra.mxu0 %v4679_v35 }
0x16dd   :  { %4687 = vmatprep.subr.bf16.mxu0 %v5779_v0 }
0x16de   :  { %v3038_v42 = vmax.f32 %v3037_v48, 0.0  ;;  %v3470_v48 = vld [vmem:[#allocation55 + $0x20] sm:$0xff] }
0x16e0   :  { %v3040_v43 = vadd.f32 1e-05, %v3038_v42  ;;  %v3471_v42 = vld [vmem:[#allocation55 + $0x28] sm:$0xff] }
0x16e2   :  { %4828 = vrsqrt.f32 %v3040_v43  ;;  %v4682_v43 = vpack.c.bf16 %v3471_v42, %v3470_v48 }
0x16ec   :  { %v4829_v45 = vpop.eup %4828 }
0x16ed   :  { %v3042_v47 = vmul.f32 %v4829_v45, %v3039_v44  ;;  %v3472_v44 = vld [vmem:[#allocation55 + $0x30] sm:$0xff]  ;;  %v3473_v45 = vld [vmem:[#allocation55 + $0x38] sm:$0xff] }
0x16ef   :  { %v3049_v50 = vmul.f32 %v4266_v46, %v3042_v47  ;;  %v4277_v46 = vld [vmem:[#allocation50] ss:$0 sm:$0xff] }
0x16f1   :  { %v3056_v51 = vadd.f32 %v4267_v49, %v3049_v50 }
0x16f3   :  { %4542 = vmatmul.mubr.msk.f32.vlgmr.msra.gmra.mrb[20].mxu1 %vm745_vm2, %v3056_v51 }
0x16f4   :  { %4555 = vmatprep.mubr.msk.f32.mxu1 %vm5780_vm0, %v5781_v1  ;;  %4674 = vmatpush3.bf16.msra.mxu1 %v4673_v54 }
0x16f5   :  { %4681 = vmatprep.subr.bf16.mxu1 %v5779_v0 }
0x17c6   :  { %v3137_v56 = vpop.f32.mrb[20].mxu1 }
0x17c7   :  { %v3138_v2 = vadd.f32 %v4270_v55, %v3137_v56  ;;  %v4543_v58 = vpop.f32.mrb[21].mxu1 }
0x17c9   :  { %v3141_v59 = vmul.f32 0.01, %v3138_v2 }
0x17cb   :  { %v3142_v60 = vmax.f32 %v3138_v2, %v3141_v59 }
0x17cd   :  { %v3147_v61 = vsel %vm745_vm2, %v3142_v60, 0.0  ;;  %v3155_v62 = vmul.f32 %v3142_v60, %v3142_v60 }
0x17ce   :  { %v3148_v63 = vrot.slane %v3147_v61, 4 }
0x17cf   :  { %v3156_v6 = vsel %vm745_vm2, %v3155_v62, 0.0 }
0x17d0   :  { %v3149_v3 = vadd.f32 %v3148_v63, %v3147_v61  ;;  %v3157_v4 = vrot.slane %v3156_v6, 4 }
0x17d2   :  { %v3150_v5 = vrot.slane %v3149_v3, 2  ;;  %v3158_v7 = vadd.f32 %v3157_v4, %v3156_v6 }
0x17d4   :  { %v3151_v8 = vadd.f32 %v3150_v5, %v3149_v3  ;;  %v3159_v9 = vrot.slane %v3158_v7, 2 }
0x17d6   :  { %v3152_v10 = vrot.slane %v3151_v8, 1  ;;  %v3160_v11 = vadd.f32 %v3159_v9, %v3158_v7 }
0x17d8   :  { %v3153_v12 = vadd.f32 %v3152_v10, %v3151_v8  ;;  %v3161_v13 = vrot.slane %v3160_v11, 1 }
0x17da   :  { %v3154_v14 = vmul.f32 0.125, %v3153_v12  ;;  %v3162_v15 = vadd.f32 %v3161_v13, %v3160_v11 }
0x17dc   :  { %v3163_v17 = vmul.f32 0.125, %v3162_v15  ;;  %v3164_v16 = vmul.f32 %v3154_v14, %v3154_v14  ;;  %v3167_v22 = vsub.f32 %v3142_v60, %v3154_v14  ;;  %v4279_v15 = vld [vmem:[#allocation53] ss:$0 sm:$0xff] }
0x17de   :  { %v3165_v18 = vsub.f32 %v3163_v17, %v3164_v16  ;;  %v4280_v16 = vld [vmem:[#allocation52] ss:$0 sm:$0xff] }
0x17e0   :  { %v3166_v19 = vmax.f32 %v3165_v18, 0.0 }
0x17e2   :  { %v3168_v20 = vadd.f32 1e-05, %v3166_v19 }
0x17e4   :  { %4830 = vrsqrt.f32 %v3168_v20  ;;  %v3600_v20 = vld [vmem:[#allocation55 + $0x40] sm:$0xff] }
0x17ee   :  { %v4831_v23 = vpop.eup %4830 }
0x17ef   :  { %v3170_v24 = vmul.f32 %v4831_v23, %v3167_v22  ;;  %v3601_v22 = vld [vmem:[#allocation55 + $0x48] sm:$0xff] }
0x17f0   :  { %v4688_v23 = vpack.c.bf16 %v3601_v22, %v3600_v20 }
0x17f1   :  { %v3177_v26 = vmul.f32 %v4272_v57, %v3170_v24  ;;  %v3602_v57 = vld [vmem:[#allocation55 + $0x50] sm:$0xff]  ;;  %v3603_v24 = vld [vmem:[#allocation55 + $0x58] sm:$0xff] }
0x17f3   :  { %v3184_v27 = vadd.f32 %v4273_v25, %v3177_v26  ;;  %v4691_v25 = vpack.c.bf16 %v3603_v24, %v3602_v57  ;;  %v4281_v26 = vld [vmem:[#allocation50 + $0x1] ss:$0 sm:$0xff] }
0x17f5   :  { %v3185_v28 = vadd.f32 %v3184_v27, %v6426_v33 }
0x17f7   :  { %4556 = vmatmul.mubr.msk.f32.vlgmr.msra.gmra.mrb[22].mxu1 %vm745_vm2, %v3185_v28 }
0x17f8   :  { %4577 = vmatprep.mubr.msk.f32.mxu1 %vm5780_vm0, %v5781_v1  ;;  %4683 = vmatpush3.bf16.msra.mxu1 %v4682_v43 }
0x17f9   :  { %4684 = vmatprep.subr.bf16.mxu1 %v5779_v0 }
0x18ca   :  { %v3329_v36 = vpop.f32.mrb[22].mxu1 }
0x18cb   :  { %v3330_v33 = vadd.f32 %v3329_v36, %v6448_v21  ;;  %v4557_v38 = vpop.f32.mrb[23].mxu1  ;;  %v4685_v21 = vpack.c.bf16 %v3473_v45, %v3472_v44 }
0x18cd   :  { %v3340_v39 = vadd.f32 %v4276_v37, %v3330_v33  ;;  %4686 = vmatpush3.bf16.msra.mxu1 %v4685_v21 }
0x18ce   :  { %4693 = vmatprep.subr.bf16.mxu1 %v5779_v0 }
0x18cf   :  { %v3341_v40 = vmul.f32 0.01, %v3340_v39 }
0x18d1   :  { %v6466_v41 = vmax.f32 %v3340_v39, %v3341_v40 }
0x18d3   :  { %4567 = vmatmul.mubr.msk.f32.vlgmr.msra.gmra.mrb[22].mxu0 %vm660_vm1, %v6466_v41 }
0x18d4   :  { %4588 = vmatprep.mubr.msk.f32.mxu0 %vm5780_vm0, %v5781_v1  ;;  %4689 = vmatpush3.bf16.msra.mxu0 %v4688_v23 }
0x18d5   :  { %4690 = vmatprep.subr.bf16.mxu0 %v5779_v0 }
0x18d8   :  { %4692 = vmatpush3.bf16.msra.mxu0 %v4691_v25 }
0x18d9   :  { %4699 = vmatprep.subr.bf16.mxu0 %v5779_v0 }
0x19a6   :  { %v3423_v47 = vpop.f32.mrb[22].mxu0 }
0x19a7   :  { %v3424_v49 = vadd.f32 %v4277_v46, %v3423_v47  ;;  %v4568_v50 = vpop.f32.mrb[23].mxu0 }
0x19a9   :  { %v3427_v51 = vmul.f32 0.01, %v3424_v49 }
0x19ab   :  { %v3428_v52 = vmax.f32 %v3424_v49, %v3427_v51 }
0x19ad   :  { %v3431_v53 = vsel %vm660_vm1, %v3428_v52, 0.0  ;;  %v3439_v54 = vmul.f32 %v3428_v52, %v3428_v52 }
0x19ae   :  { %v3432_v55 = vrot.slane %v3431_v53, 4 }
0x19af   :  { %v3440_v56 = vsel %vm660_vm1, %v3439_v54, 0.0 }
0x19b0   :  { %v3433_v2 = vadd.f32 %v3432_v55, %v3431_v53  ;;  %v3441_v58 = vrot.slane %v3440_v56, 4  ;;  %v4283_v55 = vld [vmem:[#allocation53 + $0x1] ss:$0 sm:$0xff] }
0x19b2   :  { %v3434_v59 = vrot.slane %v3433_v2, 2  ;;  %v3442_v60 = vadd.f32 %v3441_v58, %v3440_v56 }
0x19b4   :  { %v3435_v61 = vadd.f32 %v3434_v59, %v3433_v2  ;;  %v3443_v62 = vrot.slane %v3442_v60, 2  ;;  %v4284_v2 = vld [vmem:[#allocation52 + $0x1] ss:$0 sm:$0xff] }
0x19b6   :  { %v3436_v63 = vrot.slane %v3435_v61, 1  ;;  %v3444_v6 = vadd.f32 %v3443_v62, %v3442_v60  ;;  %v3730_v60 = vld [vmem:[%s5991_s27] sm:$0xff] }
0x19b8   :  { %v3437_v3 = vadd.f32 %v3436_v63, %v3435_v61  ;;  %v3445_v4 = vrot.slane %v3444_v6, 1  ;;  %v3731_v61 = vld [vmem:[%s5991_s27 + $0x8] sm:$0xff]  ;;  %v3732_v63 = vld [vmem:[%s5991_s27 + $0x10] sm:$0xff] }
0x19b9   :  { %v4694_v62 = vpack.c.bf16 %v3731_v61, %v3730_v60 }
0x19ba   :  { %v3438_v5 = vmul.f32 0.125, %v3437_v3  ;;  %v3446_v7 = vadd.f32 %v3445_v4, %v3444_v6  ;;  %v3733_v6 = vld [vmem:[%s5991_s27 + $0x18] sm:$0xff]  ;;  %v4285_v4 = vld [vmem:[#allocation50 + $0x2] ss:$0 sm:$0xff] }
0x19bb   :  { %v4697_v3 = vpack.c.bf16 %v3733_v6, %v3732_v63 }
0x19bc   :  { %v3447_v8 = vmul.f32 0.125, %v3446_v7  ;;  %v3448_v9 = vmul.f32 %v3438_v5, %v3438_v5  ;;  %v3451_v13 = vsub.f32 %v3428_v52, %v3438_v5 }
0x19be   :  { %v3449_v10 = vsub.f32 %v3447_v8, %v3448_v9 }
0x19c0   :  { %v3450_v11 = vmax.f32 %v3449_v10, 0.0 }
0x19c2   :  { %v3452_v12 = vadd.f32 1e-05, %v3450_v11 }
0x19c4   :  { %4832 = vrsqrt.f32 %v3452_v12 }
0x19ce   :  { %v4833_v14 = vpop.eup %4832 }
0x19cf   :  { %v3454_v17 = vmul.f32 %v4833_v14, %v3451_v13 }
0x19d1   :  { %v3461_v18 = vmul.f32 %v4279_v15, %v3454_v17 }
0x19d3   :  { %v3468_v19 = vadd.f32 %v4280_v16, %v3461_v18 }
0x19d5   :  { %4578 = vmatmul.mubr.msk.f32.vlgmr.msra.gmra.mrb[24].mxu1 %vm660_vm1, %v3468_v19 }
0x19d6   :  { %4599 = vmatprep.mubr.msk.f32.mxu1 %vm5780_vm0, %v5781_v1  ;;  %4695 = vmatpush3.bf16.msra.mxu1 %v4694_v62 }
0x19d7   :  { %4696 = vmatprep.subr.bf16.mxu1 %v5779_v0 }
0x19da   :  { %4698 = vmatpush3.bf16.msra.mxu1 %v4697_v3 }
0x19db   :  { %4705 = vmatprep.subr.bf16.mxu1 %v5779_v0 }
0x1aa8   :  { %v3551_v27 = vpop.f32.mrb[24].mxu1 }
0x1aa9   :  { %v3552_v28 = vadd.f32 %v4281_v26, %v3551_v27  ;;  %v4579_v29 = vpop.f32.mrb[25].mxu1 }
0x1aab   :  { %v3555_v30 = vmul.f32 0.01, %v3552_v28 }
0x1aad   :  { %v3556_v31 = vmax.f32 %v3552_v28, %v3555_v30 }
0x1aaf   :  { %v3561_v32 = vsel %vm660_vm1, %v3556_v31, 0.0  ;;  %v3569_v34 = vmul.f32 %v3556_v31, %v3556_v31 }
0x1ab0   :  { %v3562_v35 = vrot.slane %v3561_v32, 4 }
0x1ab1   :  { %v3570_v36 = vsel %vm660_vm1, %v3569_v34, 0.0 }
0x1ab2   :  { %v3563_v37 = vadd.f32 %v3562_v35, %v3561_v32  ;;  %v3571_v33 = vrot.slane %v3570_v36, 4  ;;  %v4287_v35 = vld [vmem:[#allocation53 + $0x2] ss:$0 sm:$0xff] }
0x1ab4   :  { %v3564_v38 = vrot.slane %v3563_v37, 2  ;;  %v3572_v39 = vadd.f32 %v3571_v33, %v3570_v36 }
0x1ab6   :  { %v3565_v40 = vadd.f32 %v3564_v38, %v3563_v37  ;;  %v3573_v48 = vrot.slane %v3572_v39, 2  ;;  %v4288_v37 = vld [vmem:[#allocation52 + $0x2] ss:$0 sm:$0xff] }
0x1ab8   :  { %v3566_v42 = vrot.slane %v3565_v40, 1  ;;  %v3574_v43 = vadd.f32 %v3573_v48, %v3572_v39  ;;  %v4294_v48 = vld [vmem:[%s5991_s27 + $0x28] sm:$0xff] }
0x1aba   :  { %v3567_v44 = vadd.f32 %v3566_v42, %v3565_v40  ;;  %v3575_v45 = vrot.slane %v3574_v43, 1  ;;  %v4293_v40 = vld [vmem:[%s5991_s27 + $0x20] sm:$0xff] }
0x1abb   :  { %v4700_v42 = vpack.c.bf16 %v4294_v48, %v4293_v40 }
0x1abc   :  { %v3568_v21 = vmul.f32 0.125, %v3567_v44  ;;  %v3576_v46 = vadd.f32 %v3575_v45, %v3574_v43  ;;  %v4295_v43 = vld [vmem:[%s5991_s27 + $0x30] sm:$0xff]  ;;  %v4296_v44 = vld [vmem:[%s5991_s27 + $0x38] sm:$0xff] }
0x1abd   :  { %v4703_v45 = vpack.c.bf16 %v4296_v44, %v4295_v43 }
0x1abe   :  { %v3577_v47 = vmul.f32 0.125, %v3576_v46  ;;  %v3578_v49 = vmul.f32 %v3568_v21, %v3568_v21  ;;  %v3581_v53 = vsub.f32 %v3556_v31, %v3568_v21  ;;  %v4289_v21 = vld [vmem:[#allocation56] ss:$0 sm:$0xff] }
0x1ac0   :  { %v3579_v50 = vsub.f32 %v3577_v47, %v3578_v49 }
0x1ac2   :  { %v3580_v51 = vmax.f32 %v3579_v50, 0.0 }
0x1ac4   :  { %v3582_v52 = vadd.f32 1e-05, %v3580_v51 }
0x1ac6   :  { %4834 = vrsqrt.f32 %v3582_v52 }
0x1ad0   :  { %v4835_v54 = vpop.eup %4834 }
0x1ad1   :  { %v3584_v56 = vmul.f32 %v4835_v54, %v3581_v53 }
0x1ad3   :  { %v3591_v58 = vmul.f32 %v4283_v55, %v3584_v56 }
0x1ad5   :  { %v3598_v59 = vadd.f32 %v4284_v2, %v3591_v58 }
0x1ad7   :  { %4589 = vmatmul.mubr.msk.f32.vlgmr.msra.gmra.mrb[24].mxu0 %vm660_vm1, %v3598_v59 }
0x1ad8   :  { %4610 = vmatprep.mubr.msk.f32.mxu0 %vm5780_vm0, %v5781_v1  ;;  %4701 = vmatpush3.bf16.msra.mxu0 %v4700_v42 }
0x1ad9   :  { %4702 = vmatprep.subr.bf16.mxu0 %v5779_v0 }
0x1adc   :  { %4704 = vmatpush3.bf16.msra.mxu0 %v4703_v45 }
0x1baa   :  { %v3681_v5 = vpop.f32.mrb[24].mxu0 }
0x1bab   :  { %v3682_v7 = vadd.f32 %v4285_v4, %v3681_v5  ;;  %v4590_v8 = vpop.f32.mrb[25].mxu0 }
0x1bad   :  { %v3685_v9 = vmul.f32 0.01, %v3682_v7 }
0x1baf   :  { %v3686_v10 = vmax.f32 %v3682_v7, %v3685_v9 }
0x1bb1   :  { %v3691_v11 = vsel %vm660_vm1, %v3686_v10, 0.0  ;;  %v3699_v12 = vmul.f32 %v3686_v10, %v3686_v10 }
0x1bb2   :  { %v3692_v13 = vrot.slane %v3691_v11, 4 }
0x1bb3   :  { %v3700_v14 = vsel %vm660_vm1, %v3699_v12, 0.0  ;;  %v4291_v12 = vld [vmem:[%s5986_s5] ss:$0 sm:$0xff] }
0x1bb4   :  { %v3693_v15 = vadd.f32 %v3692_v13, %v3691_v11  ;;  %v3701_v17 = vrot.slane %v3700_v14, 4 }
0x1bb6   :  { %v3694_v16 = vrot.slane %v3693_v15, 2  ;;  %v3702_v18 = vadd.f32 %v3701_v17, %v3700_v14  ;;  %v4292_v14 = vld [vmem:[%s5981_s12] ss:$0 sm:$0xff] }
0x1bb8   :  { %v3695_v19 = vadd.f32 %v3694_v16, %v3693_v15  ;;  %v3703_v20 = vrot.slane %v3702_v18, 2  ;;  %v4303_v16 = vld [vmem:[%s5991_s27 + $0x40] sm:$0xff] }
0x1bba   :  { %v3696_v22 = vrot.slane %v3695_v19, 1  ;;  %v3704_v23 = vadd.f32 %v3703_v20, %v3702_v18  ;;  %v4304_v18 = vld [vmem:[%s5991_s27 + $0x48] sm:$0xff]  ;;  %v4305_v20 = vld [vmem:[%s5991_s27 + $0x50] sm:$0xff] }
0x1bbc   :  { %v3697_v57 = vadd.f32 %v3696_v22, %v3695_v19  ;;  %v3705_v24 = vrot.slane %v3704_v23, 1  ;;  %v4706_v19 = vpack.c.bf16 %v4304_v18, %v4303_v16  ;;  %v4306_v22 = vld [vmem:[%s5991_s27 + $0x58] sm:$0xff]  ;;  %s5782_s27 = smov [#allocation58]  }
0x1bbd   :  { %s4124_s15 = sshll.u32 %s5782_s27, 4  ;;  %s4125_s15 = int_to_ptr.vmem [resolvable:$true] %s4124_s15 }
0x1bbe   :  { %v3698_v25 = vmul.f32 0.125, %v3697_v57  ;;  %v3706_v26 = vadd.f32 %v3705_v24, %v3704_v23  ;;  %v4709_v23 = vpack.c.bf16 %v4306_v22, %v4305_v20  ;;  %v4297_v57 = vld [vmem:[#allocation56 + $0x1] ss:$0 sm:$0xff]  ;;  %s5636_s14 = scalar_lea.vmem %s4125_s15, 128  ;;  %p5641_p9 = scmp.lt.s32.totalorder %s4125_s15, %s4125_s15 }
0x1bbf   :  { %p5637_p8 = scmp.ne.s32.totalorder %s4125_s15, %s5636_s14  ;;  %p5642_p10 = scmp.lt.s32.totalorder %s5636_s14, %s5636_s14 }
0x1bc0   :  { %v3707_v27 = vmul.f32 0.125, %v3706_v26  ;;  %v3708_v28 = vmul.f32 %v3698_v25, %v3698_v25  ;;  %v3711_v32 = vsub.f32 %v3686_v10, %v3698_v25 }
0x1bc1   :  { %p5643_p11 = por %p5642_p10, %p5641_p9 }
0x1bc2   :  { %v3709_v29 = vsub.f32 %v3707_v27, %v3708_v28 }
0x1bc3   :  { %p5644_p12 = pnand %p5643_p11, %p5637_p8 }
0x1bc4   :  { %v3710_v30 = vmax.f32 %v3709_v29, 0.0 }
0x1bc6   :  { %v3712_v31 = vadd.f32 1e-05, %v3710_v30 }
0x1bc8   :  { %4836 = vrsqrt.f32 %v3712_v31 }
0x1bd2   :  { %v4837_v34 = vpop.eup %4836 }
0x1bd3   :  { %v3714_v36 = vmul.f32 %v4837_v34, %v3711_v32 }
0x1bd5   :  { %v3721_v33 = vmul.f32 %v4287_v35, %v3714_v36 }
0x1bd7   :  { %v3728_v38 = vadd.f32 %v4288_v37, %v3721_v33 }
0x1bd9   :  { %v6495_v39 = vadd.f32 %v3728_v38, %v6466_v41 }
0x1bdb   :  { %4600 = vmatmul.mubr.msk.f32.vlgmr.msra.gmra.mrb[26].mxu1 %vm660_vm1, %v6495_v39 }
0x1bdc   :  { %4621 = vmatprep.mubr.msk.f32.mxu1 %vm5780_vm0, %v5781_v1  ;;  %4707 = vmatpush3.bf16.msra.mxu1 %v4706_v19 }
0x1bdd   :  { %4708 = vmatprep.subr.bf16.mxu1 %v5779_v0 }
0x1be0   :  { %4710 = vmatpush3.bf16.msra.mxu1 %v4709_v23 }
0x1cae   :  { %v3810_v46 = vpop.f32.mrb[26].mxu1 }
0x1caf   :  { %v3811_v41 = vadd.f32 %v4289_v21, %v3810_v46  ;;  %v4601_v47 = vpop.f32.mrb[27].mxu1 }
0x1cb1   :  { %v3814_v49 = vmul.f32 0.01, %v3811_v41 }
0x1cb3   :  { %v3815_v50 = vmax.f32 %v3811_v41, %v3814_v49 }
0x1cb5   :  { %v3818_v51 = vsel %vm660_vm1, %v3815_v50, 0.0  ;;  %v3826_v52 = vmul.f32 %v3815_v50, %v3815_v50 }
0x1cb6   :  { %v3819_v1 = vrot.slane %v3818_v51, 4 }
0x1cb7   :  { %v3827_v53 = vsel %vm660_vm1, %v3826_v52, 0.0 }
0x1cb8   :  { %v3820_v54 = vadd.f32 %v3819_v1, %v3818_v51  ;;  %v3828_v55 = vrot.slane %v3827_v53, 4  ;;  %v4301_v51 = vld [vmem:[%s5986_s5 + $0x1] ss:$0 sm:$0xff] }
0x1cb9   :  { %v4302_v1 = vld [vmem:[%s5981_s12 + $0x1] ss:$0 sm:$0xff] }
0x1cba   :  { %v3821_v56 = vrot.slane %v3820_v54, 2  ;;  %v3829_v2 = vadd.f32 %v3828_v55, %v3827_v53  ;;  %v4307_v55 = vld [vmem:[#allocation56 + $0x2] ss:$0 sm:$0xff] }
0x1cbc   :  { %v3822_v58 = vadd.f32 %v3821_v56, %v3820_v54  ;;  %v3830_v59 = vrot.slane %v3829_v2, 2 }
0x1cbe   :  { %v3823_v60 = vrot.slane %v3822_v58, 1  ;;  %v3831_v61 = vadd.f32 %v3830_v59, %v3829_v2 }
0x1cc0   :  { %v3824_v62 = vadd.f32 %v3823_v60, %v3822_v58  ;;  %v3832_v63 = vrot.slane %v3831_v61, 1 }
0x1cc2   :  { %v3825_v6 = vmul.f32 0.125, %v3824_v62  ;;  %v3833_v3 = vadd.f32 %v3832_v63, %v3831_v61 }
0x1cc4   :  { %v3834_v4 = vmul.f32 0.125, %v3833_v3  ;;  %v3835_v5 = vmul.f32 %v3825_v6, %v3825_v6  ;;  %v3838_v10 = vsub.f32 %v3815_v50, %v3825_v6 }
0x1cc6   :  { %v3836_v7 = vsub.f32 %v3834_v4, %v3835_v5 }
0x1cc8   :  { %v3837_v8 = vmax.f32 %v3836_v7, 0.0 }
0x1cca   :  { %v3839_v9 = vadd.f32 1e-05, %v3837_v8 }
0x1ccc   :  { %4838 = vrsqrt.f32 %v3839_v9 }
0x1cd6   :  { %v4839_v11 = vpop.eup %4838 }
0x1cd7   :  { %v3841_v13 = vmul.f32 %v4839_v11, %v3838_v10 }
0x1cd9   :  { %v3848_v15 = vmul.f32 %v4291_v12, %v3841_v13 }
0x1cdb   :  { %v3855_v17 = vadd.f32 %v4292_v14, %v3848_v15 }
0x1cdd   :  { %4611 = vmatmul.mubr.msk.f32.vlgmr.msra.gmra.mrb[26].mxu0 %vm660_vm1, %v3855_v17 }
0x1db0   :  { %v3938_v24 = vpop.f32.mrb[26].mxu0 }
0x1db1   :  { %v3939_v25 = vadd.f32 %v4297_v57, %v3938_v24  ;;  %v4612_v26 = vpop.f32.mrb[27].mxu0  ;;  %v4311_v57 = vld [vmem:[%s5986_s5 + $0x2] ss:$0 sm:$0xff] }
0x1db3   :  { %v3942_v27 = vmul.f32 0.01, %v3939_v25 }
0x1db5   :  { %v3943_v28 = vmax.f32 %v3939_v25, %v3942_v27  ;;  %v4312_v25 = vld [vmem:[%s5981_s12 + $0x2] ss:$0 sm:$0xff] }
0x1db7   :  { %v3948_v29 = vsel %vm660_vm1, %v3943_v28, 0.0  ;;  %v3956_v30 = vmul.f32 %v3943_v28, %v3943_v28 }
0x1db8   :  { %v3949_v31 = vrot.slane %v3948_v29, 4 }
0x1db9   :  { %v3957_v32 = vsel %vm660_vm1, %v3956_v30, 0.0 }
0x1dba   :  { %v3950_v34 = vadd.f32 %v3949_v31, %v3948_v29  ;;  %v3958_v35 = vrot.slane %v3957_v32, 4 }
0x1dbc   :  { %v3951_v36 = vrot.slane %v3950_v34, 2  ;;  %v3959_v0 = vadd.f32 %v3958_v35, %v3957_v32 }
0x1dbe   :  { %v3952_v37 = vadd.f32 %v3951_v36, %v3950_v34  ;;  %v3960_v33 = vrot.slane %v3959_v0, 2 }
0x1dc0   :  { %v3953_v38 = vrot.slane %v3952_v37, 1  ;;  %v3961_v40 = vadd.f32 %v3960_v33, %v3959_v0 }
0x1dc2   :  { %v3954_v48 = vadd.f32 %v3953_v38, %v3952_v37  ;;  %v3962_v42 = vrot.slane %v3961_v40, 1 }
0x1dc4   :  { %v3955_v43 = vmul.f32 0.125, %v3954_v48  ;;  %v3963_v44 = vadd.f32 %v3962_v42, %v3961_v40 }
0x1dc6   :  { %v3964_v45 = vmul.f32 0.125, %v3963_v44  ;;  %v3965_v21 = vmul.f32 %v3955_v43, %v3955_v43  ;;  %v3968_v49 = vsub.f32 %v3943_v28, %v3955_v43 }
0x1dc8   :  { %v3966_v46 = vsub.f32 %v3964_v45, %v3965_v21 }
0x1dca   :  { %v3967_v41 = vmax.f32 %v3966_v46, 0.0 }
0x1dcc   :  { %v3969_v47 = vadd.f32 1e-05, %v3967_v41 }
0x1dce   :  { %4840 = vrsqrt.f32 %v3969_v47 }
0x1dd8   :  { %v4841_v50 = vpop.eup %4840 }
0x1dd9   :  { %v3971_v52 = vmul.f32 %v4841_v50, %v3968_v49 }
0x1ddb   :  { %v3978_v53 = vmul.f32 %v4301_v51, %v3971_v52 }
0x1ddd   :  { %v3985_v54 = vadd.f32 %v4302_v1, %v3978_v53 }
0x1ddf   :  { %4622 = vmatmul.mubr.msk.f32.vlgmr.msra.gmra.mrb[28].mxu1 %vm660_vm1, %v3985_v54 }
0x1eb2   :  { %v4068_v56 = vpop.f32.mrb[28].mxu1 }
0x1eb3   :  { %v4069_v2 = vadd.f32 %v4307_v55, %v4068_v56  ;;  %v4623_v58 = vpop.f32.mrb[29].mxu1 }
0x1eb5   :  { %v4072_v59 = vmul.f32 0.01, %v4069_v2 }
0x1eb7   :  { %v4073_v60 = vmax.f32 %v4069_v2, %v4072_v59 }
0x1eb9   :  { %v4078_v61 = vsel %vm660_vm1, %v4073_v60, 0.0  ;;  %v4086_v62 = vmul.f32 %v4073_v60, %v4073_v60 }
0x1eba   :  { %v4079_v63 = vrot.slane %v4078_v61, 4 }
0x1ebb   :  { %v4087_v6 = vsel %vm660_vm1, %v4086_v62, 0.0 }
0x1ebc   :  { %v4080_v3 = vadd.f32 %v4079_v63, %v4078_v61  ;;  %v4088_v4 = vrot.slane %v4087_v6, 4 }
0x1ebe   :  { %v4081_v5 = vrot.slane %v4080_v3, 2  ;;  %v4089_v7 = vadd.f32 %v4088_v4, %v4087_v6 }
0x1ec0   :  { %v4082_v8 = vadd.f32 %v4081_v5, %v4080_v3  ;;  %v4090_v9 = vrot.slane %v4089_v7, 2 }
0x1ec2   :  { %v4083_v10 = vrot.slane %v4082_v8, 1  ;;  %v4091_v11 = vadd.f32 %v4090_v9, %v4089_v7 }
0x1ec4   :  { %v4084_v12 = vadd.f32 %v4083_v10, %v4082_v8  ;;  %v4092_v13 = vrot.slane %v4091_v11, 1 }
0x1ec6   :  { %v4085_v14 = vmul.f32 0.125, %v4084_v12  ;;  %v4093_v15 = vadd.f32 %v4092_v13, %v4091_v11 }
0x1ec8   :  { %v4094_v17 = vmul.f32 0.125, %v4093_v15  ;;  %v4095_v16 = vmul.f32 %v4085_v14, %v4085_v14  ;;  %v4098_v22 = vsub.f32 %v4073_v60, %v4085_v14 }
0x1eca   :  { %v4096_v18 = vsub.f32 %v4094_v17, %v4095_v16 }
0x1ecc   :  { %v4097_v19 = vmax.f32 %v4096_v18, 0.0 }
0x1ece   :  { %v4099_v20 = vadd.f32 1e-05, %v4097_v19 }
0x1ed0   :  { %4842 = vrsqrt.f32 %v4099_v20 }
0x1eda   :  { %v4843_v23 = vpop.eup %4842 }
0x1edb   :  { %v4101_v24 = vmul.f32 %v4843_v23, %v4098_v22 }
0x1edd   :  { %v4108_v26 = vmul.f32 %v4311_v57, %v4101_v24 }
0x1edf   :  { %v4115_v27 = vadd.f32 %v4312_v25, %v4108_v26 }
0x1ee1   :  { %v4116_v28 = vadd.f32 %v4115_v27, %v6495_v39 }
0x1ee3   :  { %4117 = vst.msk [vmem:[#allocation58] sm:$0xff] %vm660_vm1, %v4116_v28 }
0x1ee4   :  { %5647 = shalt.err (!%p5644_p12)
}
0x1ee5   :  { %s5648_s5 = scalar_lea.hbm %s5996_s13, 128 }
0x1ee6   :  { %p5649_p13 = scmp.ne.s32.totalorder %s5996_s13, %s5648_s5  ;;  %p5652_p0 = scmp.lt.u32.totalorder %s5648_s5, %s5996_s13 }
0x1ee8   :  { %p5654_p1 = pnand %p5652_p0, %p5649_p13 }
0x1eea   :  { %5657 = shalt.err (!%p5654_p1)
}
0x1eeb   :  { %4127 = dma.vmem_to_hbm [thread:$0]  %s4125_s15, 128, %s5996_s13, [#allocation4]  }
0x1eec   :  { %5696 = dma.done.wait [#allocation4], 128  }
0x1eed   :  { %5697 = vsyncadd [#allocation4], 4294967168 }
0x1eee   :  { %4131 = vsyncpa [#allocation3], 1 }
0x1eef   :  { %4132 = vsyncpa [#allocation6], 1 }
0x1ef0   :  { %4133 = vsyncpa [#allocation9], 1 }
0x1ef1   :  { %4134 = vsyncpa [#allocation12], 1 }
0x1ef2   :  { %4135 = vsyncpa [#allocation15], 1 }
0x1ef3   :  { %4136 = vsyncpa [#allocation18], 1 }
0x1ef4   :  { %4137 = vsyncpa [#allocation21], 1 }
0x1ef5   :  { %4138 = vsyncpa [#allocation24], 1 }
0x1ef6   :  { %4139 = vsyncpa [#allocation27], 1 }
0x1ef7   :  { %4140 = vsyncpa [#allocation30], 1 }
0x1ef8   :  { %4141 = vsyncpa [#allocation33], 1 }
0x1ef9   :  { %4142 = vsyncpa [#allocation36], 1 }
0x1efa   :  { %4143 = vsyncpa [#allocation39], 1 }
0x1efb   :  { %4144 = vsyncpa [#allocation42], 1 }
0x1efc   :  { %4145 = vsyncpa [#allocation45], 1 }
0x1efd   :  { %4146 = vsyncpa [#allocation48], 1 }
0x1efe   :  { %4147 = vsyncpa [#allocation51], 1 }
0x1eff   :  { %4148 = vsyncpa [#allocation54], 1 }
0x1f00   :  { %4149 = vsyncpa [#allocation57], 1 }
0x1f01   :  { %4150 = vsyncpa [#allocation4], 1 }

</bundles_post_ra>
